<compile_context>
chip_gen: v5e
topology: v5e:2x2
jax: 0.10.0
libtpu: 0.0.40
codegen_flags: <defaults>
</compile_context>

<pallas_src>
import functools

import jax
import jax.numpy as jnp
from jax.experimental import pallas as pl
from jax.experimental.pallas import tpu as pltpu


def _round_up(v, m):
    return (v + m - 1) // m * m


# ----------------------------------------------------------------------------
# Kernel
# ----------------------------------------------------------------------------
def _make_pg_kernel(*, L, F, C, dim, TT, H, G, Wa, T_real, num_tiles):
    """Fused prediction-stage kernel for one (batch, time-tile) grid step."""
    dils = [(2 ** (L - 1 - i), 2 ** i) for i in range(L)]

    def kernel(x_hbm, w_in, b_in, w_eff, b_eff, w_out, b_out,
               out_ref, x_vmem, shadow, dma_sem):
        n = pl.program_id(0)
        j = pl.program_id(1)
        slot = j % 2

        def fetch(jt, s):
            start = pl.multiple_of(jt * TT, 128)      # TT is a multiple of 128
            pltpu.make_async_copy(x_hbm.at[n, :, pl.ds(start, Wa)],
                                  x_vmem.at[s], dma_sem.at[s]).start()

        # Once per batch: zero the shadow guard bands (never written elsewhere,
        # scratch persists across grid steps) and prime the input double buffer.
        @pl.when(j == 0)
        def _():
            shadow[:, :G] = jnp.zeros((F, G), jnp.bfloat16)
            shadow[:, G + Wa:] = jnp.zeros((F, G), jnp.bfloat16)
            fetch(0, 0)

        # Wait for this tile's halo'd window (started at step j-1, or primed above).
        cur_start = pl.multiple_of(j * TT, 128)
        pltpu.make_async_copy(x_hbm.at[n, :, pl.ds(cur_start, Wa)],
                              x_vmem.at[slot], dma_sem.at[slot]).wait()

        # Prefetch the next tile's window so the DMA overlaps the compute below.
        @pl.when(j + 1 < num_tiles)
        def _():
            fetch(j + 1, 1 - slot)

        # Boundary handling: positions outside [0, T_real) must look like zeros to the
        # dilated taps (PyTorch per-conv zero padding).  Only tiles whose window crosses
        # a boundary need it; interior tiles skip all mask work.
        col = jax.lax.broadcasted_iota(jnp.int32, (1, Wa), 1)
        gpos = j * TT - H + col
        valid_b = ((gpos >= 0) & (gpos < T_real)).astype(jnp.bfloat16)
        needs_mask = (j * TT - H < 0) | (j * TT - H + Wa > T_real)

        def store_center(f32_vals):
            cvals = f32_vals.astype(jnp.bfloat16)
            shadow[:, G:G + Wa] = cvals

            @pl.when(needs_mask)
            def _():
                shadow[:, G:G + Wa] = cvals * valid_b

        # ---- conv_1x1_in : (F, dim) @ (dim, Wa) ----
        f = jnp.dot(w_in[...], x_vmem[slot],
                    preferred_element_type=jnp.float32) + b_in[...]
        store_center(f)

        # ---- L dual-dilated layers, one K=5F matmul per layer ----
        for i, (d1, d2) in enumerate(dils):
            def tap(off):
                return shadow[:, G + off:G + off + Wa]

            # (5F, Wa) slab: [f(t-d1); f(t); f(t+d1); f(t-d2); f(t+d2)]
            slab = jnp.concatenate(
                [tap(-d1), tap(0), tap(d1), tap(-d2), tap(d2)], axis=0)
            y = jnp.dot(w_eff[i], slab,
                        preferred_element_type=jnp.float32) + b_eff[i]
            # TODO(synk): nn.Dropout treated as identity (eval mode).
            f = jnp.maximum(y, 0.0) + f            # residual kept in f32
            store_center(f)

        # ---- conv_out on the exact central TT columns ----
        fc = shadow[:, G + H:G + H + TT]
        out_ref[...] = jnp.dot(w_out[...], fc,
                               preferred_element_type=jnp.float32) + b_out[...]

    return kernel


# ----------------------------------------------------------------------------
# One-time parameter preprocessing (hoisted out of the forward pass)
# ----------------------------------------------------------------------------
def preprocess_params(params, num_layers):
    F = int(params["w_in"].shape[0])
    dim = int(params["w_in"].shape[1])
    C = int(params["w_out"].shape[0])

    w_in = params["w_in"][:, :, 0].astype(jnp.float32)        # (F, dim)
    b_in = params["b_in"][:, None].astype(jnp.float32)        # (F, 1)
    w_out = params["w_out"][:, :, 0].astype(jnp.float32)      # (C, F)
    b_out = params["b_out"][:, None].astype(jnp.float32)      # (C, 1)

    w_eff, b_eff = [], []
    for i in range(num_layers):
        # PyTorch Conv1d weight (O, I, K) -> (O, K*I): columns [0:F]=tap t-d, [F:2F]=t, [2F:3F]=t+d
        wd1 = jnp.transpose(params["w_d1"][i], (0, 2, 1)).reshape(F, 3 * F).astype(jnp.float32)
        wd2 = jnp.transpose(params["w_d2"][i], (0, 2, 1)).reshape(F, 3 * F).astype(jnp.float32)
        wfu = params["w_fu"][i][:, :, 0].astype(jnp.float32)   # (F, 2F)
        wa, wb = wfu[:, :F], wfu[:, F:]

        # Compose fusion conv into the dilated convs (exact, done in f32).
        W1 = wa @ wd1                                          # (F, 3F)
        W2 = wb @ wd2                                          # (F, 3F)
        w_eff.append(jnp.concatenate(
            [W1[:, :F],                       # tap t - d1
             W1[:, F:2 * F] + W2[:, F:2 * F],  # shared center tap t
             W1[:, 2 * F:],                   # tap t + d1
             W2[:, :F],                       # tap t - d2
             W2[:, 2 * F:]], axis=1))         # tap t + d2   -> (F, 5F)

        b_eff.append(params["b_fu"][i][:, None].astype(jnp.float32)
                     + wa @ params["b_d1"][i][:, None].astype(jnp.float32)
                     + wb @ params["b_d2"][i][:, None].astype(jnp.float32))

    return {
        "num_layers": num_layers, "F": F, "C": C, "dim": dim,
        "w_in": w_in.astype(jnp.bfloat16),
        "b_in": b_in,
        "w_eff": jnp.stack(w_eff).astype(jnp.bfloat16),        # (L, F, 5F)
        "b_eff": jnp.stack(b_eff),                             # (L, F, 1) f32
        "w_out": w_out.astype(jnp.bfloat16),
        "b_out": b_out,
    }


# ----------------------------------------------------------------------------
# Forward wrapper
# ----------------------------------------------------------------------------
def prediction_generation_forward(x, pp, *, time_tile=None):
    """x: (N, dim, T) float32 -> (N, num_classes, T) float32."""
    N, dim, T = x.shape
    L, F, C = pp["num_layers"], pp["F"], pp["C"]
    assert dim == pp["dim"]

    # Halo so the central TT columns of every tile are exact after L layers.
    H = sum(2 ** max(L - 1 - i, i) for i in range(L))
    G = _round_up(2 ** (L - 1), 128)             # zero guard >= max dilation, lane aligned

    if time_tile is not None:
        TT = _round_up(time_tile, 128)
    else:
        TT = max(2048, _round_up(2 * H, 128))    # big tiles: amortize halo + per-step overhead
    TT = min(TT, _round_up(T, 128))
    T_pad = _round_up(T, TT)
    num_tiles = T_pad // TT
    Wa = _round_up(TT + 2 * H, 128)              # lane-aligned halo'd window
    extra = Wa - (TT + 2 * H)

    # Pre-pad x (bf16) so every window read is in-bounds: H left, (tile rounding + H + extra) right.
    x_pad = jnp.pad(x.astype(jnp.bfloat16),
                    ((0, 0), (0, 0), (H, (T_pad - T) + H + extra)))

    kernel = _make_pg_kernel(L=L, F=F, C=C, dim=dim, TT=TT, H=H, G=G, Wa=Wa,
                             T_real=T, num_tiles=num_tiles)

    # Tight VMEM budget (true footprint is tiny; keep headroom for compiler scratch).
    weight_bytes = (2 * (pp["w_in"].size + pp["w_eff"].size + pp["w_out"].size)
                    + 4 * (pp["b_in"].size + pp["b_eff"].size + pp["b_out"].size))
    scratch_bytes = 2 * dim * Wa * 2 + F * (Wa + 2 * G) * 2
    out_bytes = 2 * C * TT * 4
    vmem_limit = int(min(max(4 * (2 * weight_bytes + scratch_bytes + out_bytes),
                             16 * 1024 * 1024), 48 * 1024 * 1024))

    out = pl.pallas_call(
        kernel,
        out_shape=jax.ShapeDtypeStruct((N, C, T_pad), jnp.float32),
        grid=(N, num_tiles),
        in_specs=[
            pl.BlockSpec(memory_space=pl.ANY),                        # x_pad (manual halo DMA)
            pl.BlockSpec((F, dim), lambda n, j: (0, 0)),              # w_in
            pl.BlockSpec((F, 1), lambda n, j: (0, 0)),                # b_in
            pl.BlockSpec((L, F, 5 * F), lambda n, j: (0, 0, 0)),      # composed layer weights
            pl.BlockSpec((L, F, 1), lambda n, j: (0, 0, 0)),          # folded layer biases
            pl.BlockSpec((C, F), lambda n, j: (0, 0)),                # w_out
            pl.BlockSpec((C, 1), lambda n, j: (0, 0)),                # b_out
        ],
        out_specs=pl.BlockSpec((None, C, TT), lambda n, j: (n, 0, j)),
        scratch_shapes=[
            pltpu.VMEM((2, dim, Wa), jnp.bfloat16),          # double-buffered input window
            pltpu.VMEM((F, Wa + 2 * G), jnp.bfloat16),       # bf16 feature shadow + zero guards
            pltpu.SemaphoreType.DMA((2,)),
        ],
        compiler_params=pltpu.CompilerParams(
            # Time axis carries the prefetch / guard-zeroing chain -> "arbitrary";
            # batch axis "parallel" (megacore sharding on v7x splits whole batches).
            dimension_semantics=("parallel", "arbitrary"),
            vmem_limit_bytes=vmem_limit,
        ),
    )(x_pad, pp["w_in"], pp["b_in"], pp["w_eff"], pp["b_eff"],
      pp["w_out"], pp["b_out"])

    return out[:, :, :T]


# ----------------------------------------------------------------------------
# Pure-JAX reference (lax convs), used only to validate the Pallas path
# ----------------------------------------------------------------------------
def _ref_conv1d(x, w, b, dilation=1, padding=0):
    out = jax.lax.conv_general_dilated(
        x, w, window_strides=(1,), padding=[(padding, padding)],
        rhs_dilation=(dilation,), dimension_numbers=("NCH", "OIH", "NCH"))
    return out + b[None, :, None]


def reference_forward(x, params, num_layers):
    f = _ref_conv1d(x, params["w_in"], params["b_in"])
    for i in range(num_layers):
        d1 = 2 ** (num_layers - 1 - i)
        d2 = 2 ** i
        f_in = f
        c1 = _ref_conv1d(f, params["w_d1"][i], params["b_d1"][i], dilation=d1, padding=d1)
        c2 = _ref_conv1d(f, params["w_d2"][i], params["b_d2"][i], dilation=d2, padding=d2)
        f = _ref_conv1d(jnp.concatenate([c1, c2], axis=1), params["w_fu"][i], params["b_fu"][i])
        f = jax.nn.relu(f)
        f = f + f_in
    return _ref_conv1d(f, params["w_out"], params["b_out"])


# ----------------------------------------------------------------------------
# Deterministic parameter construction (PyTorch Conv1d shapes)
# ----------------------------------------------------------------------------
def make_params(key, num_layers, num_f_maps, dim, num_classes):
    ks = jax.random.split(key, 4 + 6 * num_layers)
    it = iter(ks)
    scale = 0.1
    p = {
        "w_in": scale * jax.random.normal(next(it), (num_f_maps, dim, 1), jnp.float32),
        "b_in": scale * jax.random.normal(next(it), (num_f_maps,), jnp.float32),
        "w_out": scale * jax.random.normal(next(it), (num_classes, num_f_maps, 1), jnp.float32),
        "b_out": scale * jax.random.normal(next(it), (num_classes,), jnp.float32),
        "w_d1": [], "b_d1": [], "w_d2": [], "b_d2": [], "w_fu": [], "b_fu": [],
    }
    for _ in range(num_layers):
        p["w_d1"].append(scale * jax.random.normal(next(it), (num_f_maps, num_f_maps, 3), jnp.float32))
        p["b_d1"].append(scale * jax.random.normal(next(it), (num_f_maps,), jnp.float32))
        p["w_d2"].append(scale * jax.random.normal(next(it), (num_f_maps, num_f_maps, 3), jnp.float32))
        p["b_d2"].append(scale * jax.random.normal(next(it), (num_f_maps,), jnp.float32))
        p["w_fu"].append(scale * jax.random.normal(next(it), (num_f_maps, 2 * num_f_maps, 1), jnp.float32))
        p["b_fu"].append(scale * jax.random.normal(next(it), (num_f_maps,), jnp.float32))
    return p


if __name__ == "__main__":
    num_layers, num_f_maps, dim, num_classes = 4, 32, 16, 8
    N, T = 2, 320  # time_tile=128 below -> 3 time tiles, exercises halos + boundary masking

    key = jax.random.PRNGKey(0)
    k_x, k_p = jax.random.split(key)
    x = jax.random.normal(k_x, (N, dim, T), jnp.float32)
    params = make_params(k_p, num_layers, num_f_maps, dim, num_classes)

    pp = preprocess_params(params, num_layers)
    ref = jax.block_until_ready(reference_forward(x, params, num_layers))
    scale = float(jnp.max(jnp.abs(ref))) + 1e-6

    # Check both the multi-tile path (small tiles, halo + boundary masks + DMA prefetch)
    # and the default single-tile path.
    for tt in (128, None):
        out = jax.block_until_ready(prediction_generation_forward(x, pp, time_tile=tt))
        assert out.shape == (N, num_classes, T), out.shape
        err = float(jnp.max(jnp.abs(out - ref)))
        # bf16 matmul operands -> loosened tolerance vs. the f32 lax.conv reference.
        assert err / scale < 0.05, (tt, err, scale)

    print("KERNEL_OK")
</pallas_src>

<mosaic_0001>
module attributes {stable_mosaic.version = 11 : i64} {
  func.func @kernel(%arg0: i32, %arg1: i32, %arg2: memref<2x16x512xbf16, #tpu.memory_space<any>>, %arg3: memref<32x16xbf16, #tpu.memory_space<vmem>>, %arg4: memref<32x1xf32, #tpu.memory_space<vmem>>, %arg5: memref<4x32x160xbf16, #tpu.memory_space<vmem>>, %arg6: memref<4x32x1xf32, #tpu.memory_space<vmem>>, %arg7: memref<8x32xbf16, #tpu.memory_space<vmem>>, %arg8: memref<8x1xf32, #tpu.memory_space<vmem>>, %arg9: memref<1x8x128xf32, #tpu.memory_space<vmem>>, %arg10: memref<2x16x256xbf16, #tpu.memory_space<vmem>>, %arg11: memref<32x512xbf16, #tpu.memory_space<vmem>>, %arg12: memref<2x!tpu.dma_semaphore, #tpu.memory_space<semaphore_mem>>) attributes {dimension_semantics = [#tpu.dimension_semantics<parallel>, #tpu.dimension_semantics<arbitrary>], iteration_bounds = array<i64: 2, 3>, scalar_prefetch = 0 : i64, scratch_operands = 3 : i64, tpu.core_type = #tpu.core_type<tc>, window_params = [{}, {pipeline_mode = #tpu.pipeline_mode<synchronous>, transform_indices = @transform_1, window_bounds = array<i64: 32, 16>}, {pipeline_mode = #tpu.pipeline_mode<synchronous>, transform_indices = @transform_2, window_bounds = array<i64: 32, 1>}, {pipeline_mode = #tpu.pipeline_mode<synchronous>, transform_indices = @transform_3, window_bounds = array<i64: 4, 32, 160>}, {pipeline_mode = #tpu.pipeline_mode<synchronous>, transform_indices = @transform_4, window_bounds = array<i64: 4, 32, 1>}, {pipeline_mode = #tpu.pipeline_mode<synchronous>, transform_indices = @transform_5, window_bounds = array<i64: 8, 32>}, {pipeline_mode = #tpu.pipeline_mode<synchronous>, transform_indices = @transform_6, window_bounds = array<i64: 8, 1>}, {transform_indices = @transform_7, window_bounds = array<i64: 1, 8, 128>}]} {
    %c2_i32 = arith.constant 2 : i32
    %c0_i32 = arith.constant 0 : i32
    %0 = arith.cmpi eq, %c2_i32, %c0_i32 : i32
    %c1_i32 = arith.constant 1 : i32
    %1 = arith.select %0, %c1_i32, %c2_i32 : i32
    %2 = arith.remsi %arg1, %1 : i32
    %c0_i32_0 = arith.constant 0 : i32
    %3 = arith.cmpi ne, %2, %c0_i32_0 : i32
    %c0_i32_1 = arith.constant 0 : i32
    %4 = arith.cmpi slt, %2, %c0_i32_1 : i32
    %c0_i32_2 = arith.constant 0 : i32
    %5 = arith.cmpi slt, %1, %c0_i32_2 : i32
    %6 = arith.xori %4, %5 : i1
    %7 = arith.andi %6, %3 : i1
    %8 = arith.addi %2, %1 : i32
    %9 = arith.select %7, %8, %2 : i32
    %c0_i32_3 = arith.constant 0 : i32
    %10 = arith.cmpi eq, %arg1, %c0_i32_3 : i32
    %11 = arith.extui %10 : i1 to i32
    %c0_i32_4 = arith.constant 0 : i32
    %12 = arith.cmpi ne, %11, %c0_i32_4 : i32
    scf.if %12 {
      %cst_107 = arith.constant 0.000000e+00 : bf16
      %147 = vector.broadcast %cst_107 : bf16 to vector<32x128xbf16>
      %c0_108 = arith.constant 0 : index
      %c0_109 = arith.constant 0 : index
      %148 = vector.load %arg11[%c0_108, %c0_109] : memref<32x512xbf16, #tpu.memory_space<vmem>>, vector<32x128xbf16>
      tpu.vector_store %arg11[%c0_108, %c0_109], %147 {strides = array<i32>} : memref<32x512xbf16, #tpu.memory_space<vmem>>, vector<32x128xbf16>,
      %cst_110 = arith.constant 0.000000e+00 : bf16
      %149 = vector.broadcast %cst_110 : bf16 to vector<32x128xbf16>
      %c0_111 = arith.constant 0 : index
      %c384 = arith.constant 384 : index
      %150 = vector.load %arg11[%c0_111, %c384] : memref<32x512xbf16, #tpu.memory_space<vmem>>, vector<32x128xbf16>
      tpu.vector_store %arg11[%c0_111, %c384], %149 {strides = array<i32>} : memref<32x512xbf16, #tpu.memory_space<vmem>>, vector<32x128xbf16>,
      %c0_i32_112 = arith.constant 0 : i32
      %151 = tpu.assume_multiple %c0_i32_112, 128 : i32
      %c0_i32_113 = arith.constant 0 : i32
      %c0_i32_114 = arith.constant 0 : i32
      %c0_i32_115 = arith.constant 0 : i32
      %152 = tpu.memref_slice %arg2[%arg0, %c0_i32_115, %151] : memref<2x16x512xbf16, #tpu.memory_space<any>> -> memref<1x16x256xbf16, #tpu.memory_space<any>>
      %153 = tpu.memref_squeeze %152 : memref<1x16x256xbf16, #tpu.memory_space<any>> -> memref<16x256xbf16, #tpu.memory_space<any>>
      %c0_i32_116 = arith.constant 0 : i32
      %c0_i32_117 = arith.constant 0 : i32
      %154 = tpu.memref_slice %arg10[%c0_i32_113, %c0_i32_116, %c0_i32_117] : memref<2x16x256xbf16, #tpu.memory_space<vmem>> -> memref<1x16x256xbf16, #tpu.memory_space<vmem>>
      %155 = tpu.memref_squeeze %154 : memref<1x16x256xbf16, #tpu.memory_space<vmem>> -> memref<16x256xbf16, #tpu.memory_space<vmem>>
      %156 = tpu.memref_slice %arg12[%c0_i32_114] : memref<2x!tpu.dma_semaphore, #tpu.memory_space<semaphore_mem>> -> memref<1x!tpu.dma_semaphore, #tpu.memory_space<semaphore_mem>>
      %157 = tpu.memref_squeeze %156 : memref<1x!tpu.dma_semaphore, #tpu.memory_space<semaphore_mem>> -> memref<!tpu.dma_semaphore, #tpu.memory_space<semaphore_mem>>
      tpu.enqueue_dma source(%153 : memref<16x256xbf16, #tpu.memory_space<any>>) target(%155 : memref<16x256xbf16, #tpu.memory_space<vmem>>) target_semaphore(%157 : memref<!tpu.dma_semaphore, #tpu.memory_space<semaphore_mem>>)
    } else {
    }
    %c128_i32 = arith.constant 128 : i32
    %13 = arith.muli %arg1, %c128_i32 : i32
    %14 = tpu.assume_multiple %13, 128 : i32
    %c0_i32_5 = arith.constant 0 : i32
    %15 = tpu.memref_slice %arg2[%arg0, %c0_i32_5, %14] : memref<2x16x512xbf16, #tpu.memory_space<any>> -> memref<1x16x256xbf16, #tpu.memory_space<any>>
    %16 = tpu.memref_squeeze %15 : memref<1x16x256xbf16, #tpu.memory_space<any>> -> memref<16x256xbf16, #tpu.memory_space<any>>
    %c0_i32_6 = arith.constant 0 : i32
    %c0_i32_7 = arith.constant 0 : i32
    %17 = tpu.memref_slice %arg10[%9, %c0_i32_6, %c0_i32_7] : memref<2x16x256xbf16, #tpu.memory_space<vmem>> -> memref<1x16x256xbf16, #tpu.memory_space<vmem>>
    %18 = tpu.memref_squeeze %17 : memref<1x16x256xbf16, #tpu.memory_space<vmem>> -> memref<16x256xbf16, #tpu.memory_space<vmem>>
    %19 = tpu.memref_slice %arg12[%9] : memref<2x!tpu.dma_semaphore, #tpu.memory_space<semaphore_mem>> -> memref<1x!tpu.dma_semaphore, #tpu.memory_space<semaphore_mem>>
    %20 = tpu.memref_squeeze %19 : memref<1x!tpu.dma_semaphore, #tpu.memory_space<semaphore_mem>> -> memref<!tpu.dma_semaphore, #tpu.memory_space<semaphore_mem>>
    tpu.wait_dma2 semaphore(%20 : memref<!tpu.dma_semaphore, #tpu.memory_space<semaphore_mem>>) src(%16 : memref<16x256xbf16, #tpu.memory_space<any>>) dst(%18 : memref<16x256xbf16, #tpu.memory_space<vmem>>)
    %c1_i32_8 = arith.constant 1 : i32
    %21 = arith.addi %arg1, %c1_i32_8 : i32
    %c3_i32 = arith.constant 3 : i32
    %22 = arith.cmpi slt, %21, %c3_i32 : i32
    %23 = arith.extui %22 : i1 to i32
    %c0_i32_9 = arith.constant 0 : i32
    %24 = arith.cmpi ne, %23, %c0_i32_9 : i32
    scf.if %24 {
      %c1_i32_107 = arith.constant 1 : i32
      %147 = arith.addi %arg1, %c1_i32_107 : i32
      %c1_i32_108 = arith.constant 1 : i32
      %148 = arith.subi %c1_i32_108, %9 : i32
      %c128_i32_109 = arith.constant 128 : i32
      %149 = arith.muli %147, %c128_i32_109 : i32
      %150 = tpu.assume_multiple %149, 128 : i32
      %c0_i32_110 = arith.constant 0 : i32
      %151 = tpu.memref_slice %arg2[%arg0, %c0_i32_110, %150] : memref<2x16x512xbf16, #tpu.memory_space<any>> -> memref<1x16x256xbf16, #tpu.memory_space<any>>
      %152 = tpu.memref_squeeze %151 : memref<1x16x256xbf16, #tpu.memory_space<any>> -> memref<16x256xbf16, #tpu.memory_space<any>>
      %c0_i32_111 = arith.constant 0 : i32
      %c0_i32_112 = arith.constant 0 : i32
      %153 = tpu.memref_slice %arg10[%148, %c0_i32_111, %c0_i32_112] : memref<2x16x256xbf16, #tpu.memory_space<vmem>> -> memref<1x16x256xbf16, #tpu.memory_space<vmem>>
      %154 = tpu.memref_squeeze %153 : memref<1x16x256xbf16, #tpu.memory_space<vmem>> -> memref<16x256xbf16, #tpu.memory_space<vmem>>
      %155 = tpu.memref_slice %arg12[%148] : memref<2x!tpu.dma_semaphore, #tpu.memory_space<semaphore_mem>> -> memref<1x!tpu.dma_semaphore, #tpu.memory_space<semaphore_mem>>
      %156 = tpu.memref_squeeze %155 : memref<1x!tpu.dma_semaphore, #tpu.memory_space<semaphore_mem>> -> memref<!tpu.dma_semaphore, #tpu.memory_space<semaphore_mem>>
      tpu.enqueue_dma source(%152 : memref<16x256xbf16, #tpu.memory_space<any>>) target(%154 : memref<16x256xbf16, #tpu.memory_space<vmem>>) target_semaphore(%156 : memref<!tpu.dma_semaphore, #tpu.memory_space<semaphore_mem>>)
    } else {
    }
    %25 = tpu.iota {dimensions = array<i32: 1>} : vector<1x256xi32>
    %c128_i32_10 = arith.constant 128 : i32
    %26 = arith.muli %arg1, %c128_i32_10 : i32
    %c24_i32 = arith.constant 24 : i32
    %27 = arith.subi %26, %c24_i32 : i32
    %28 = vector.broadcast %27 : i32 to vector<1x256xi32>
    %29 = arith.addi %28, %25 : vector<1x256xi32>
    %c0_i32_11 = arith.constant 0 : i32
    %30 = vector.broadcast %c0_i32_11 : i32 to vector<1x256xi32>
    %31 = arith.cmpi sge, %29, %30 : vector<1x256xi32>
    %c320_i32 = arith.constant 320 : i32
    %32 = vector.broadcast %c320_i32 : i32 to vector<1x256xi32>
    %33 = arith.cmpi slt, %29, %32 : vector<1x256xi32>
    %34 = arith.andi %31, %33 : vector<1x256xi1>
    %35 = arith.extui %34 : vector<1x256xi1> to vector<1x256xi32>
    %36 = arith.sitofp %35 : vector<1x256xi32> to vector<1x256xf32>
    %37 = arith.truncf %36 : vector<1x256xf32> to vector<1x256xbf16>
    %c128_i32_12 = arith.constant 128 : i32
    %38 = arith.muli %arg1, %c128_i32_12 : i32
    %c24_i32_13 = arith.constant 24 : i32
    %39 = arith.subi %38, %c24_i32_13 : i32
    %c0_i32_14 = arith.constant 0 : i32
    %40 = arith.cmpi slt, %39, %c0_i32_14 : i32
    %c128_i32_15 = arith.constant 128 : i32
    %41 = arith.muli %arg1, %c128_i32_15 : i32
    %c24_i32_16 = arith.constant 24 : i32
    %42 = arith.subi %41, %c24_i32_16 : i32
    %c256_i32 = arith.constant 256 : i32
    %43 = arith.addi %42, %c256_i32 : i32
    %c320_i32_17 = arith.constant 320 : i32
    %44 = arith.cmpi sgt, %43, %c320_i32_17 : i32
    %45 = arith.ori %40, %44 : i1
    %c0 = arith.constant 0 : index
    %c0_18 = arith.constant 0 : index
    %46 = vector.load %arg3[%c0, %c0_18] : memref<32x16xbf16, #tpu.memory_space<vmem>>, vector<32x16xbf16>
    %47 = arith.index_cast %9 : i32 to index
    %c0_19 = arith.constant 0 : index
    %c0_20 = arith.constant 0 : index
    %48 = vector.load %arg10[%47, %c0_19, %c0_20] : memref<2x16x256xbf16, #tpu.memory_space<vmem>>, vector<1x16x256xbf16>
    %49 = vector.shape_cast %48 : vector<1x16x256xbf16> to vector<16x256xbf16>
    %cst = arith.constant dense<0.000000e+00> : vector<32x256xf32>
    %50 = tpu.matmul %46, %49, %cst {dimension_numbers = #tpu.dot_dimension_numbers<[1], [0], [0], [1], [0, 0, 1, 1], [], []>} : vector<32x16xbf16>, vector<16x256xbf16>, vector<32x256xf32> -> vector<32x256xf32>
    %c0_21 = arith.constant 0 : index
    %c0_22 = arith.constant 0 : index
    %51 = vector.load %arg4[%c0_21, %c0_22] : memref<32x1xf32, #tpu.memory_space<vmem>>, vector<32x1xf32>
    %52 = vector.broadcast %51 : vector<32x1xf32> to vector<32x256xf32>
    %53 = arith.addf %50, %52 : vector<32x256xf32>
    %54 = arith.truncf %53 : vector<32x256xf32> to vector<32x256xbf16>
    %c0_23 = arith.constant 0 : index
    %c128 = arith.constant 128 : index
    %55 = vector.load %arg11[%c0_23, %c128] : memref<32x512xbf16, #tpu.memory_space<vmem>>, vector<32x256xbf16>
    tpu.vector_store %arg11[%c0_23, %c128], %54 {strides = array<i32>} : memref<32x512xbf16, #tpu.memory_space<vmem>>, vector<32x256xbf16>,
    %56 = arith.extui %45 : i1 to i32
    %c0_i32_24 = arith.constant 0 : i32
    %57 = arith.cmpi ne, %56, %c0_i32_24 : i32
    scf.if %57 {
      %147 = vector.broadcast %37 : vector<1x256xbf16> to vector<32x256xbf16>
      %148 = arith.mulf %54, %147 : vector<32x256xbf16>
      %c0_107 = arith.constant 0 : index
      %c128_108 = arith.constant 128 : index
      %149 = vector.load %arg11[%c0_107, %c128_108] : memref<32x512xbf16, #tpu.memory_space<vmem>>, vector<32x256xbf16>
      tpu.vector_store %arg11[%c0_107, %c128_108], %148 {strides = array<i32>} : memref<32x512xbf16, #tpu.memory_space<vmem>>, vector<32x256xbf16>,
    } else {
    }
    %c0_25 = arith.constant 0 : index
    %c120 = arith.constant 120 : index
    %58 = vector.load %arg11[%c0_25, %c120] : memref<32x512xbf16, #tpu.memory_space<vmem>>, vector<32x256xbf16>
    %c0_26 = arith.constant 0 : index
    %c128_27 = arith.constant 128 : index
    %59 = vector.load %arg11[%c0_26, %c128_27] : memref<32x512xbf16, #tpu.memory_space<vmem>>, vector<32x256xbf16>
    %c0_28 = arith.constant 0 : index
    %c136 = arith.constant 136 : index
    %60 = vector.load %arg11[%c0_28, %c136] : memref<32x512xbf16, #tpu.memory_space<vmem>>, vector<32x256xbf16>
    %c0_29 = arith.constant 0 : index
    %c127 = arith.constant 127 : index
    %61 = vector.load %arg11[%c0_29, %c127] : memref<32x512xbf16, #tpu.memory_space<vmem>>, vector<32x256xbf16>
    %c0_30 = arith.constant 0 : index
    %c129 = arith.constant 129 : index
    %62 = vector.load %arg11[%c0_30, %c129] : memref<32x512xbf16, #tpu.memory_space<vmem>>, vector<32x256xbf16>
    %63 = tpu.concatenate %58, %59, %60, %61, %62 in 0 : vector<32x256xbf16>, vector<32x256xbf16>, vector<32x256xbf16>, vector<32x256xbf16>, vector<32x256xbf16> -> vector<160x256xbf16>
    %c0_31 = arith.constant 0 : index
    %c0_32 = arith.constant 0 : index
    %c0_33 = arith.constant 0 : index
    %64 = vector.load %arg5[%c0_31, %c0_32, %c0_33] : memref<4x32x160xbf16, #tpu.memory_space<vmem>>, vector<1x32x160xbf16>
    %65 = vector.shape_cast %64 : vector<1x32x160xbf16> to vector<32x160xbf16>
    %cst_34 = arith.constant dense<0.000000e+00> : vector<32x256xf32>
    %66 = tpu.matmul %65, %63, %cst_34 {dimension_numbers = #tpu.dot_dimension_numbers<[1], [0], [0], [1], [0, 0, 1, 1], [], []>} : vector<32x160xbf16>, vector<160x256xbf16>, vector<32x256xf32> -> vector<32x256xf32>
    %c0_35 = arith.constant 0 : index
    %c0_36 = arith.constant 0 : index
    %c0_37 = arith.constant 0 : index
    %67 = vector.load %arg6[%c0_35, %c0_36, %c0_37] : memref<4x32x1xf32, #tpu.memory_space<vmem>>, vector<1x32x1xf32>
    %68 = vector.shape_cast %67 : vector<1x32x1xf32> to vector<32x1xf32>
    %69 = vector.broadcast %68 : vector<32x1xf32> to vector<32x256xf32>
    %70 = arith.addf %66, %69 : vector<32x256xf32>
    %cst_38 = arith.constant 0.000000e+00 : f32
    %71 = vector.broadcast %cst_38 : f32 to vector<32x256xf32>
    %72 = arith.maximumf %70, %71 : vector<32x256xf32>
    %73 = arith.addf %72, %53 : vector<32x256xf32>
    %74 = arith.truncf %73 : vector<32x256xf32> to vector<32x256xbf16>
    %c0_39 = arith.constant 0 : index
    %c128_40 = arith.constant 128 : index
    %75 = vector.load %arg11[%c0_39, %c128_40] : memref<32x512xbf16, #tpu.memory_space<vmem>>, vector<32x256xbf16>
    tpu.vector_store %arg11[%c0_39, %c128_40], %74 {strides = array<i32>} : memref<32x512xbf16, #tpu.memory_space<vmem>>, vector<32x256xbf16>,
    %76 = arith.extui %45 : i1 to i32
    %c0_i32_41 = arith.constant 0 : i32
    %77 = arith.cmpi ne, %76, %c0_i32_41 : i32
    scf.if %77 {
      %147 = vector.broadcast %37 : vector<1x256xbf16> to vector<32x256xbf16>
      %148 = arith.mulf %74, %147 : vector<32x256xbf16>
      %c0_107 = arith.constant 0 : index
      %c128_108 = arith.constant 128 : index
      %149 = vector.load %arg11[%c0_107, %c128_108] : memref<32x512xbf16, #tpu.memory_space<vmem>>, vector<32x256xbf16>
      tpu.vector_store %arg11[%c0_107, %c128_108], %148 {strides = array<i32>} : memref<32x512xbf16, #tpu.memory_space<vmem>>, vector<32x256xbf16>,
    } else {
    }
    %c0_42 = arith.constant 0 : index
    %c124 = arith.constant 124 : index
    %78 = vector.load %arg11[%c0_42, %c124] : memref<32x512xbf16, #tpu.memory_space<vmem>>, vector<32x256xbf16>
    %c0_43 = arith.constant 0 : index
    %c128_44 = arith.constant 128 : index
    %79 = vector.load %arg11[%c0_43, %c128_44] : memref<32x512xbf16, #tpu.memory_space<vmem>>, vector<32x256xbf16>
    %c0_45 = arith.constant 0 : index
    %c132 = arith.constant 132 : index
    %80 = vector.load %arg11[%c0_45, %c132] : memref<32x512xbf16, #tpu.memory_space<vmem>>, vector<32x256xbf16>
    %c0_46 = arith.constant 0 : index
    %c126 = arith.constant 126 : index
    %81 = vector.load %arg11[%c0_46, %c126] : memref<32x512xbf16, #tpu.memory_space<vmem>>, vector<32x256xbf16>
    %c0_47 = arith.constant 0 : index
    %c130 = arith.constant 130 : index
    %82 = vector.load %arg11[%c0_47, %c130] : memref<32x512xbf16, #tpu.memory_space<vmem>>, vector<32x256xbf16>
    %83 = tpu.concatenate %78, %79, %80, %81, %82 in 0 : vector<32x256xbf16>, vector<32x256xbf16>, vector<32x256xbf16>, vector<32x256xbf16>, vector<32x256xbf16> -> vector<160x256xbf16>
    %c1 = arith.constant 1 : index
    %c0_48 = arith.constant 0 : index
    %c0_49 = arith.constant 0 : index
    %84 = vector.load %arg5[%c1, %c0_48, %c0_49] : memref<4x32x160xbf16, #tpu.memory_space<vmem>>, vector<1x32x160xbf16>
    %85 = vector.shape_cast %84 : vector<1x32x160xbf16> to vector<32x160xbf16>
    %cst_50 = arith.constant dense<0.000000e+00> : vector<32x256xf32>
    %86 = tpu.matmul %85, %83, %cst_50 {dimension_numbers = #tpu.dot_dimension_numbers<[1], [0], [0], [1], [0, 0, 1, 1], [], []>} : vector<32x160xbf16>, vector<160x256xbf16>, vector<32x256xf32> -> vector<32x256xf32>
    %c1_51 = arith.constant 1 : index
    %c0_52 = arith.constant 0 : index
    %c0_53 = arith.constant 0 : index
    %87 = vector.load %arg6[%c1_51, %c0_52, %c0_53] : memref<4x32x1xf32, #tpu.memory_space<vmem>>, vector<1x32x1xf32>
    %88 = vector.shape_cast %87 : vector<1x32x1xf32> to vector<32x1xf32>
    %89 = vector.broadcast %88 : vector<32x1xf32> to vector<32x256xf32>
    %90 = arith.addf %86, %89 : vector<32x256xf32>
    %cst_54 = arith.constant 0.000000e+00 : f32
    %91 = vector.broadcast %cst_54 : f32 to vector<32x256xf32>
    %92 = arith.maximumf %90, %91 : vector<32x256xf32>
    %93 = arith.addf %92, %73 : vector<32x256xf32>
    %94 = arith.truncf %93 : vector<32x256xf32> to vector<32x256xbf16>
    %c0_55 = arith.constant 0 : index
    %c128_56 = arith.constant 128 : index
    %95 = vector.load %arg11[%c0_55, %c128_56] : memref<32x512xbf16, #tpu.memory_space<vmem>>, vector<32x256xbf16>
    tpu.vector_store %arg11[%c0_55, %c128_56], %94 {strides = array<i32>} : memref<32x512xbf16, #tpu.memory_space<vmem>>, vector<32x256xbf16>,
    %96 = arith.extui %45 : i1 to i32
    %c0_i32_57 = arith.constant 0 : i32
    %97 = arith.cmpi ne, %96, %c0_i32_57 : i32
    scf.if %97 {
      %147 = vector.broadcast %37 : vector<1x256xbf16> to vector<32x256xbf16>
      %148 = arith.mulf %94, %147 : vector<32x256xbf16>
      %c0_107 = arith.constant 0 : index
      %c128_108 = arith.constant 128 : index
      %149 = vector.load %arg11[%c0_107, %c128_108] : memref<32x512xbf16, #tpu.memory_space<vmem>>, vector<32x256xbf16>
      tpu.vector_store %arg11[%c0_107, %c128_108], %148 {strides = array<i32>} : memref<32x512xbf16, #tpu.memory_space<vmem>>, vector<32x256xbf16>,
    } else {
    }
    %c0_58 = arith.constant 0 : index
    %c126_59 = arith.constant 126 : index
    %98 = vector.load %arg11[%c0_58, %c126_59] : memref<32x512xbf16, #tpu.memory_space<vmem>>, vector<32x256xbf16>
    %c0_60 = arith.constant 0 : index
    %c128_61 = arith.constant 128 : index
    %99 = vector.load %arg11[%c0_60, %c128_61] : memref<32x512xbf16, #tpu.memory_space<vmem>>, vector<32x256xbf16>
    %c0_62 = arith.constant 0 : index
    %c130_63 = arith.constant 130 : index
    %100 = vector.load %arg11[%c0_62, %c130_63] : memref<32x512xbf16, #tpu.memory_space<vmem>>, vector<32x256xbf16>
    %c0_64 = arith.constant 0 : index
    %c124_65 = arith.constant 124 : index
    %101 = vector.load %arg11[%c0_64, %c124_65] : memref<32x512xbf16, #tpu.memory_space<vmem>>, vector<32x256xbf16>
    %c0_66 = arith.constant 0 : index
    %c132_67 = arith.constant 132 : index
    %102 = vector.load %arg11[%c0_66, %c132_67] : memref<32x512xbf16, #tpu.memory_space<vmem>>, vector<32x256xbf16>
    %103 = tpu.concatenate %98, %99, %100, %101, %102 in 0 : vector<32x256xbf16>, vector<32x256xbf16>, vector<32x256xbf16>, vector<32x256xbf16>, vector<32x256xbf16> -> vector<160x256xbf16>
    %c2 = arith.constant 2 : index
    %c0_68 = arith.constant 0 : index
    %c0_69 = arith.constant 0 : index
    %104 = vector.load %arg5[%c2, %c0_68, %c0_69] : memref<4x32x160xbf16, #tpu.memory_space<vmem>>, vector<1x32x160xbf16>
    %105 = vector.shape_cast %104 : vector<1x32x160xbf16> to vector<32x160xbf16>
    %cst_70 = arith.constant dense<0.000000e+00> : vector<32x256xf32>
    %106 = tpu.matmul %105, %103, %cst_70 {dimension_numbers = #tpu.dot_dimension_numbers<[1], [0], [0], [1], [0, 0, 1, 1], [], []>} : vector<32x160xbf16>, vector<160x256xbf16>, vector<32x256xf32> -> vector<32x256xf32>
    %c2_71 = arith.constant 2 : index
    %c0_72 = arith.constant 0 : index
    %c0_73 = arith.constant 0 : index
    %107 = vector.load %arg6[%c2_71, %c0_72, %c0_73] : memref<4x32x1xf32, #tpu.memory_space<vmem>>, vector<1x32x1xf32>
    %108 = vector.shape_cast %107 : vector<1x32x1xf32> to vector<32x1xf32>
    %109 = vector.broadcast %108 : vector<32x1xf32> to vector<32x256xf32>
    %110 = arith.addf %106, %109 : vector<32x256xf32>
    %cst_74 = arith.constant 0.000000e+00 : f32
    %111 = vector.broadcast %cst_74 : f32 to vector<32x256xf32>
    %112 = arith.maximumf %110, %111 : vector<32x256xf32>
    %113 = arith.addf %112, %93 : vector<32x256xf32>
    %114 = arith.truncf %113 : vector<32x256xf32> to vector<32x256xbf16>
    %c0_75 = arith.constant 0 : index
    %c128_76 = arith.constant 128 : index
    %115 = vector.load %arg11[%c0_75, %c128_76] : memref<32x512xbf16, #tpu.memory_space<vmem>>, vector<32x256xbf16>
    tpu.vector_store %arg11[%c0_75, %c128_76], %114 {strides = array<i32>} : memref<32x512xbf16, #tpu.memory_space<vmem>>, vector<32x256xbf16>,
    %116 = arith.extui %45 : i1 to i32
    %c0_i32_77 = arith.constant 0 : i32
    %117 = arith.cmpi ne, %116, %c0_i32_77 : i32
    scf.if %117 {
      %147 = vector.broadcast %37 : vector<1x256xbf16> to vector<32x256xbf16>
      %148 = arith.mulf %114, %147 : vector<32x256xbf16>
      %c0_107 = arith.constant 0 : index
      %c128_108 = arith.constant 128 : index
      %149 = vector.load %arg11[%c0_107, %c128_108] : memref<32x512xbf16, #tpu.memory_space<vmem>>, vector<32x256xbf16>
      tpu.vector_store %arg11[%c0_107, %c128_108], %148 {strides = array<i32>} : memref<32x512xbf16, #tpu.memory_space<vmem>>, vector<32x256xbf16>,
    } else {
    }
    %c0_78 = arith.constant 0 : index
    %c127_79 = arith.constant 127 : index
    %118 = vector.load %arg11[%c0_78, %c127_79] : memref<32x512xbf16, #tpu.memory_space<vmem>>, vector<32x256xbf16>
    %c0_80 = arith.constant 0 : index
    %c128_81 = arith.constant 128 : index
    %119 = vector.load %arg11[%c0_80, %c128_81] : memref<32x512xbf16, #tpu.memory_space<vmem>>, vector<32x256xbf16>
    %c0_82 = arith.constant 0 : index
    %c129_83 = arith.constant 129 : index
    %120 = vector.load %arg11[%c0_82, %c129_83] : memref<32x512xbf16, #tpu.memory_space<vmem>>, vector<32x256xbf16>
    %c0_84 = arith.constant 0 : index
    %c120_85 = arith.constant 120 : index
    %121 = vector.load %arg11[%c0_84, %c120_85] : memref<32x512xbf16, #tpu.memory_space<vmem>>, vector<32x256xbf16>
    %c0_86 = arith.constant 0 : index
    %c136_87 = arith.constant 136 : index
    %122 = vector.load %arg11[%c0_86, %c136_87] : memref<32x512xbf16, #tpu.memory_space<vmem>>, vector<32x256xbf16>
    %123 = tpu.concatenate %118, %119, %120, %121, %122 in 0 : vector<32x256xbf16>, vector<32x256xbf16>, vector<32x256xbf16>, vector<32x256xbf16>, vector<32x256xbf16> -> vector<160x256xbf16>
    %c3 = arith.constant 3 : index
    %c0_88 = arith.constant 0 : index
    %c0_89 = arith.constant 0 : index
    %124 = vector.load %arg5[%c3, %c0_88, %c0_89] : memref<4x32x160xbf16, #tpu.memory_space<vmem>>, vector<1x32x160xbf16>
    %125 = vector.shape_cast %124 : vector<1x32x160xbf16> to vector<32x160xbf16>
    %cst_90 = arith.constant dense<0.000000e+00> : vector<32x256xf32>
    %126 = tpu.matmul %125, %123, %cst_90 {dimension_numbers = #tpu.dot_dimension_numbers<[1], [0], [0], [1], [0, 0, 1, 1], [], []>} : vector<32x160xbf16>, vector<160x256xbf16>, vector<32x256xf32> -> vector<32x256xf32>
    %c3_91 = arith.constant 3 : index
    %c0_92 = arith.constant 0 : index
    %c0_93 = arith.constant 0 : index
    %127 = vector.load %arg6[%c3_91, %c0_92, %c0_93] : memref<4x32x1xf32, #tpu.memory_space<vmem>>, vector<1x32x1xf32>
    %128 = vector.shape_cast %127 : vector<1x32x1xf32> to vector<32x1xf32>
    %129 = vector.broadcast %128 : vector<32x1xf32> to vector<32x256xf32>
    %130 = arith.addf %126, %129 : vector<32x256xf32>
    %cst_94 = arith.constant 0.000000e+00 : f32
    %131 = vector.broadcast %cst_94 : f32 to vector<32x256xf32>
    %132 = arith.maximumf %130, %131 : vector<32x256xf32>
    %133 = arith.addf %132, %113 : vector<32x256xf32>
    %134 = arith.truncf %133 : vector<32x256xf32> to vector<32x256xbf16>
    %c0_95 = arith.constant 0 : index
    %c128_96 = arith.constant 128 : index
    %135 = vector.load %arg11[%c0_95, %c128_96] : memref<32x512xbf16, #tpu.memory_space<vmem>>, vector<32x256xbf16>
    tpu.vector_store %arg11[%c0_95, %c128_96], %134 {strides = array<i32>} : memref<32x512xbf16, #tpu.memory_space<vmem>>, vector<32x256xbf16>,
    %136 = arith.extui %45 : i1 to i32
    %c0_i32_97 = arith.constant 0 : i32
    %137 = arith.cmpi ne, %136, %c0_i32_97 : i32
    scf.if %137 {
      %147 = vector.broadcast %37 : vector<1x256xbf16> to vector<32x256xbf16>
      %148 = arith.mulf %134, %147 : vector<32x256xbf16>
      %c0_107 = arith.constant 0 : index
      %c128_108 = arith.constant 128 : index
      %149 = vector.load %arg11[%c0_107, %c128_108] : memref<32x512xbf16, #tpu.memory_space<vmem>>, vector<32x256xbf16>
      tpu.vector_store %arg11[%c0_107, %c128_108], %148 {strides = array<i32>} : memref<32x512xbf16, #tpu.memory_space<vmem>>, vector<32x256xbf16>,
    } else {
    }
    %c0_98 = arith.constant 0 : index
    %c152 = arith.constant 152 : index
    %138 = vector.load %arg11[%c0_98, %c152] : memref<32x512xbf16, #tpu.memory_space<vmem>>, vector<32x128xbf16>
    %c0_99 = arith.constant 0 : index
    %c0_100 = arith.constant 0 : index
    %139 = vector.load %arg7[%c0_99, %c0_100] : memref<8x32xbf16, #tpu.memory_space<vmem>>, vector<8x32xbf16>
    %cst_101 = arith.constant dense<0.000000e+00> : vector<8x128xf32>
    %140 = tpu.matmul %139, %138, %cst_101 {dimension_numbers = #tpu.dot_dimension_numbers<[1], [0], [0], [1], [0, 0, 1, 1], [], []>} : vector<8x32xbf16>, vector<32x128xbf16>, vector<8x128xf32> -> vector<8x128xf32>
    %c0_102 = arith.constant 0 : index
    %c0_103 = arith.constant 0 : index
    %141 = vector.load %arg8[%c0_102, %c0_103] : memref<8x1xf32, #tpu.memory_space<vmem>>, vector<8x1xf32>
    %142 = vector.broadcast %141 : vector<8x1xf32> to vector<8x128xf32>
    %143 = arith.addf %140, %142 : vector<8x128xf32>
    %c0_104 = arith.constant 0 : index
    %c0_105 = arith.constant 0 : index
    %c0_106 = arith.constant 0 : index
    %144 = vector.load %arg9[%c0_104, %c0_105, %c0_106] : memref<1x8x128xf32, #tpu.memory_space<vmem>>, vector<1x8x128xf32>
    %145 = vector.shape_cast %144 : vector<1x8x128xf32> to vector<8x128xf32>
    %146 = vector.shape_cast %143 : vector<8x128xf32> to vector<1x8x128xf32>
    tpu.vector_store %arg9[%c0_104, %c0_105, %c0_106], %146 {strides = array<i32>} : memref<1x8x128xf32, #tpu.memory_space<vmem>>, vector<1x8x128xf32>,
    return
  }
  func.func @transform_1(%arg0: i32, %arg1: i32) -> (i32, i32) {
    %c0_i32 = arith.constant 0 : i32
    %c0_i32_0 = arith.constant 0 : i32
    %c0_i32_1 = arith.constant 0 : i32
    return %c0_i32, %c0_i32_0 : i32, i32
  }
  func.func @transform_2(%arg0: i32, %arg1: i32) -> (i32, i32) {
    %c0_i32 = arith.constant 0 : i32
    %c0_i32_0 = arith.constant 0 : i32
    %c0_i32_1 = arith.constant 0 : i32
    return %c0_i32, %c0_i32_0 : i32, i32
  }
  func.func @transform_3(%arg0: i32, %arg1: i32) -> (i32, i32, i32) {
    %c0_i32 = arith.constant 0 : i32
    %c0_i32_0 = arith.constant 0 : i32
    %c0_i32_1 = arith.constant 0 : i32
    %c0_i32_2 = arith.constant 0 : i32
    return %c0_i32, %c0_i32_0, %c0_i32_1 : i32, i32, i32
  }
  func.func @transform_4(%arg0: i32, %arg1: i32) -> (i32, i32, i32) {
    %c0_i32 = arith.constant 0 : i32
    %c0_i32_0 = arith.constant 0 : i32
    %c0_i32_1 = arith.constant 0 : i32
    %c0_i32_2 = arith.constant 0 : i32
    return %c0_i32, %c0_i32_0, %c0_i32_1 : i32, i32, i32
  }
  func.func @transform_5(%arg0: i32, %arg1: i32) -> (i32, i32) {
    %c0_i32 = arith.constant 0 : i32
    %c0_i32_0 = arith.constant 0 : i32
    %c0_i32_1 = arith.constant 0 : i32
    return %c0_i32, %c0_i32_0 : i32, i32
  }
  func.func @transform_6(%arg0: i32, %arg1: i32) -> (i32, i32) {
    %c0_i32 = arith.constant 0 : i32
    %c0_i32_0 = arith.constant 0 : i32
    %c0_i32_1 = arith.constant 0 : i32
    return %c0_i32, %c0_i32_0 : i32, i32
  }
  func.func @transform_7(%arg0: i32, %arg1: i32) -> (i32, i32, i32) {
    %c0_i32 = arith.constant 0 : i32
    %c0_i32_0 = arith.constant 0 : i32
    return %arg0, %c0_i32, %arg1 : i32, i32, i32
  }
}

</mosaic_0001>

<bundles_post_ra>
// kernel: tpu_custom_call.1
= control target key start
LH: loop header
LB: loop body
LE: loop exit
PB: predicated region body
PF: predicated region fallthrough
CT: control target
= control target key end

     0   :  { %12 = vsyncpa [#allocation6], 0  ;;  %s4163_s0 = inlined_call_operand.hbm [shape: bf16[2,16,512], index: 0, kind: input, shape index: {}]   ;;  %s4164_s1 = inlined_call_operand.vmem [shape: bf16[32,16], index: 1, kind: input, shape index: {}]   ;;  %s4165_s2 = inlined_call_operand.vmem [shape: f32[32,1], index: 2, kind: input, shape index: {}]   ;;  %s4166_s3 = inlined_call_operand.vmem [shape: bf16[4,32,160], index: 3, kind: input, shape index: {}]   ;;  %s4167_s4 = inlined_call_operand.vmem [shape: f32[4,32,1], index: 4, kind: input, shape index: {}]   ;;  %s4168_s5 = inlined_call_operand.vmem [shape: bf16[8,32], index: 5, kind: input, shape index: {}]   ;;  %s4169_s6 = inlined_call_operand.vmem [shape: f32[8,1], index: 6, kind: input, shape index: {}]   ;;  %s4170_s7 = inlined_call_operand.hbm [shape: f32[2,8,384], index: 7, kind: output, shape index: {}]  }
   0x1   :  { %14 = vsyncpa [#allocation6 + $0x1], 0  ;;  %s3190_s24 = smov 0   ;;  %s3192_s25 = smov 0  }
   0x2   :  { %s3194_s26 = smov 0   ;;  %s3196_s27 = smov 0  }
   0x3   :  { %s3198_s28 = smov 0   ;;  %s3200_s29 = smov 0  }
   0x4   :  { %s3202_s30 = smov 0   ;;  %s3204_s8 = smov 0  }
   0x5 LB: > { %4181 = sst [smem:[#allocation11_spill]] %s3096_s24  ;;  %s2343_s9 = sadd.s32 4294967295, %s3124_s8   ;;  %s3124_s8 = sphi %s3204_s8, %s20_s8   ;;  %s3120_s30 = sphi %s3202_s30, %s4206_s30   ;;  %s3116_s29 = sphi %s3200_s29, %s4205_s29   ;;  %s3112_s28 = sphi %s3198_s28, %s4204_s28   ;;  %s3108_s27 = sphi %s3196_s27, %s4203_s27   ;;  %s3104_s26 = sphi %s3194_s26, %s4202_s26   ;;  %s3100_s25 = sphi %s3192_s25, %s4208_s25   ;;  %s3096_s24 = sphi %s3190_s24, %s4207_s24  }
   0x6   : > { %4182 = sst [smem:[#allocation12_spill]] %s3104_s26  ;;  %s2344_s10 = sadd.s32 4294967294, %s3124_s8  }
   0x7   : > { %4183 = sst [smem:[#allocation13_spill]] %s3116_s29  ;;  %s29_s11 = sadd.s32 1, %s3116_s29 }
   0x8   : > { %4184 = sst [smem:[#allocation14_spill]] %s3120_s30  ;;  %p30_p0 = scmp.ge.s32.totalorder %s29_s11, 3 }
   0x9   : > { %4185 = sst [smem:[#allocation15_spill]] %s3124_s8  ;;  %s32_s12 = sadd.s32 1, %s3120_s30 }
   0xa   : > { %p177_p1 = scmp.ne.s32.totalorder %s3104_s26, %s3100_s25  ;;  %p178_p2 = scmp.eq.s32.totalorder %s2343_s9, 5 }
   0xb   : > { %s4210_s11 = smov (%p30_p0, %s29_s11), 0  ;;  %s4212_s12 = smov (!%p30_p0, %s32_s12), %s3120_s30 }
   0xc   : > { %4186 = sst [smem:[#allocation16_spill]] %s4210_s11  ;;  %s163_s13 = ssub.s32 %s3116_s29, %s4210_s11 }
   0xd   : > { %p3241_p3 = por %p178_p2, %p177_p1  ;;  %p34_p4 = scmp.ge.s32.totalorder %s4212_s12, 2 }
   0xe   : > { %p183_p5 = scmp.ne.s32.totalorder %s3100_s25, %s3096_s24  ;;  %p184_p6 = scmp.eq.s32.totalorder %s2344_s10, 5 }
   0xf   : > { %p2346_p7 = scmp.ge.s32.totalorder %s3124_s8, 1  ;;  %s4214_s12 = smov (%p34_p4, %s4212_s12), 0 }
  0x10   : > { %4188 = sst [smem:[#allocation17_spill]] %s4214_s12  ;;  %p3250_p8 = por %p184_p6, %p183_p5 }
  0x11   : > { %p220_p9 = scmp.lt.s32.totalorder %s3124_s8, 7  ;;  %s162_s16 = ssub.s32 %s3120_s30, %s4214_s12 }
  0x12   : > { %s4189_s15 = scalar_select %p3250_p8, 1, 0 }
  0x13   : > { %s167_s17 = sadd.s32 1, %s3104_s26  ;;  %s164_s18 = sor.u32 %s163_s13, %s162_s16 }
  0x14   : > { %4190 = sst [smem:[#allocation18_spill]] %s4189_s15  ;;  %p221_p10 = pnand %p2346_p7, %p220_p9 }
  0x15   : > { %p165_p11 = scmp.eq.s32.totalorder %s164_s18, 0  ;;  %s4171_s20 = sand.u32 (!%p221_p10), 1, %s3100_s25  }
  0x16   : > { %224 = sbr.rel (%p221_p10) target bundleno = 2438 (0x986), region = 44  ;;  %p246_p12 = scmp.lt.s32.totalorder (!%p221_p10), %s3108_s27, 0 }
  0x17   : > { %s3259_s19 = scalar_select %p165_p11, %s3104_s26, %s167_s17  }
  0x18   : > { %s3265_s21 = sshll.u32 (!%p221_p10), %s4171_s20, 3  ;;  %s247_s22 = ssub.s32 (!%p221_p10), 0, %s3108_s27 }
  0x19   : > { %4191 = sst [smem:[#allocation19_spill]] %s3259_s19  ;;  %s2348_s23 = smin.u32 (!%p221_p10), %s3108_s27, %s247_s22 }
  0x1a   : > { %s249_s9 = sand.u32 (!%p221_p10), 1, %s2348_s23   ;;  %p2351_p0 = scmp.ne.s32.totalorder (!%p221_p10), %s3108_s27, 0 }
  0x1b   : > { %s250_s10 = ssub.s32 0, %s249_s9  ;;  %s2769_s17 = sshll.u32 (!%p2351_p0), %s3112_s28, 5 }
  0x1c   : > { %s4216_s10 = smov (!%p246_p12, %s250_s10), %s249_s9  ;;  %261 = sbr.rel (%p2351_p0) target bundleno = 45 (0x2d), region = 48 }
  0x1d   : > { %p2350_p13 = scmp.lt.s32.totalorder %s4216_s10, 0  ;;  %s256_s13 = sadd.s32 2, %s4216_s10 }
  0x1e   : > { %s273_s12 = scalar_lea.hbm (!%p2351_p0), %s4163_s0, %s2769_s17  ;;  %s3127_s22 = smov (!%p2351_p0), [#allocation2]  }
  0x1f   : > { %s4218_s13 = smov (!%p2350_p13, %s256_s13), %s4216_s10  ;;  %s276_s23 = sshll.u32 (!%p2351_p0), %s3127_s22, 4  ;;  %s277_s23 = int_to_ptr.vmem [resolvable:$true] %s276_s23 }
  0x20   : > { %s274_s9 = sshll.u32 (!%p2351_p0), %s273_s12, 4  ;;  %s2980_s29 = scalar_lea.hbm (!%p2351_p0), %s4163_s0, 64  ;;  %s275_s9 = int_to_ptr.hbm [resolvable:$true] %s274_s9 }
  0x21   : > { %v3126_v0 = vmov 0   ;;  %s2976_s10 = sshra.s32 %s275_s9, 4  ;;  %s2977_s10 = int_to_ptr.hbm [resolvable:$true] %s2976_s10 }
  0x22   : > { %262 = vst [vmem:[#allocation3] sm:$0xf] %v3126_v0  ;;  %s2978_s16 = scalar_lea.hbm %s2977_s10, 16  ;;  %p2981_p2 = scmp.lt.s32.totalorder %s2977_s10, %s4163_s0 }
  0x23   : > { %263 = vst [vmem:[#allocation3 + $0x10] sm:$0xf] %v3126_v0  ;;  %p2979_p1 = scmp.ne.s32.totalorder %s2977_s10, %s2978_s16  ;;  %p2982_p4 = scmp.lt.s32.totalorder %s2980_s29, %s2978_s16 }
  0x24   : > { %264 = vst [vmem:[#allocation3 + $0x20] sm:$0xf] %v3126_v0 }
  0x25   : > { %265 = vst [vmem:[#allocation3 + $0x30] sm:$0xf] %v3126_v0  ;;  %p2983_p5 = por %p2982_p4, %p2981_p2 }
  0x26   : > { %266 = vst [vmem:[#allocation3 + $0xc] sm:$0xf] %v3126_v0 }
  0x27   : > { %p2984_p6 = pnand %p2983_p5, %p2979_p1 }
  0x29   : > { %2987 = shalt.err (!%p2984_p6)  }
  0x2a   : > { %s3128_s12 = smov 256   ;;  %s3129_s17 = smov 128   ;;  %267 = vst [vmem:[#allocation3 + $0x1c] sm:$0xf] %v3126_v0 }
  0x2b   : > { %s3130_s18 = smov 8   ;;  %268 = vst [vmem:[#allocation3 + $0x2c] sm:$0xf] %v3126_v0 }
  0x2c   : > { %281 = dma.hbm_to_vmem [thread:$0]  %s275_s9, 256, %s277_s23, [#allocation4], %s3128_s12, %s3129_s17, %s3130_s18  ;;  %269 = vst [vmem:[#allocation3 + $0x3c] sm:$0xf] %v3126_v0 }
  0x2d PF: > { %s3284_s30 = sshll.u32 %s3108_s27, 7  ;;  %s2770_s11 = sshll.u32 %s4218_s13, 4 }
  0x2e   : > { %s3287_s19 = scalar_lea.vmem [#allocation2], %s2770_s11  ;;  %s286_s29 = scalar_lea.sflag [#allocation4], %s4218_s13 }
  0x2f   : > { %3088 = dma.done.wait %s286_s29, 256 }
  0x30   : > { %3089 = vsyncadd %s286_s29, 4294967040  ;;  %s291_s16 = sadd.s32 1, %s3108_s27  ;;  %s296_s22 = ssub.s32 1, %s4218_s13  ;;  %v316_v1 = vlaneseq  ;;  %v3131_v2 = vmov 0   ;;  %v344_v4 = vld [vmem:[%s4165_s2] sm:$0xff]  ;;  %v346_v5 = vld [vmem:[%s4165_s2 + $0x10] sm:$0xff] }
  0x31   : > { %p3292_p7 = scmp.lt.s32.totalorder %s291_s16, 3  ;;  %2960 = vset.pattern.permute.xlu0 %v3131_v2  ;;  %2961 = vset.pattern.permute.xlu1 %v3131_v2  ;;  %s2772_s9 = sadd.s32 128, %s3284_s30 }
  0x32   : > { %s2359_s10 = sshll.u32 %s3112_s28, 3  ;;  %s298_s20 = sshra.s32 %s2772_s9, 7  ;;  %v317_v3 = vand.u32 127, %v316_v1  ;;  %350 = vperm.xlu0 %2960, %v344_v4   ;;  %360 = vperm.xlu1 %2961, %v346_v5  }
  0x33   : > { %s2773_s12 = sshll.u32 %s296_s22, 4  ;;  %s301_s17 = sadd.s32 %s2359_s10, %s298_s20 }
  0x34   : > { %s2360_s18 = sshll.u32 %s301_s17, 2  ;;  %s306_s16 = scalar_lea.vmem [#allocation2], %s2773_s12  ;;  %v318_v6 = vadd.s32 128, %v317_v3 }
  0x35   : > { %s303_s13 = scalar_lea.hbm %s4163_s0, %s2360_s18  ;;  %s3303_s26 = sshll.u32 %s306_s16, 4  ;;  %s311_s26 = int_to_ptr.vmem [resolvable:$true] %s3303_s26 }
  0x36   : > { %s308_s15 = sshll.u32 %s303_s13, 4  ;;  %s3314_s20 = scalar_lea.sflag [#allocation4], %s296_s22  ;;  %s3309_s15 = int_to_ptr.hbm [resolvable:$true] %s308_s15 }
  0x37   : > { %s3000_s12 = sshra.s32 %s3309_s15, 4  ;;  %s3006_s18 = scalar_lea.hbm %s4163_s0, 64  ;;  %s3001_s12 = int_to_ptr.hbm [resolvable:$true] %s3000_s12 }
  0x38   : > { %s3002_s17 = scalar_lea.hbm %s3001_s12, 16  ;;  %p3007_p12 = scmp.lt.s32.totalorder %s3001_s12, %s4163_s0 }
  0x39   : > { %p3003_p9 = scmp.ne.s32.totalorder %s3001_s12, %s3002_s17  ;;  %p3008_p13 = scmp.lt.s32.totalorder %s3006_s18, %s3002_s17 }
  0x3b   : > { %p3004_p10 = pnand %p3003_p9, %p3292_p7  ;;  %p3009_p0 = por %p3008_p13, %p3007_p12 }
  0x3d   : > { %p3005_p11 = pneg %p3004_p10 }
  0x3f   : > { %p3010_p1 = pnand %p3009_p0, %p3005_p11 }
  0x41   : > { %3013 = shalt.err (!%p3010_p1)  }
  0x42   : > { %s3014_s22 = sshra.s32 %s311_s26, 4  ;;  %s3132_s16 = smov [#allocation2]   ;;  %s3015_s22 = int_to_ptr.vmem [resolvable:$true] %s3014_s22 }
  0x43   : > { %s3016_s13 = scalar_lea.vmem %s3015_s22, 16  ;;  %s3020_s9 = scalar_lea.vmem %s3132_s16, 32 }
  0x44   : > { %p3017_p2 = scmp.ne.s32.totalorder %s3015_s22, %s3016_s13  ;;  %p3021_p6 = scmp.lt.s32.totalorder %s3015_s22, [#allocation2] }
  0x45   : > { %p3022_p9 = scmp.lt.s32.totalorder %s3020_s9, %s3016_s13 }
  0x46   : > { %p3018_p4 = pnand %p3017_p2, %p3292_p7 }
  0x47   : > { %p3023_p10 = por %p3022_p9, %p3021_p6 }
  0x48   : > { %p3019_p5 = pneg %p3018_p4 }
  0x4a   : > { %p3024_p8 = pnand %p3023_p10, %p3019_p5 }
  0x4c   : > { %3027 = shalt.err (!%p3024_p8)  }
  0x4d   : > { %s3133_s10 = smov 256   ;;  %s3134_s12 = smov 128   ;;  %v345_v10 = vld [vmem:[%s4165_s2 + $0x8] sm:$0xff]  ;;  %v347_v11 = vld [vmem:[%s4165_s2 + $0x18] sm:$0xff]  ;;  %v3136_v12 = vmov 0.0   ;;  %v2774_v21 = vld [vmem:[%s4164_s1] sm:$0xff] }
  0x4e   : > { %s3135_s17 = smov 8   ;;  %s2363_s24 = sadd.s32 4294967272, %s3284_s30  ;;  %355 = vperm.xlu0 %2960, %v345_v10   ;;  %365 = vperm.xlu1 %2961, %v347_v11   ;;  %vm388_vm6 = vcmask 130048   ;;  %v2775_v22 = vld [vmem:[%s4164_s1 + $0x8] sm:$0xff] }
  0x4f   : > { %2864 = dma.hbm_to_vmem [thread:$0]  (%p3292_p7), %s3309_s15, 256, %s311_s26, %s3314_s20, %s3133_s10, %s3134_s12, %s3135_s17 }
  0x50   : > { %s335_s8 = sadd.s32 232, %s3284_s30  ;;  %v320_v7 = vstv %s2363_s24  ;;  %p334_p11 = scmp.lt.s32.totalorder %s2363_s24, 0  ;;  %v2376_v14 = vld [vmem:[%s3287_s19] sm:$0xf]  ;;  %v2777_v15 = vld [vmem:[%s3287_s19 + $0x4] sm:$0xf0] }
  0x51   : > { %p336_p12 = scmp.gt.s32.totalorder %s335_s8, 320  ;;  %v321_v8 = vadd.s32 %v320_v7, %v317_v3  ;;  %v322_v9 = vadd.s32 %v320_v7, %v318_v6  ;;  %v2377_v17 = vor.u32 %v2777_v15, %v2376_v14  ;;  %v2776_v18 = vld [vmem:[%s3287_s19 + $0x4] sm:$0xf]  ;;  %v2378_v19 = vld [vmem:[%s3287_s19 + $0x8] sm:$0xf0] }
  0x52   : > { %v2381_v20 = vor.u32 %v2776_v18, %v2378_v19 }
  0x53   : > { %p3341_p8 = por %p336_p12, %p334_p11  ;;  %vm323_vm0 = vcmp.ge.s32.totalorder %v321_v8, 0  ;;  %vm324_vm1 = vcmp.ge.s32.totalorder %v322_v9, 0  ;;  %vm325_vm2 = vcmp.lt.s32.totalorder %v321_v8, 320  ;;  %vm326_vm3 = vcmp.lt.s32.totalorder %v322_v9, 320  ;;  %402 = vmatpush.bf16.msra.mxu0 %v2377_v17 }
  0x54   : > { %vm327_vm4 = vmand %vm323_vm0, %vm325_vm2  ;;  %421 = vmatpush.bf16.msra.mxu1 %v2381_v20 }
  0x55   : > { %vm328_vm5 = vmand %vm324_vm1, %vm326_vm3  ;;  %v3348_v13 = vsel %vm327_vm4, 1.0, %v3136_v12 }
  0x56   : > { %v3352_v16 = vsel %vm328_vm5, 1.0, %v3136_v12  ;;  %2382 = vmatmul.msk.bf16.vlgmr.msra.gmra.mxu0 %vm388_vm6, %v2774_v21 }
  0x57   : > { %2384 = vmatmul.msk.bf16.vlgmr.msra.gmra.mxu1 %vm388_vm6, %v2774_v21 }
  0x66   : > { %2383 = vmatmul.msk.bf16.gmra.mxu0 %vm388_vm6, %v2775_v22 }
  0x67   : > { %2385 = vmatmul.msk.bf16.gmra.mxu1 %vm388_vm6, %v2775_v22 }
  0xa4   : > { %v351_v23 = vpop.permute.xlu0 %350  ;;  %v361_v35 = vpop.permute.xlu1 %360 }
  0xc0   : > { %v356_v29 = vpop.permute.xlu0 %355  ;;  %v366_v41 = vpop.permute.xlu1 %365 }
  0xd3   : > { %v404_v24 = vpop.f32.mrf.mxu0 }
  0xd4   : > { %v3362_v25 = vadd.f32 %v404_v24, %v351_v23  ;;  %v423_v26 = vpop.f32.mrf.mxu1 }
  0xd5   : > { %v3364_v27 = vadd.f32 %v423_v26, %v351_v23 }
  0xd7   : > { %v433_v28 = vpack.c.bf16 %v3364_v27, %v3362_v25 }
  0xd9   : > { %437 = vst [vmem:[#allocation3 + $0x4] sm:$0xff] %v433_v28  ;;  %v444_v47 = vunpack.c.l.bf16 (%p3341_p8), %v433_v28  ;;  %v445_v48 = vunpack.c.h.bf16 (%p3341_p8), %v433_v28 }
  0xdb   : > { %v406_v30 = vpop.f32.mrf.mxu0  ;;  %v454_v55 = vmul.f32 (%p3341_p8), %v3348_v13, %v444_v47  ;;  %v455_v56 = vmul.f32 (%p3341_p8), %v3352_v16, %v445_v48 }
  0xdc   : > { %v3368_v31 = vadd.f32 %v406_v30, %v356_v29  ;;  %v425_v32 = vpop.f32.mrf.mxu1 }
  0xdd   : > { %v3370_v33 = vadd.f32 %v425_v32, %v356_v29  ;;  %v462_v63 = vpack.c.bf16 (%p3341_p8), %v455_v56, %v454_v55 }
  0xdf   : > { %v434_v34 = vpack.c.bf16 %v3370_v33, %v3368_v31  ;;  %466 = vst [vmem:[#allocation3 + $0x4] sm:$0xff] (%p3341_p8), %v462_v63 }
  0xe1   : > { %438 = vst [vmem:[#allocation3 + $0x14] sm:$0xff] %v434_v34  ;;  %v446_v49 = vunpack.c.l.bf16 (%p3341_p8), %v434_v34  ;;  %v447_v50 = vunpack.c.h.bf16 (%p3341_p8), %v434_v34 }
  0xe3   : > { %v409_v36 = vpop.f32.mrf.mxu0  ;;  %v456_v57 = vmul.f32 (%p3341_p8), %v3348_v13, %v446_v49  ;;  %v457_v58 = vmul.f32 (%p3341_p8), %v3352_v16, %v447_v50 }
  0xe4   : > { %v3374_v37 = vadd.f32 %v409_v36, %v361_v35  ;;  %v428_v38 = vpop.f32.mrf.mxu1 }
  0xe5   : > { %v3376_v39 = vadd.f32 %v428_v38, %v361_v35  ;;  %v463_v0 = vpack.c.bf16 (%p3341_p8), %v457_v58, %v456_v57 }
  0xe7   : > { %v435_v40 = vpack.c.bf16 %v3376_v39, %v3374_v37  ;;  %467 = vst [vmem:[#allocation3 + $0x14] sm:$0xff] (%p3341_p8), %v463_v0 }
  0xe9   : > { %439 = vst [vmem:[#allocation3 + $0x24] sm:$0xff] %v435_v40  ;;  %v448_v51 = vunpack.c.l.bf16 (%p3341_p8), %v435_v40  ;;  %v449_v52 = vunpack.c.h.bf16 (%p3341_p8), %v435_v40 }
  0xeb   : > { %v411_v42 = vpop.f32.mrf.mxu0  ;;  %v458_v59 = vmul.f32 (%p3341_p8), %v3348_v13, %v448_v51  ;;  %v459_v60 = vmul.f32 (%p3341_p8), %v3352_v16, %v449_v52 }
  0xec   : > { %v3380_v43 = vadd.f32 %v411_v42, %v366_v41  ;;  %v430_v44 = vpop.f32.mrf.mxu1 }
  0xed   : > { %v3382_v45 = vadd.f32 %v430_v44, %v366_v41  ;;  %443 = sbr.rel (!%p3341_p8) target bundleno = 248 (0xf8), region = 56  ;;  %v464_v1 = vpack.c.bf16 (%p3341_p8), %v459_v60, %v458_v59 }
  0xef   : > { %v436_v46 = vpack.c.bf16 %v3382_v45, %v3380_v43  ;;  %468 = vst [vmem:[#allocation3 + $0x24] sm:$0xff] (%p3341_p8), %v464_v1 }
  0xf1   : > { %440 = vst [vmem:[#allocation3 + $0x34] sm:$0xff] %v436_v46  ;;  %v450_v53 = vunpack.c.l.bf16 (%p3341_p8), %v436_v46  ;;  %v451_v54 = vunpack.c.h.bf16 (%p3341_p8), %v436_v46 }
  0xf3   : > { %v460_v61 = vmul.f32 %v3348_v13, %v450_v53  ;;  %v461_v62 = vmul.f32 %v3352_v16, %v451_v54 }
  0xf5   : > { %v465_v3 = vpack.c.bf16 %v461_v62, %v460_v61 }
  0xf7   : > { %469 = vst [vmem:[#allocation3 + $0x34] sm:$0xff] %v465_v3 }
  0xf8 PF: > { %2962 = vset.pattern.permute.xlu1 %v3131_v2  ;;  %2964 = vset.pattern.permute.xlu0 %v3131_v2  ;;  %v2400_v7 = vld [vmem:[#allocation3 + $0x20] sm:$0xf]  ;;  %v2782_v8 = vld [vmem:[#allocation3 + $0x2c] sm:$0xf0]  ;;  %s3137_s19 = smov 121   ;;  %s3138_s13 = smov 112  }
  0xf9   : > { %2963 = vset.pattern.permute.xlu2 %v3131_v2  ;;  %v3401_v9 = vor.u32 %v2782_v8, %v2400_v7  ;;  %v2388_v11 = vld [vmem:[#allocation3] sm:$0xf]  ;;  %v2779_v12 = vld [vmem:[#allocation3 + $0xc] sm:$0xf0]  ;;  %v2778_v15 = vld [vmem:[#allocation3 + $0x4] sm:$0xf] }
  0xfa   : > { %v2390_v17 = vld [vmem:[#allocation3 + $0x10] sm:$0xf0]  ;;  %v3407_v19 = vor.u32 %v2779_v12, %v2388_v11  ;;  %v2396_v21 = vld [vmem:[#allocation3 + $0x8] sm:$0xf]  ;;  %v2780_v22 = vld [vmem:[#allocation3 + $0x14] sm:$0xf0] }
  0xfb   : > { %592 = vrot.lane.b32.xlu0 %v3401_v9, %s3137_s19  ;;  %v3405_v18 = vor.u32 %v2778_v15, %v2390_v17  ;;  %v3411_v26 = vor.u32 %v2780_v22, %v2396_v21  ;;  %v2428_v34 = vld [vmem:[#allocation3 + $0x4] sm:$0xf]  ;;  %v2789_v35 = vld [vmem:[#allocation3 + $0x10] sm:$0xf0]  ;;  %v2448_v36 = vld [vmem:[#allocation3 + $0x2c] sm:$0xf] }
  0xfc   : > { %v2408_v4 = vld [vmem:[#allocation3 + $0x28] sm:$0xf]  ;;  %v2781_v10 = vld [vmem:[#allocation3 + $0x24] sm:$0xf]  ;;  %v2793_v38 = vld [vmem:[#allocation3 + $0x38] sm:$0xf0]  ;;  %v2429_v40 = vor.u32 %v2789_v35, %v2428_v34 }
  0xfd   : > { %588 = vrot.lane.b32.xlu2 %v3405_v18, %s3137_s19  ;;  %v2791_v23 = vld [vmem:[#allocation3 + $0x28] sm:$0xf]  ;;  %v2440_v28 = vld [vmem:[#allocation3 + $0x24] sm:$0xf]  ;;  %v2430_v42 = vld [vmem:[#allocation3 + $0x14] sm:$0xf0]  ;;  %v2449_v44 = vor.u32 %v2793_v38, %v2448_v36 }
  0xfe   : > { %v2783_v5 = vld [vmem:[#allocation3 + $0x34] sm:$0xf0]  ;;  %v2402_v14 = vld [vmem:[#allocation3 + $0x30] sm:$0xf0]  ;;  %v2788_v41 = vld [vmem:[#allocation3 + $0x8] sm:$0xf] }
  0xff   : > { %v3398_v6 = vor.u32 %v2783_v5, %v2408_v4  ;;  %v2405_v20 = vor.u32 %v2781_v10, %v2402_v14  ;;  %v2442_v24 = vld [vmem:[#allocation3 + $0x34] sm:$0xf0]  ;;  %v2792_v29 = vld [vmem:[#allocation3 + $0x30] sm:$0xf0]  ;;  %v2433_v46 = vor.u32 %v2788_v41, %v2430_v42  ;;  %v2420_v47 = vld [vmem:[#allocation3 + $0x24] sm:$0xf] }
 0x100   : > { %v2445_v30 = vor.u32 %v2791_v23, %v2442_v24  ;;  %v2441_v32 = vor.u32 %v2792_v29, %v2440_v28  ;;  %v2787_v48 = vld [vmem:[#allocation3 + $0x30] sm:$0xf0]  ;;  %v2436_v49 = vld [vmem:[#allocation3 + $0xc] sm:$0xf]  ;;  %v2790_v50 = vld [vmem:[#allocation3 + $0x18] sm:$0xf0] }
 0x101   : > { %596 = vrot.lane.b32.xlu1 %v3398_v6, %s3137_s19  ;;  %v2421_v51 = vor.u32 %v2787_v48, %v2420_v47  ;;  %v2786_v52 = vld [vmem:[#allocation3 + $0x28] sm:$0xf]  ;;  %v2422_v53 = vld [vmem:[#allocation3 + $0x34] sm:$0xf0]  ;;  %v2437_v54 = vor.u32 %v2790_v50, %v2436_v49  ;;  %s3139_s16 = smov 120   ;;  %s3140_s9 = smov 119  }
 0x102   : > { %v2425_v55 = vor.u32 %v2786_v52, %v2422_v53  ;;  %v2412_v56 = vld [vmem:[#allocation3 + $0x4] sm:$0xf]  ;;  %v2785_v57 = vld [vmem:[#allocation3 + $0x10] sm:$0xf0]  ;;  %v2784_v59 = vld [vmem:[#allocation3 + $0x8] sm:$0xf] }
 0x103   : > { %594 = vrot.lane.b32.xlu0 %v2405_v20, %s3137_s19  ;;  %v2413_v58 = vor.u32 %v2785_v57, %v2412_v56  ;;  %v2414_v60 = vld [vmem:[#allocation3 + $0x14] sm:$0xf0]  ;;  %vm598_vm7 = vcmask 990208   ;;  %vm581_vm8 = vcmask 916480   ;;  %vm540_vm9 = vcmask 982016  }
 0x104   : > { %v2417_v61 = vor.u32 %v2784_v59, %v2414_v60  ;;  %vm615_vm10 = vcmask 973824   ;;  %vm726_vm11 = vcmask 64512   ;;  %vm767_vm12 = vcmask 261120  }
 0x105   : > { %590 = vrot.lane.b32.xlu2 %v3411_v26, %s3137_s19 }
 0x109   : > { %586 = vrot.lane.b32.xlu1 %v3407_v19, %s3137_s19 }
 0x10b   : > { %575 = vrot.lane.b32.xlu0 %v2441_v32, %s3138_s13 }
 0x10d   : > { %569 = vrot.lane.b32.xlu2 %v2429_v40, %s3138_s13 }
 0x111   : > { %577 = vrot.lane.b32.xlu1 %v2445_v30, %s3138_s13 }
 0x113   : > { %571 = vrot.lane.b32.xlu0 %v2433_v46, %s3138_s13 }
 0x115   : > { %536 = vrot.lane.b32.xlu2 %v2421_v51, %s3139_s16 }
 0x119   : > { %579 = vrot.lane.b32.xlu1 %v2449_v44, %s3138_s13 }
 0x11b   : > { %538 = vrot.lane.b32.xlu0 %v2425_v55, %s3139_s16 }
 0x11d   : > { %532 = vrot.lane.b32.xlu2 %v2413_v58, %s3139_s16 }
 0x121   : > { %573 = vrot.lane.b32.xlu1 %v2437_v54, %s3138_s13 }
 0x123   : > { %534 = vrot.lane.b32.xlu0 %v2417_v61, %s3139_s16 }
 0x125   : > { %611 = vrot.lane.b32.xlu2 %v2445_v30, %s3140_s9 }
 0x129   : > { %609 = vrot.lane.b32.xlu1 %v2441_v32, %s3140_s9 }
 0x12b   : > { %603 = vrot.lane.b32.xlu0 %v2429_v40, %s3140_s9 }
 0x12d   : > { %613 = vrot.lane.b32.xlu2 %v2449_v44, %s3140_s9 }
 0x131   : > { %605 = vrot.lane.b32.xlu1 %v2433_v46, %s3140_s9 }
 0x133   : > { %607 = vrot.lane.b32.xlu0 %v2437_v54, %s3140_s9 }
 0x139   : > { %674 = vrot.lane.b32.xlu1 %v2405_v20, %s3135_s17 }
 0x13b   : > { %672 = vrot.lane.b32.xlu0 %v3401_v9, %s3135_s17 }
 0x157   : > { %v589_v62 = vpop.permute.xlu2 %588 }
 0x15f   : > { %v591_v1 = vpop.permute.xlu2 %590 }
 0x160   : > { %v600_v8 = vsel %vm598_vm7, %v589_v62, %v591_v1 }
 0x167   : > { %v570_v9 = vpop.permute.xlu2 %569 }
 0x16d   : > { %v593_v0 = vpop.permute.xlu0 %592 }
 0x16f   : > { %v537_v14 = vpop.permute.xlu2 %536 }
 0x173   : > { %v597_v63 = vpop.permute.xlu1 %596 }
 0x174   : > { %712 = vrot.lane.b32.xlu2 %v597_v63, %s3135_s17 }
 0x175   : > { %v595_v3 = vpop.permute.xlu0 %594 }
 0x176   : > { %v601_v4 = vsel %vm598_vm7, %v593_v0, %v595_v3  ;;  %v602_v28 = vsel %vm598_vm7, %v595_v3, %v597_v63 }
 0x177   : > { %708 = vrot.lane.b32.xlu1 %v601_v4, %s3135_s17  ;;  %v533_v21 = vpop.permute.xlu2 %532 }
 0x17b   : > { %v587_v5 = vpop.permute.xlu1 %586 }
 0x17c   : > { %706 = vrot.lane.b32.xlu2 %v591_v1, %s3135_s17  ;;  %v599_v29 = vsel %vm598_vm7, %v587_v5, %v589_v62 }
 0x17d   : > { %v576_v7 = vpop.permute.xlu0 %575 }
 0x17e   : > { %696 = vrot.lane.b32.xlu0 %v576_v7, %s3135_s17 }
 0x17f   : > { %704 = vrot.lane.b32.xlu1 %v600_v8, %s3135_s17  ;;  %v612_v34 = vpop.permute.xlu2 %611 }
 0x183   : > { %v578_v10 = vpop.permute.xlu1 %577 }
 0x184   : > { %v584_v12 = vsel %vm581_vm8, %v576_v7, %v578_v10 }
 0x185   : > { %v572_v11 = vpop.permute.xlu0 %571 }
 0x186   : > { %690 = vrot.lane.b32.xlu0 %v570_v9, %s3135_s17  ;;  %v582_v17 = vsel %vm581_vm8, %v570_v9, %v572_v11 }
 0x187   : > { %698 = vrot.lane.b32.xlu1 %v584_v12, %s3135_s17  ;;  %v614_v41 = vpop.permute.xlu2 %613 }
 0x188   : > { %v619_v44 = vsel %vm615_vm10, %v612_v34, %v614_v41  ;;  %v625_v41 = vld [vmem:[%s4167_s4 + $0x8] sm:$0xff] }
 0x18b   : > { %v580_v20 = vpop.permute.xlu1 %579 }
 0x18c   : > { %v585_v36 = vsel %vm581_vm8, %v578_v10, %v580_v20 }
 0x18d   : > { %v539_v15 = vpop.permute.xlu0 %538 }
 0x18e   : > { %688 = vrot.lane.b32.xlu2 %v539_v15, %s3135_s17  ;;  %684 = vrot.lane.b32.xlu0 %v537_v14, %s3135_s17  ;;  %v542_v23 = vsel %vm540_vm9, %v537_v14, %v539_v15 }
 0x18f   : > { %692 = vrot.lane.b32.xlu1 %v582_v17, %s3135_s17 }
 0x193   : > { %v574_v24 = vpop.permute.xlu1 %573 }
 0x195   : > { %v535_v22 = vpop.permute.xlu0 %534 }
 0x196   : > { %682 = vrot.lane.b32.xlu2 %v535_v22, %s3135_s17  ;;  %678 = vrot.lane.b32.xlu0 %v533_v21, %s3135_s17  ;;  %v541_v30 = vsel %vm540_vm9, %v533_v21, %v535_v22 }
 0x197   : > { %686 = vrot.lane.b32.xlu1 %v542_v23, %s3135_s17  ;;  %v624_v23 = vld [vmem:[%s4167_s4] sm:$0xff] }
 0x19b   : > { %v610_v32 = vpop.permute.xlu1 %609 }
 0x19c   : > { %v618_v35 = vsel %vm615_vm10, %v610_v32, %v612_v34  ;;  %v2452_v34 = vld [vmem:[%s4166_s3] sm:$0xf] }
 0x19d   : > { %v604_v38 = vpop.permute.xlu0 %603 }
 0x19e   : > { %710 = vrot.lane.b32.xlu2 %v602_v28, %s3135_s17  ;;  %702 = vrot.lane.b32.xlu0 %v599_v29, %s3135_s17 }
 0x19f   : > { %680 = vrot.lane.b32.xlu1 %v541_v30, %s3135_s17 }
 0x1a3   : > { %v606_v40 = vpop.permute.xlu1 %605 }
 0x1a4   : > { %v616_v42 = vsel %vm615_vm10, %v604_v38, %v606_v40 }
 0x1a5   : > { %v608_v46 = vpop.permute.xlu0 %607 }
 0x1a6   : > { %666 = vrot.lane.b32.xlu2 %v3407_v19, %s3135_s17  ;;  %720 = vrot.lane.b32.xlu0 %v610_v32, %s3135_s17  ;;  %v583_v19 = vsel %vm581_vm8, %v572_v11, %v574_v24 }
 0x1a7   : > { %722 = vrot.lane.b32.xlu1 %v618_v35, %s3135_s17  ;;  %v2795_v35 = vld [vmem:[%s4166_s3 + $0x4] sm:$0xf0] }
 0x1ab   : > { %v675_v47 = vpop.permute.xlu1 %674 }
 0x1ad   : > { %v673_v49 = vpop.permute.xlu0 %672 }
 0x1ae   : > { %700 = vrot.lane.b32.xlu2 %v585_v36, %s3135_s17  ;;  %668 = vrot.lane.b32.xlu0 %v3405_v18, %s3135_s17  ;;  %v617_v18 = vsel %vm615_vm10, %v606_v40, %v608_v46  ;;  %v729_v36 = vsel %vm726_vm11, %v673_v49, %v675_v47  ;;  %v627_v40 = vld [vmem:[%s4167_s4 + $0x18] sm:$0xff]  ;;  %v2453_v46 = vor.u32 %v2795_v35, %v2452_v34 }
 0x1af   : > { %676 = vrot.lane.b32.xlu1 %v3398_v6, %s3135_s17 }
 0x1b6   : > { %694 = vrot.lane.b32.xlu2 %v583_v19, %s3135_s17  ;;  %716 = vrot.lane.b32.xlu0 %v616_v42, %s3135_s17  ;;  %v2794_v19 = vld [vmem:[%s4166_s3 + $0x4] sm:$0xf] }
 0x1b7   : > { %724 = vrot.lane.b32.xlu1 %v619_v44, %s3135_s17  ;;  %v2454_v44 = vld [vmem:[%s4166_s3 + $0x8] sm:$0xf0] }
 0x1b8   : > { %v2457_v49 = vor.u32 %v2794_v19, %v2454_v44 }
 0x1be   : > { %714 = vrot.lane.b32.xlu2 %v604_v38, %s3135_s17  ;;  %718 = vrot.lane.b32.xlu0 %v617_v18, %s3135_s17  ;;  %v626_v38 = vld [vmem:[%s4167_s4 + $0x10] sm:$0xff] }
 0x1bf   : > { %630 = vperm.xlu1 %2962, %v624_v23  }
 0x1c6   : > { %670 = vrot.lane.b32.xlu2 %v3411_v26, %s3135_s17  ;;  %640 = vperm.xlu0 %2964, %v626_v38  }
 0x1c7   : > { %645 = vperm.xlu1 %2962, %v627_v40  }
 0x1ce   : > { %v713_v6 = vpop.permute.xlu2 %712  ;;  %635 = vperm.xlu2 %2963, %v625_v41  }
 0x1d6   : > { %v707_v48 = vpop.permute.xlu2 %706 }
 0x1e8   : > { %v689_v50 = vpop.permute.xlu2 %688 }
 0x1e9   : > { %v709_v51 = vpop.permute.xlu1 %708 }
 0x1f0   : > { %v697_v52 = vpop.permute.xlu0 %696  ;;  %v683_v53 = vpop.permute.xlu2 %682 }
 0x1f1   : > { %v705_v54 = vpop.permute.xlu1 %704 }
 0x1f2   : > { %v740_v26 = vsel %vm726_vm11, %v705_v54, %v707_v48 }
 0x1f8   : > { %v691_v55 = vpop.permute.xlu0 %690  ;;  %v711_v56 = vpop.permute.xlu2 %710 }
 0x1f9   : > { %v699_v57 = vpop.permute.xlu1 %698  ;;  %v741_v58 = vsel %vm726_vm11, %v709_v51, %v711_v56  ;;  %v742_v59 = vsel %vm726_vm11, %v711_v56, %v713_v6  ;;  %v2462_v56 = vld [vmem:[%s4166_s3 + $0x18] sm:$0xf0] }
 0x1fa   : > { %774 = vmatpush.bf16.msra.mxu2 %v741_v58  ;;  %812 = vmatpush.bf16.msrb.mxu0 %v742_v59  ;;  %v737_v10 = vsel %vm726_vm11, %v697_v52, %v699_v57 }
 0x1fe   : > { %813 = vmatpush.bf16.msrb.mxu0 %v740_v26 }
 0x200   : > { %v685_v60 = vpop.permute.xlu0 %684  ;;  %v667_v61 = vpop.permute.xlu2 %666 }
 0x201   : > { %v693_v62 = vpop.permute.xlu1 %692 }
 0x202   : > { %v735_v17 = vsel %vm726_vm11, %v691_v55, %v693_v62  ;;  %v2796_v55 = vld [vmem:[%s4166_s3 + $0x14] sm:$0xf] }
 0x203   : > { %v2465_v58 = vor.u32 %v2796_v55, %v2462_v56 }
 0x208   : > { %v679_v63 = vpop.permute.xlu0 %678  ;;  %v701_v0 = vpop.permute.xlu2 %700 }
 0x209   : > { %v687_v1 = vpop.permute.xlu1 %686  ;;  %v738_v3 = vsel %vm726_vm11, %v699_v57, %v701_v0 }
 0x20a   : > { %814 = vmatpush.bf16.msrb.mxu0 %v738_v3  ;;  %v734_v11 = vsel %vm726_vm11, %v687_v1, %v689_v50  ;;  %v733_v22 = vsel %vm726_vm11, %v685_v60, %v687_v1 }
 0x210   : > { %v703_v4 = vpop.permute.xlu0 %702  ;;  %v695_v5 = vpop.permute.xlu2 %694 }
 0x211   : > { %v681_v7 = vpop.permute.xlu1 %680  ;;  %v739_v8 = vsel %vm726_vm11, %v703_v4, %v705_v54  ;;  %v736_v9 = vsel %vm726_vm11, %v693_v62, %v695_v5  ;;  %v2797_v54 = vld [vmem:[%s4166_s3 + $0x14] sm:$0xf0] }
 0x212   : > { %775 = vmatpush.bf16.msra.mxu2 %v739_v8  ;;  %815 = vmatpush.bf16.msrb.mxu0 %v736_v9  ;;  %v732_v20 = vsel %vm726_vm11, %v681_v7, %v683_v53  ;;  %v731_v29 = vsel %vm726_vm11, %v679_v63, %v681_v7  ;;  %v2460_v53 = vld [vmem:[%s4166_s3 + $0x10] sm:$0xf] }
 0x213   : > { %v2461_v57 = vor.u32 %v2797_v54, %v2460_v53 }
 0x216   : > { %776 = vmatpush.bf16.msra.mxu2 %v737_v10  ;;  %816 = vmatpush.bf16.msrb.mxu0 %v734_v11 }
 0x218   : > { %v721_v12 = vpop.permute.xlu0 %720  ;;  %v715_v14 = vpop.permute.xlu2 %714 }
 0x219   : > { %v723_v15 = vpop.permute.xlu1 %722 }
 0x21a   : > { %777 = vmatpush.bf16.msra.mxu2 %v735_v17  ;;  %817 = vmatpush.bf16.msrb.mxu0 %v732_v20  ;;  %v745_v21 = vsel %vm726_vm11, %v721_v12, %v723_v15 }
 0x21b   : > { %799 = vmatpush.bf16.msra.mxu3 %v745_v21 }
 0x21e   : > { %778 = vmatpush.bf16.msra.mxu2 %v733_v22 }
 0x220   : > { %v669_v24 = vpop.permute.xlu0 %668  ;;  %v671_v32 = vpop.permute.xlu2 %670 }
 0x221   : > { %v677_v28 = vpop.permute.xlu1 %676  ;;  %v728_v42 = vsel %vm726_vm11, %v669_v24, %v671_v32 }
 0x222   : > { %779 = vmatpush.bf16.msra.mxu2 %v731_v29  ;;  %v730_v30 = vsel %vm726_vm11, %v675_v47, %v677_v28  ;;  %v727_v47 = vsel %vm726_vm11, %v667_v61, %v669_v24 }
 0x223   : > { %818 = vmatpush.bf16.msrb.mxu0 %v730_v30 }
 0x226   : > { %780 = vmatpush.bf16.msra.mxu2 %v729_v36 }
 0x227   : > { %819 = vmatpush.bf16.msrb.mxu0 %v728_v42 }
 0x228   : > { %v717_v18 = vpop.permute.xlu0 %716  ;;  %v636_v8 = vpop.permute.xlu2 %635 }
 0x229   : > { %v725_v6 = vpop.permute.xlu1 %724  ;;  %v743_v48 = vsel %vm726_vm11, %v715_v14, %v717_v18 }
 0x22a   : > { %781 = vmatpush.bf16.msra.mxu2 %v727_v47  ;;  %800 = vmatpush.bf16.msra.mxu3 %v743_v48  ;;  %v746_v50 = vsel %vm726_vm11, %v723_v15, %v725_v6 }
 0x22b   : > { %820 = vmatmul.bf16.vlgmr.msrb.gmra.mxu0 %v2453_v46  ;;  %837 = vmatpush.bf16.msrb.mxu1 %v746_v50 }
 0x22d   : > { %782 = vmatmul.bf16.vlgmr.msra.gmra.mxu2 %v2453_v46  ;;  %2466 = vmatmul.msk.bf16.vlgmr.msra.gmra.mxu3 %vm767_vm12, %v2457_v49 }
 0x230   : > { %v719_v51 = vpop.permute.xlu0 %718 }
 0x231   : > { %v744_v52 = vsel %vm726_vm11, %v717_v18, %v719_v51  ;;  %v631_v26 = vpop.permute.xlu1 %630 }
 0x232   : > { %838 = vmatpush.bf16.msrb.mxu1 %v744_v52 }
 0x235   : > { %2468 = vmatmul.msk.bf16.vlgmr.msrb.gmra.mxu1 %vm767_vm12, %v2457_v49 }
 0x238   : > { %v641_v24 = vpop.permute.xlu0 %640 }
 0x239   : > { %v646_v44 = vpop.permute.xlu1 %645 }
 0x23b   : > { %825 = vmatmul.bf16.gmra.mxu0 %v2461_v57 }
 0x23d   : > { %787 = vmatmul.bf16.gmra.mxu2 %v2461_v57  ;;  %2467 = vmatmul.msk.bf16.gmra.mxu3 %vm767_vm12, %v2465_v58 }
 0x245   : > { %2469 = vmatmul.msk.bf16.gmra.mxu1 %vm767_vm12, %v2465_v58 }
 0x2a8   : > { %v821_v59 = vpop.f32.mrf.mxu0 }
 0x2a9   : > { %v822_v60 = vadd.f32 %v821_v59, %v631_v26 }
 0x2b0   : > { %v783_v61 = vpop.f32.mrf.mxu2  ;;  %v802_v62 = vpop.f32.mrf.mxu3 }
 0x2b1   : > { %v784_v63 = vadd.f32 %v783_v61, %v631_v26  ;;  %v823_v0 = vpop.f32.mrf.mxu0 }
 0x2b2   : > { %v840_v1 = vpop.f32.mrf.mxu1  ;;  %v824_v14 = vadd.f32 %v823_v0, %v636_v8 }
 0x2b3   : > { %v803_v3 = vadd.f32 %v802_v62, %v784_v63  ;;  %v841_v4 = vadd.f32 %v840_v1, %v822_v60 }
 0x2b5   : > { %v850_v5 = vmax.f32 %v803_v3, 0.0  ;;  %v851_v7 = vmax.f32 %v841_v4, 0.0 }
 0x2b7   : > { %v3534_v9 = vadd.f32 %v850_v5, %v3362_v25  ;;  %v3537_v10 = vadd.f32 %v851_v7, %v3364_v27 }
 0x2b8   : > { %v785_v11 = vpop.f32.mrf.mxu2  ;;  %v804_v12 = vpop.f32.mrf.mxu3 }
 0x2b9   : > { %v866_v15 = vpack.c.bf16 %v3537_v10, %v3534_v9  ;;  %v786_v17 = vadd.f32 %v785_v11, %v636_v8  ;;  %v826_v23 = vpop.f32.mrf.mxu0 }
 0x2ba   : > { %v842_v20 = vpop.f32.mrf.mxu1  ;;  %v827_v30 = vadd.f32 %v826_v23, %v641_v24 }
 0x2bb   : > { %870 = vst [vmem:[#allocation3 + $0x4] sm:$0xff] %v866_v15  ;;  %v805_v21 = vadd.f32 %v804_v12, %v786_v17  ;;  %v843_v22 = vadd.f32 %v842_v20, %v824_v14  ;;  %v877_v56 = vunpack.c.l.bf16 (%p3341_p8), %v866_v15  ;;  %v878_v57 = vunpack.c.h.bf16 (%p3341_p8), %v866_v15 }
 0x2bd   : > { %v852_v28 = vmax.f32 %v805_v21, 0.0  ;;  %v853_v29 = vmax.f32 %v843_v22, 0.0 }
 0x2bf   : > { %v3542_v25 = vadd.f32 %v852_v28, %v3368_v31  ;;  %v3545_v27 = vadd.f32 %v853_v29, %v3370_v33 }
 0x2c0   : > { %v788_v32 = vpop.f32.mrf.mxu2  ;;  %v807_v34 = vpop.f32.mrf.mxu3 }
 0x2c1   : > { %v867_v35 = vpack.c.bf16 %v3545_v27, %v3542_v25  ;;  %v789_v36 = vadd.f32 %v788_v32, %v641_v24  ;;  %v828_v46 = vpop.f32.mrf.mxu0 }
 0x2c2   : > { %v845_v38 = vpop.f32.mrf.mxu1  ;;  %v829_v6 = vadd.f32 %v828_v46, %v646_v44 }
 0x2c3   : > { %871 = vst [vmem:[#allocation3 + $0x14] sm:$0xff] %v867_v35  ;;  %v808_v40 = vadd.f32 %v807_v34, %v789_v36  ;;  %v846_v41 = vadd.f32 %v845_v38, %v827_v30  ;;  %v879_v58 = vunpack.c.l.bf16 (%p3341_p8), %v867_v35  ;;  %v880_v59 = vunpack.c.h.bf16 (%p3341_p8), %v867_v35 }
 0x2c5   : > { %v854_v42 = vmax.f32 %v808_v40, 0.0  ;;  %v855_v19 = vmax.f32 %v846_v41, 0.0  ;;  %v889_v63 = vmul.f32 (%p3341_p8), %v3348_v13, %v879_v58  ;;  %v890_v0 = vmul.f32 (%p3341_p8), %v3352_v16, %v880_v59 }
 0x2c7   : > { %v3550_v31 = vadd.f32 %v854_v42, %v3374_v37  ;;  %v3553_v33 = vadd.f32 %v855_v19, %v3376_v39  ;;  %v896_v8 = vpack.c.bf16 (%p3341_p8), %v890_v0, %v889_v63 }
 0x2c8   : > { %v790_v18 = vpop.f32.mrf.mxu2  ;;  %v809_v49 = vpop.f32.mrf.mxu3 }
 0x2c9   : > { %v868_v47 = vpack.c.bf16 %v3553_v33, %v3550_v31  ;;  %v791_v48 = vadd.f32 %v790_v18, %v646_v44  ;;  %900 = vst [vmem:[#allocation3 + $0x14] sm:$0xff] (%p3341_p8), %v896_v8 }
 0x2ca   : > { %v847_v50 = vpop.f32.mrf.mxu1 }
 0x2cb   : > { %872 = vst [vmem:[#allocation3 + $0x24] sm:$0xff] %v868_v47  ;;  %v810_v51 = vadd.f32 %v809_v49, %v791_v48  ;;  %v848_v52 = vadd.f32 %v847_v50, %v829_v6  ;;  %v881_v26 = vunpack.c.l.bf16 (%p3341_p8), %v868_v47  ;;  %v882_v60 = vunpack.c.h.bf16 (%p3341_p8), %v868_v47 }
 0x2cd   : > { %v856_v53 = vmax.f32 %v810_v51, 0.0  ;;  %v857_v54 = vmax.f32 %v848_v52, 0.0  ;;  %v891_v1 = vmul.f32 (%p3341_p8), %v3348_v13, %v881_v26  ;;  %v892_v3 = vmul.f32 (%p3341_p8), %v3352_v16, %v882_v60 }
 0x2cf   : > { %v3558_v55 = vadd.f32 %v856_v53, %v3380_v43  ;;  %v3561_v37 = vadd.f32 %v857_v54, %v3382_v45  ;;  %876 = sbr.rel (!%p3341_p8) target bundleno = 730 (0x2da), region = 60  ;;  %v887_v43 = vmul.f32 (%p3341_p8), %v3348_v13, %v877_v56  ;;  %v888_v45 = vmul.f32 (%p3341_p8), %v3352_v16, %v878_v57 }
 0x2d0   : > { %v897_v11 = vpack.c.bf16 (%p3341_p8), %v892_v3, %v891_v1 }
 0x2d1   : > { %v869_v39 = vpack.c.bf16 %v3561_v37, %v3558_v55  ;;  %v895_v7 = vpack.c.bf16 (%p3341_p8), %v888_v45, %v887_v43 }
 0x2d2   : > { %901 = vst [vmem:[#allocation3 + $0x24] sm:$0xff] (%p3341_p8), %v897_v11 }
 0x2d3   : > { %873 = vst [vmem:[#allocation3 + $0x34] sm:$0xff] %v869_v39  ;;  %v883_v61 = vunpack.c.l.bf16 (%p3341_p8), %v869_v39  ;;  %v884_v62 = vunpack.c.h.bf16 (%p3341_p8), %v869_v39 }
 0x2d4   : > { %899 = vst [vmem:[#allocation3 + $0x4] sm:$0xff] %v895_v7 }
 0x2d5   : > { %v893_v4 = vmul.f32 %v3348_v13, %v883_v61  ;;  %v894_v5 = vmul.f32 %v3352_v16, %v884_v62 }
 0x2d7   : > { %v898_v12 = vpack.c.bf16 %v894_v5, %v893_v4 }
 0x2d9   : > { %902 = vst [vmem:[#allocation3 + $0x34] sm:$0xff] %v898_v12 }
 0x2da PF: > { %2965 = vset.pattern.permute.xlu1 %v3131_v2  ;;  %2967 = vset.pattern.permute.xlu0 %v3131_v2  ;;  %v2484_v20 = vld [vmem:[#allocation3 + $0x20] sm:$0xf]  ;;  %v2802_v21 = vld [vmem:[#allocation3 + $0x2c] sm:$0xf0]  ;;  %s3141_s26 = smov 126   ;;  %s3142_s15 = smov 124  }
 0x2db   : > { %2966 = vset.pattern.permute.xlu2 %v3131_v2  ;;  %v3580_v22 = vor.u32 %v2802_v21, %v2484_v20  ;;  %v2472_v24 = vld [vmem:[#allocation3] sm:$0xf]  ;;  %v2799_v28 = vld [vmem:[#allocation3 + $0xc] sm:$0xf0]  ;;  %v2474_v32 = vld [vmem:[#allocation3 + $0x10] sm:$0xf0] }
 0x2dc   : > { %v3588_v35 = vor.u32 %v2799_v28, %v2472_v24  ;;  %v2800_v40 = vld [vmem:[#allocation3 + $0x14] sm:$0xf0]  ;;  %v2809_v48 = vld [vmem:[#allocation3 + $0x10] sm:$0xf0]  ;;  %v2532_v49 = vld [vmem:[#allocation3 + $0x2c] sm:$0xf] }
 0x2dd   : > { %1024 = vrot.lane.b32.xlu0 %v3580_v22, %s3141_s26  ;;  %v2813_v50 = vld [vmem:[#allocation3 + $0x38] sm:$0xf0]  ;;  %v2514_v53 = vld [vmem:[#allocation3 + $0x14] sm:$0xf0]  ;;  %v2520_v58 = vld [vmem:[#allocation3 + $0xc] sm:$0xf] }
 0x2de   : > { %v2533_v54 = vor.u32 %v2813_v50, %v2532_v49  ;;  %v2810_v59 = vld [vmem:[#allocation3 + $0x18] sm:$0xf0]  ;;  %v2805_v63 = vld [vmem:[#allocation3 + $0x10] sm:$0xf0]  ;;  %v2498_v3 = vld [vmem:[#allocation3 + $0x14] sm:$0xf0] }
 0x2df   : > { %v2492_v14 = vld [vmem:[#allocation3 + $0x28] sm:$0xf]  ;;  %v2801_v23 = vld [vmem:[#allocation3 + $0x24] sm:$0xf]  ;;  %v2521_v62 = vor.u32 %v2810_v59, %v2520_v58  ;;  %s3143_s30 = smov 122   ;;  %vm1030_vm13 = vcmask 1031168  }
 0x2e0   : > { %v2803_v15 = vld [vmem:[#allocation3 + $0x34] sm:$0xf0]  ;;  %v2486_v29 = vld [vmem:[#allocation3 + $0x30] sm:$0xf0]  ;;  %v2811_v41 = vld [vmem:[#allocation3 + $0x28] sm:$0xf] }
 0x2e1   : > { %v3577_v17 = vor.u32 %v2803_v15, %v2492_v14  ;;  %v2798_v30 = vld [vmem:[#allocation3 + $0x4] sm:$0xf]  ;;  %v2489_v36 = vor.u32 %v2801_v23, %v2486_v29  ;;  %v2480_v38 = vld [vmem:[#allocation3 + $0x8] sm:$0xf]  ;;  %v2526_v42 = vld [vmem:[#allocation3 + $0x34] sm:$0xf0] }
 0x2e2   : > { %v3586_v34 = vor.u32 %v2798_v30, %v2474_v32  ;;  %v3595_v19 = vor.u32 %v2800_v40, %v2480_v38  ;;  %v2524_v44 = vld [vmem:[#allocation3 + $0x24] sm:$0xf]  ;;  %v2812_v46 = vld [vmem:[#allocation3 + $0x30] sm:$0xf0]  ;;  %v2529_v18 = vor.u32 %v2811_v41, %v2526_v42  ;;  %v2808_v52 = vld [vmem:[#allocation3 + $0x8] sm:$0xf] }
 0x2e3   : > { %1028 = vrot.lane.b32.xlu1 %v3577_v17, %s3141_s26  ;;  %v2525_v6 = vor.u32 %v2812_v46, %v2524_v44  ;;  %v2512_v47 = vld [vmem:[#allocation3 + $0x4] sm:$0xf]  ;;  %v2517_v39 = vor.u32 %v2808_v52, %v2514_v53  ;;  %v2807_v57 = vld [vmem:[#allocation3 + $0x30] sm:$0xf0]  ;;  %v2806_v60 = vld [vmem:[#allocation3 + $0x28] sm:$0xf] }
 0x2e4   : > { %1020 = vrot.lane.b32.xlu2 %v3586_v34, %s3141_s26  ;;  %v2513_v51 = vor.u32 %v2809_v48, %v2512_v47  ;;  %v2504_v56 = vld [vmem:[#allocation3 + $0x24] sm:$0xf]  ;;  %v2506_v61 = vld [vmem:[#allocation3 + $0x34] sm:$0xf0]  ;;  %v2804_v1 = vld [vmem:[#allocation3 + $0x8] sm:$0xf] }
 0x2e5   : > { %1026 = vrot.lane.b32.xlu0 %v2489_v36, %s3141_s26  ;;  %v2505_v26 = vor.u32 %v2807_v57, %v2504_v56  ;;  %v2509_v43 = vor.u32 %v2806_v60, %v2506_v61  ;;  %v2496_v45 = vld [vmem:[#allocation3 + $0x4] sm:$0xf]  ;;  %v2501_v4 = vor.u32 %v2804_v1, %v2498_v3  ;;  %vm973_vm14 = vcmask 1014784  }
 0x2e6   : > { %v2497_v0 = vor.u32 %v2805_v63, %v2496_v45  ;;  %vm1047_vm15 = vcmask 998400   ;;  %vm1160_vm0 = vcmask 31744  }
 0x2eb   : > { %1018 = vrot.lane.b32.xlu1 %v3588_v35, %s3141_s26 }
 0x2ec   : > { %1022 = vrot.lane.b32.xlu2 %v3595_v19, %s3141_s26 }
 0x2ed   : > { %1008 = vrot.lane.b32.xlu0 %v2525_v6, %s3139_s16 }
 0x2f3   : > { %1010 = vrot.lane.b32.xlu1 %v2529_v18, %s3139_s16 }
 0x2f4   : > { %1002 = vrot.lane.b32.xlu2 %v2513_v51, %s3139_s16 }
 0x2f5   : > { %1004 = vrot.lane.b32.xlu0 %v2517_v39, %s3139_s16 }
 0x2fb   : > { %1012 = vrot.lane.b32.xlu1 %v2533_v54, %s3139_s16 }
 0x2fc   : > { %969 = vrot.lane.b32.xlu2 %v2505_v26, %s3142_s15 }
 0x2fd   : > { %971 = vrot.lane.b32.xlu0 %v2509_v43, %s3142_s15 }
 0x303   : > { %1006 = vrot.lane.b32.xlu1 %v2521_v62, %s3139_s16  ;;  %s3144_s16 = smov 4  }
 0x304   : > { %965 = vrot.lane.b32.xlu2 %v2497_v0, %s3142_s15 }
 0x305   : > { %967 = vrot.lane.b32.xlu0 %v2501_v4, %s3142_s15 }
 0x30b   : > { %1041 = vrot.lane.b32.xlu1 %v2525_v6, %s3143_s30 }
 0x30c   : > { %1043 = vrot.lane.b32.xlu2 %v2529_v18, %s3143_s30 }
 0x30d   : > { %1035 = vrot.lane.b32.xlu0 %v2513_v51, %s3143_s30 }
 0x313   : > { %1037 = vrot.lane.b32.xlu1 %v2517_v39, %s3143_s30 }
 0x314   : > { %1045 = vrot.lane.b32.xlu2 %v2533_v54, %s3143_s30 }
 0x315   : > { %1039 = vrot.lane.b32.xlu0 %v2521_v62, %s3143_s30 }
 0x31b   : > { %1108 = vrot.lane.b32.xlu1 %v2489_v36, %s3144_s16 }
 0x31d   : > { %1106 = vrot.lane.b32.xlu0 %v3580_v22, %s3144_s16 }
 0x33e   : > { %v1021_v5 = vpop.permute.xlu2 %1020 }
 0x346   : > { %v1023_v11 = vpop.permute.xlu2 %1022 }
 0x347   : > { %v1032_v21 = vsel %vm1030_vm13, %v1021_v5, %v1023_v11 }
 0x34e   : > { %v1003_v22 = vpop.permute.xlu2 %1002 }
 0x34f   : > { %v1025_v8 = vpop.permute.xlu0 %1024 }
 0x355   : > { %v1029_v7 = vpop.permute.xlu1 %1028 }
 0x356   : > { %1146 = vrot.lane.b32.xlu2 %v1029_v7, %s3144_s16  ;;  %v970_v29 = vpop.permute.xlu2 %969 }
 0x357   : > { %v1027_v12 = vpop.permute.xlu0 %1026 }
 0x358   : > { %v1033_v14 = vsel %vm1030_vm13, %v1025_v8, %v1027_v12  ;;  %v1034_v44 = vsel %vm1030_vm13, %v1027_v12, %v1029_v7 }
 0x359   : > { %1142 = vrot.lane.b32.xlu1 %v1033_v14, %s3144_s16 }
 0x35d   : > { %v1019_v15 = vpop.permute.xlu1 %1018 }
 0x35e   : > { %1140 = vrot.lane.b32.xlu2 %v1023_v11, %s3144_s16  ;;  %v966_v38 = vpop.permute.xlu2 %965  ;;  %v1031_v46 = vsel %vm1030_vm13, %v1019_v15, %v1021_v5 }
 0x35f   : > { %v1009_v20 = vpop.permute.xlu0 %1008 }
 0x360   : > { %1130 = vrot.lane.b32.xlu0 %v1009_v20, %s3144_s16 }
 0x361   : > { %1138 = vrot.lane.b32.xlu1 %v1032_v21, %s3144_s16 }
 0x365   : > { %v1011_v23 = vpop.permute.xlu1 %1010 }
 0x366   : > { %v1016_v28 = vsel %vm540_vm9, %v1009_v20, %v1011_v23  ;;  %v1044_v47 = vpop.permute.xlu2 %1043 }
 0x367   : > { %v1005_v24 = vpop.permute.xlu0 %1004 }
 0x368   : > { %1124 = vrot.lane.b32.xlu0 %v1003_v22, %s3144_s16  ;;  %v1014_v32 = vsel %vm540_vm9, %v1003_v22, %v1005_v24 }
 0x369   : > { %1132 = vrot.lane.b32.xlu1 %v1016_v28, %s3144_s16 }
 0x36d   : > { %v1013_v36 = vpop.permute.xlu1 %1012 }
 0x36e   : > { %v1017_v49 = vsel %vm540_vm9, %v1011_v23, %v1013_v36  ;;  %v1046_v52 = vpop.permute.xlu2 %1045 }
 0x36f   : > { %v972_v30 = vpop.permute.xlu0 %971  ;;  %v1051_v54 = vsel %vm1047_vm15, %v1044_v47, %v1046_v52  ;;  %v2539_v52 = vld [vmem:[%s4167_s4 + $0x28] sm:$0xff] }
 0x370   : > { %1122 = vrot.lane.b32.xlu2 %v972_v30, %s3144_s16  ;;  %1118 = vrot.lane.b32.xlu0 %v970_v29, %s3144_s16  ;;  %v975_v41 = vsel %vm973_vm14, %v970_v29, %v972_v30 }
 0x371   : > { %1126 = vrot.lane.b32.xlu1 %v1014_v32, %s3144_s16 }
 0x375   : > { %v1007_v42 = vpop.permute.xlu1 %1006 }
 0x377   : > { %v968_v40 = vpop.permute.xlu0 %967 }
 0x378   : > { %1116 = vrot.lane.b32.xlu2 %v968_v40, %s3144_s16  ;;  %1112 = vrot.lane.b32.xlu0 %v966_v38, %s3144_s16  ;;  %v974_v18 = vsel %vm973_vm14, %v966_v38, %v968_v40 }
 0x379   : > { %1120 = vrot.lane.b32.xlu1 %v975_v41, %s3144_s16  ;;  %v2538_v41 = vld [vmem:[%s4167_s4 + $0x20] sm:$0xff] }
 0x37d   : > { %v1042_v6 = vpop.permute.xlu1 %1041 }
 0x37e   : > { %v1050_v48 = vsel %vm1047_vm15, %v1042_v6, %v1044_v47  ;;  %v2544_v47 = vld [vmem:[%s4166_s3 + $0x20] sm:$0xf] }
 0x37f   : > { %v1036_v50 = vpop.permute.xlu0 %1035 }
 0x380   : > { %1144 = vrot.lane.b32.xlu2 %v1034_v44, %s3144_s16  ;;  %1136 = vrot.lane.b32.xlu0 %v1031_v46, %s3144_s16 }
 0x381   : > { %1114 = vrot.lane.b32.xlu1 %v974_v18, %s3144_s16 }
 0x385   : > { %v1038_v51 = vpop.permute.xlu1 %1037 }
 0x386   : > { %v1048_v53 = vsel %vm1047_vm15, %v1036_v50, %v1038_v51 }
 0x387   : > { %v1040_v39 = vpop.permute.xlu0 %1039 }
 0x388   : > { %1100 = vrot.lane.b32.xlu2 %v3588_v35, %s3144_s16  ;;  %1154 = vrot.lane.b32.xlu0 %v1042_v6, %s3144_s16  ;;  %v1015_v35 = vsel %vm540_vm9, %v1005_v24, %v1007_v42 }
 0x389   : > { %1156 = vrot.lane.b32.xlu1 %v1050_v48, %s3144_s16  ;;  %v2815_v48 = vld [vmem:[%s4166_s3 + $0x24] sm:$0xf0] }
 0x38d   : > { %v1109_v56 = vpop.permute.xlu1 %1108 }
 0x38f   : > { %v1107_v58 = vpop.permute.xlu0 %1106 }
 0x390   : > { %1134 = vrot.lane.b32.xlu2 %v1017_v49, %s3144_s16  ;;  %1102 = vrot.lane.b32.xlu0 %v3586_v34, %s3144_s16  ;;  %v1049_v34 = vsel %vm1047_vm15, %v1038_v51, %v1040_v39  ;;  %v1163_v49 = vsel %vm1160_vm0, %v1107_v58, %v1109_v56  ;;  %v2541_v51 = vld [vmem:[%s4167_s4 + $0x38] sm:$0xff]  ;;  %v2545_v39 = vor.u32 %v2815_v48, %v2544_v47 }
 0x391   : > { %1110 = vrot.lane.b32.xlu1 %v3577_v17, %s3144_s16 }
 0x398   : > { %1128 = vrot.lane.b32.xlu2 %v1015_v35, %s3144_s16  ;;  %1150 = vrot.lane.b32.xlu0 %v1048_v53, %s3144_s16  ;;  %v2814_v35 = vld [vmem:[%s4166_s3 + $0x24] sm:$0xf] }
 0x399   : > { %1158 = vrot.lane.b32.xlu1 %v1051_v54, %s3144_s16  ;;  %v2546_v54 = vld [vmem:[%s4166_s3 + $0x28] sm:$0xf0] }
 0x39a   : > { %v2549_v58 = vor.u32 %v2814_v35, %v2546_v54 }
 0x3a0   : > { %1148 = vrot.lane.b32.xlu2 %v1036_v50, %s3144_s16  ;;  %1152 = vrot.lane.b32.xlu0 %v1049_v34, %s3144_s16  ;;  %v2540_v50 = vld [vmem:[%s4167_s4 + $0x30] sm:$0xff] }
 0x3a1   : > { %1064 = vperm.xlu1 %2965, %v2538_v41  }
 0x3a8   : > { %1104 = vrot.lane.b32.xlu2 %v3595_v19, %s3144_s16  ;;  %1074 = vperm.xlu0 %2967, %v2540_v50  }
 0x3a9   : > { %1079 = vperm.xlu1 %2965, %v2541_v51  }
 0x3b0   : > { %v1147_v17 = vpop.permute.xlu2 %1146  ;;  %1069 = vperm.xlu2 %2966, %v2539_v52  }
 0x3b8   : > { %v1141_v57 = vpop.permute.xlu2 %1140 }
 0x3ca   : > { %v1123_v59 = vpop.permute.xlu2 %1122 }
 0x3cb   : > { %v1143_v26 = vpop.permute.xlu1 %1142 }
 0x3d2   : > { %v1131_v60 = vpop.permute.xlu0 %1130  ;;  %v1117_v61 = vpop.permute.xlu2 %1116 }
 0x3d3   : > { %v1139_v62 = vpop.permute.xlu1 %1138 }
 0x3d4   : > { %v1174_v19 = vsel %vm1160_vm0, %v1139_v62, %v1141_v57 }
 0x3da   : > { %v1125_v43 = vpop.permute.xlu0 %1124  ;;  %v1145_v45 = vpop.permute.xlu2 %1144 }
 0x3db   : > { %v1133_v63 = vpop.permute.xlu1 %1132  ;;  %v1175_v0 = vsel %vm1160_vm0, %v1143_v26, %v1145_v45  ;;  %v1176_v1 = vsel %vm1160_vm0, %v1145_v45, %v1147_v17  ;;  %v2554_v45 = vld [vmem:[%s4166_s3 + $0x38] sm:$0xf0] }
 0x3dc   : > { %1207 = vmatpush.bf16.msrb.mxu3 %v1175_v0  ;;  %1245 = vmatpush.bf16.msra.mxu0 %v1176_v1  ;;  %v1171_v23 = vsel %vm1160_vm0, %v1131_v60, %v1133_v63 }
 0x3e0   : > { %1246 = vmatpush.bf16.msra.mxu0 %v1174_v19 }
 0x3e2   : > { %v1119_v3 = vpop.permute.xlu0 %1118  ;;  %v1101_v4 = vpop.permute.xlu2 %1100 }
 0x3e3   : > { %v1127_v5 = vpop.permute.xlu1 %1126 }
 0x3e4   : > { %v1169_v32 = vsel %vm1160_vm0, %v1125_v43, %v1127_v5  ;;  %v2816_v43 = vld [vmem:[%s4166_s3 + $0x34] sm:$0xf] }
 0x3e5   : > { %v2557_v0 = vor.u32 %v2816_v43, %v2554_v45 }
 0x3ea   : > { %v1113_v7 = vpop.permute.xlu0 %1112  ;;  %v1135_v8 = vpop.permute.xlu2 %1134 }
 0x3eb   : > { %v1121_v11 = vpop.permute.xlu1 %1120  ;;  %v1172_v12 = vsel %vm1160_vm0, %v1133_v63, %v1135_v8 }
 0x3ec   : > { %1247 = vmatpush.bf16.msra.mxu0 %v1172_v12  ;;  %v1168_v24 = vsel %vm1160_vm0, %v1121_v11, %v1123_v59  ;;  %v1167_v40 = vsel %vm1160_vm0, %v1119_v3, %v1121_v11 }
 0x3f2   : > { %v1137_v14 = vpop.permute.xlu0 %1136  ;;  %v1129_v15 = vpop.permute.xlu2 %1128 }
 0x3f3   : > { %v1115_v20 = vpop.permute.xlu1 %1114  ;;  %v1173_v21 = vsel %vm1160_vm0, %v1137_v14, %v1139_v62  ;;  %v1170_v22 = vsel %vm1160_vm0, %v1127_v5, %v1129_v15  ;;  %v2817_v62 = vld [vmem:[%s4166_s3 + $0x34] sm:$0xf0] }
 0x3f4   : > { %1208 = vmatpush.bf16.msrb.mxu3 %v1173_v21  ;;  %1248 = vmatpush.bf16.msra.mxu0 %v1170_v22  ;;  %v1166_v36 = vsel %vm1160_vm0, %v1115_v20, %v1117_v61  ;;  %v1165_v46 = vsel %vm1160_vm0, %v1113_v7, %v1115_v20  ;;  %v2552_v61 = vld [vmem:[%s4166_s3 + $0x30] sm:$0xf] }
 0x3f5   : > { %v2553_v63 = vor.u32 %v2817_v62, %v2552_v61 }
 0x3f8   : > { %1209 = vmatpush.bf16.msrb.mxu3 %v1171_v23  ;;  %1249 = vmatpush.bf16.msra.mxu0 %v1168_v24 }
 0x3fa   : > { %v1155_v28 = vpop.permute.xlu0 %1154  ;;  %v1149_v29 = vpop.permute.xlu2 %1148 }
 0x3fb   : > { %v1157_v30 = vpop.permute.xlu1 %1156 }
 0x3fc   : > { %1210 = vmatpush.bf16.msrb.mxu3 %v1169_v32  ;;  %1250 = vmatpush.bf16.msra.mxu0 %v1166_v36  ;;  %v1179_v38 = vsel %vm1160_vm0, %v1155_v28, %v1157_v30 }
 0x3fd   : > { %1232 = vmatpush.bf16.msrb.mxu2 %v1179_v38 }
 0x400   : > { %1211 = vmatpush.bf16.msrb.mxu3 %v1167_v40 }
 0x402   : > { %v1103_v42 = vpop.permute.xlu0 %1102  ;;  %v1105_v6 = vpop.permute.xlu2 %1104 }
 0x403   : > { %v1111_v44 = vpop.permute.xlu1 %1110  ;;  %v1162_v53 = vsel %vm1160_vm0, %v1103_v42, %v1105_v6 }
 0x404   : > { %1212 = vmatpush.bf16.msrb.mxu3 %v1165_v46  ;;  %v1164_v18 = vsel %vm1160_vm0, %v1109_v56, %v1111_v44  ;;  %v1161_v56 = vsel %vm1160_vm0, %v1101_v4, %v1103_v42 }
 0x405   : > { %1251 = vmatpush.bf16.msra.mxu0 %v1164_v18 }
 0x408   : > { %1213 = vmatpush.bf16.msrb.mxu3 %v1163_v49 }
 0x409   : > { %1252 = vmatpush.bf16.msra.mxu0 %v1162_v53 }
 0x40a   : > { %v1151_v34 = vpop.permute.xlu0 %1150  ;;  %v1070_v21 = vpop.permute.xlu2 %1069 }
 0x40b   : > { %v1159_v17 = vpop.permute.xlu1 %1158  ;;  %v1177_v57 = vsel %vm1160_vm0, %v1149_v29, %v1151_v34 }
 0x40c   : > { %1214 = vmatpush.bf16.msrb.mxu3 %v1161_v56  ;;  %1233 = vmatpush.bf16.msrb.mxu2 %v1177_v57  ;;  %v1180_v59 = vsel %vm1160_vm0, %v1157_v30, %v1159_v17 }
 0x40d   : > { %1253 = vmatmul.bf16.vlgmr.msra.gmra.mxu0 %v2545_v39  ;;  %1270 = vmatpush.bf16.msra.mxu1 %v1180_v59 }
 0x40f   : > { %1215 = vmatmul.bf16.vlgmr.msrb.gmra.mxu3 %v2545_v39  ;;  %2558 = vmatmul.msk.bf16.vlgmr.msrb.gmra.mxu2 %vm767_vm12, %v2549_v58 }
 0x412   : > { %v1153_v26 = vpop.permute.xlu0 %1152 }
 0x413   : > { %v1178_v60 = vsel %vm1160_vm0, %v1151_v34, %v1153_v26  ;;  %v1065_v19 = vpop.permute.xlu1 %1064 }
 0x414   : > { %1271 = vmatpush.bf16.msra.mxu1 %v1178_v60 }
 0x417   : > { %2560 = vmatmul.msk.bf16.vlgmr.msra.gmra.mxu1 %vm767_vm12, %v2549_v58 }
 0x41a   : > { %v1075_v42 = vpop.permute.xlu0 %1074 }
 0x41b   : > { %v1080_v54 = vpop.permute.xlu1 %1079 }
 0x41d   : > { %1258 = vmatmul.bf16.gmra.mxu0 %v2553_v63 }
 0x41f   : > { %1220 = vmatmul.bf16.gmra.mxu3 %v2553_v63  ;;  %2559 = vmatmul.msk.bf16.gmra.mxu2 %vm767_vm12, %v2557_v0 }
 0x427   : > { %2561 = vmatmul.msk.bf16.gmra.mxu1 %vm767_vm12, %v2557_v0 }
 0x48a   : > { %v1254_v1 = vpop.f32.mrf.mxu0 }
 0x48b   : > { %v1255_v3 = vadd.f32 %v1254_v1, %v1065_v19 }
 0x492   : > { %v1216_v4 = vpop.f32.mrf.mxu3  ;;  %v1235_v5 = vpop.f32.mrf.mxu2 }
 0x493   : > { %v1217_v7 = vadd.f32 %v1216_v4, %v1065_v19  ;;  %v1256_v8 = vpop.f32.mrf.mxu0 }
 0x494   : > { %v1273_v11 = vpop.f32.mrf.mxu1  ;;  %v1257_v29 = vadd.f32 %v1256_v8, %v1070_v21 }
 0x495   : > { %v1236_v12 = vadd.f32 %v1235_v5, %v1217_v7  ;;  %v1274_v14 = vadd.f32 %v1273_v11, %v1255_v3 }
 0x497   : > { %v1283_v15 = vmax.f32 %v1236_v12, 0.0  ;;  %v1284_v20 = vmax.f32 %v1274_v14, 0.0 }
 0x499   : > { %v3725_v22 = vadd.f32 %v1283_v15, %v3534_v9  ;;  %v3728_v23 = vadd.f32 %v1284_v20, %v3537_v10 }
 0x49a   : > { %v1218_v24 = vpop.f32.mrf.mxu3  ;;  %v1237_v28 = vpop.f32.mrf.mxu2 }
 0x49b   : > { %v1299_v30 = vpack.c.bf16 %v3728_v23, %v3725_v22  ;;  %v1219_v32 = vadd.f32 %v1218_v24, %v1070_v21  ;;  %v1259_v41 = vpop.f32.mrf.mxu0 }
 0x49c   : > { %v1275_v36 = vpop.f32.mrf.mxu1  ;;  %v1260_v18 = vadd.f32 %v1259_v41, %v1075_v42 }
 0x49d   : > { %1303 = vst [vmem:[#allocation3 + $0x4] sm:$0xff] %v1299_v30  ;;  %v1238_v38 = vadd.f32 %v1237_v28, %v1219_v32  ;;  %v1276_v40 = vadd.f32 %v1275_v36, %v1257_v29  ;;  %v1310_v45 = vunpack.c.l.bf16 (%p3341_p8), %v1299_v30  ;;  %v1311_v63 = vunpack.c.h.bf16 (%p3341_p8), %v1299_v30 }
 0x49f   : > { %v1285_v44 = vmax.f32 %v1238_v38, 0.0  ;;  %v1286_v46 = vmax.f32 %v1276_v40, 0.0 }
 0x4a1   : > { %v3733_v9 = vadd.f32 %v1285_v44, %v3542_v25  ;;  %v3736_v10 = vadd.f32 %v1286_v46, %v3545_v27 }
 0x4a2   : > { %v1221_v6 = vpop.f32.mrf.mxu3  ;;  %v1240_v47 = vpop.f32.mrf.mxu2 }
 0x4a3   : > { %v1300_v48 = vpack.c.bf16 %v3736_v10, %v3733_v9  ;;  %v1222_v49 = vadd.f32 %v1221_v6, %v1075_v42  ;;  %v1261_v39 = vpop.f32.mrf.mxu0 }
 0x4a4   : > { %v1278_v50 = vpop.f32.mrf.mxu1  ;;  %v1262_v17 = vadd.f32 %v1261_v39, %v1080_v54 }
 0x4a5   : > { %1304 = vst [vmem:[#allocation3 + $0x14] sm:$0xff] %v1300_v48  ;;  %v1241_v51 = vadd.f32 %v1240_v47, %v1222_v49  ;;  %v1279_v52 = vadd.f32 %v1278_v50, %v1260_v18  ;;  %v1312_v0 = vunpack.c.l.bf16 (%p3341_p8), %v1300_v48  ;;  %v1313_v1 = vunpack.c.h.bf16 (%p3341_p8), %v1300_v48 }
 0x4a7   : > { %v1287_v53 = vmax.f32 %v1241_v51, 0.0  ;;  %v1288_v35 = vmax.f32 %v1279_v52, 0.0  ;;  %v1322_v7 = vmul.f32 (%p3341_p8), %v3348_v13, %v1312_v0  ;;  %v1323_v8 = vmul.f32 (%p3341_p8), %v3352_v16, %v1313_v1 }
 0x4a9   : > { %v3741_v25 = vadd.f32 %v1287_v53, %v3550_v31  ;;  %v3744_v27 = vadd.f32 %v1288_v35, %v3553_v33  ;;  %v1329_v21 = vpack.c.bf16 (%p3341_p8), %v1323_v8, %v1322_v7 }
 0x4aa   : > { %v1223_v34 = vpop.f32.mrf.mxu3  ;;  %v1242_v58 = vpop.f32.mrf.mxu2 }
 0x4ab   : > { %v1301_v56 = vpack.c.bf16 %v3744_v27, %v3741_v25  ;;  %v1224_v57 = vadd.f32 %v1223_v34, %v1080_v54  ;;  %1333 = vst [vmem:[#allocation3 + $0x14] sm:$0xff] (%p3341_p8), %v1329_v21 }
 0x4ac   : > { %v1280_v59 = vpop.f32.mrf.mxu1 }
 0x4ad   : > { %1305 = vst [vmem:[#allocation3 + $0x24] sm:$0xff] %v1301_v56  ;;  %v1243_v26 = vadd.f32 %v1242_v58, %v1224_v57  ;;  %v1281_v60 = vadd.f32 %v1280_v59, %v1262_v17  ;;  %v1314_v19 = vunpack.c.l.bf16 (%p3341_p8), %v1301_v56  ;;  %v1315_v3 = vunpack.c.h.bf16 (%p3341_p8), %v1301_v56 }
 0x4af   : > { %v1289_v61 = vmax.f32 %v1243_v26, 0.0  ;;  %v1290_v62 = vmax.f32 %v1281_v60, 0.0  ;;  %v1324_v11 = vmul.f32 (%p3341_p8), %v3348_v13, %v1314_v19  ;;  %v1325_v12 = vmul.f32 (%p3341_p8), %v3352_v16, %v1315_v3 }
 0x4b1   : > { %v3749_v43 = vadd.f32 %v1289_v61, %v3558_v55  ;;  %v3752_v31 = vadd.f32 %v1290_v62, %v3561_v37  ;;  %1309 = sbr.rel (!%p3341_p8) target bundleno = 1212 (0x4bc), region = 64  ;;  %v1320_v55 = vmul.f32 (%p3341_p8), %v3348_v13, %v1310_v45  ;;  %v1321_v37 = vmul.f32 (%p3341_p8), %v3352_v16, %v1311_v63 }
 0x4b2   : > { %v1330_v24 = vpack.c.bf16 (%p3341_p8), %v1325_v12, %v1324_v11 }
 0x4b3   : > { %v1302_v33 = vpack.c.bf16 %v3752_v31, %v3749_v43  ;;  %v1328_v20 = vpack.c.bf16 (%p3341_p8), %v1321_v37, %v1320_v55 }
 0x4b4   : > { %1334 = vst [vmem:[#allocation3 + $0x24] sm:$0xff] (%p3341_p8), %v1330_v24 }
 0x4b5   : > { %1306 = vst [vmem:[#allocation3 + $0x34] sm:$0xff] %v1302_v33  ;;  %v1316_v4 = vunpack.c.l.bf16 (%p3341_p8), %v1302_v33  ;;  %v1317_v5 = vunpack.c.h.bf16 (%p3341_p8), %v1302_v33 }
 0x4b6   : > { %1332 = vst [vmem:[#allocation3 + $0x4] sm:$0xff] %v1328_v20 }
 0x4b7   : > { %v1326_v14 = vmul.f32 %v3348_v13, %v1316_v4  ;;  %v1327_v15 = vmul.f32 %v3352_v16, %v1317_v5 }
 0x4b9   : > { %v1331_v28 = vpack.c.bf16 %v1327_v15, %v1326_v14 }
 0x4bb   : > { %1335 = vst [vmem:[#allocation3 + $0x34] sm:$0xff] %v1331_v28 }
 0x4bc PF: > { %v2576_v29 = vld [vmem:[#allocation3 + $0x20] sm:$0xf]  ;;  %v2822_v30 = vld [vmem:[#allocation3 + $0x2c] sm:$0xf0]  ;;  %2968 = vset.pattern.permute.xlu1 %v3131_v2  ;;  %2970 = vset.pattern.permute.xlu0 %v3131_v2  ;;  %s3145_s22 = smov 2   ;;  %vm1462_vm1 = vcmask 15360  }
 0x4bd   : > { %v2577_v32 = vor.u32 %v2822_v30, %v2576_v29  ;;  %v2564_v36 = vld [vmem:[#allocation3] sm:$0xf]  ;;  %v2819_v38 = vld [vmem:[#allocation3 + $0xc] sm:$0xf0]  ;;  %2969 = vset.pattern.permute.xlu2 %v3131_v2  ;;  %v2566_v46 = vld [vmem:[#allocation3 + $0x10] sm:$0xf0] }
 0x4be   : > { %v2565_v40 = vor.u32 %v2819_v38, %v2564_v36  ;;  %v2820_v54 = vld [vmem:[#allocation3 + $0x14] sm:$0xf0]  ;;  %v2829_v57 = vld [vmem:[#allocation3 + $0x10] sm:$0xf0]  ;;  %v2624_v26 = vld [vmem:[#allocation3 + $0x2c] sm:$0xf] }
 0x4bf   : > { %1456 = vrot.lane.b32.xlu0 %v2577_v32, %s3145_s22  ;;  %v2606_v59 = vld [vmem:[#allocation3 + $0x14] sm:$0xf0]  ;;  %v2833_v60 = vld [vmem:[#allocation3 + $0x38] sm:$0xf0]  ;;  %v2612_v19 = vld [vmem:[#allocation3 + $0xc] sm:$0xf] }
 0x4c0   : > { %1450 = vrot.lane.b32.xlu1 %v2565_v40, %s3145_s22  ;;  %v2625_v33 = vor.u32 %v2833_v60, %v2624_v26  ;;  %v2830_v3 = vld [vmem:[#allocation3 + $0x18] sm:$0xf0]  ;;  %v2825_v7 = vld [vmem:[#allocation3 + $0x10] sm:$0xf0]  ;;  %v2590_v11 = vld [vmem:[#allocation3 + $0x14] sm:$0xf0] }
 0x4c1   : > { %v2821_v41 = vld [vmem:[#allocation3 + $0x24] sm:$0xf]  ;;  %v2584_v18 = vld [vmem:[#allocation3 + $0x28] sm:$0xf]  ;;  %v2613_v55 = vor.u32 %v2830_v3, %v2612_v19 }
 0x4c2   : > { %v2578_v42 = vld [vmem:[#allocation3 + $0x30] sm:$0xf0]  ;;  %v2823_v6 = vld [vmem:[#allocation3 + $0x34] sm:$0xf0]  ;;  %v2616_v50 = vld [vmem:[#allocation3 + $0x24] sm:$0xf] }
 0x4c3   : > { %v2818_v44 = vld [vmem:[#allocation3 + $0x4] sm:$0xf]  ;;  %v2581_v47 = vor.u32 %v2821_v41, %v2578_v42  ;;  %v2585_v48 = vor.u32 %v2823_v6, %v2584_v18  ;;  %v2832_v51 = vld [vmem:[#allocation3 + $0x30] sm:$0xf0]  ;;  %v2831_v52 = vld [vmem:[#allocation3 + $0x28] sm:$0xf] }
 0x4c4   : > { %v2569_v49 = vor.u32 %v2818_v44, %v2566_v46  ;;  %v2618_v53 = vld [vmem:[#allocation3 + $0x34] sm:$0xf0]  ;;  %v2572_v35 = vld [vmem:[#allocation3 + $0x8] sm:$0xf]  ;;  %v2617_v39 = vor.u32 %v2832_v51, %v2616_v50  ;;  %v2604_v56 = vld [vmem:[#allocation3 + $0x4] sm:$0xf] }
 0x4c5   : > { %1460 = vrot.lane.b32.xlu2 %v2585_v48, %s3145_s22  ;;  %v2621_v34 = vor.u32 %v2831_v52, %v2618_v53  ;;  %v2573_v17 = vor.u32 %v2820_v54, %v2572_v35  ;;  %v2828_v58 = vld [vmem:[#allocation3 + $0x8] sm:$0xf]  ;;  %v2605_v61 = vor.u32 %v2829_v57, %v2604_v56  ;;  %v2596_v45 = vld [vmem:[#allocation3 + $0x24] sm:$0xf]  ;;  %v2827_v63 = vld [vmem:[#allocation3 + $0x30] sm:$0xf0] }
 0x4c6   : > { %v2609_v62 = vor.u32 %v2828_v58, %v2606_v59  ;;  %v2826_v0 = vld [vmem:[#allocation3 + $0x28] sm:$0xf]  ;;  %v2598_v1 = vld [vmem:[#allocation3 + $0x34] sm:$0xf0]  ;;  %v2597_v4 = vor.u32 %v2827_v63, %v2596_v45  ;;  %v2588_v37 = vld [vmem:[#allocation3 + $0x4] sm:$0xf] }
 0x4c7   : > { %1458 = vrot.lane.b32.xlu0 %v2581_v47, %s3145_s22  ;;  %v2601_v5 = vor.u32 %v2826_v0, %v2598_v1  ;;  %v2824_v8 = vld [vmem:[#allocation3 + $0x8] sm:$0xf]  ;;  %v2589_v12 = vor.u32 %v2825_v7, %v2588_v37 }
 0x4c8   : > { %1452 = vrot.lane.b32.xlu1 %v2569_v49, %s3145_s22  ;;  %v2593_v14 = vor.u32 %v2824_v8, %v2590_v11 }
 0x4cd   : > { %1440 = vrot.lane.b32.xlu2 %v2617_v39, %s3142_s15 }
 0x4cf   : > { %1442 = vrot.lane.b32.xlu0 %v2621_v34, %s3142_s15 }
 0x4d0   : > { %1454 = vrot.lane.b32.xlu1 %v2573_v17, %s3145_s22 }
 0x4d5   : > { %1434 = vrot.lane.b32.xlu2 %v2605_v61, %s3142_s15 }
 0x4d7   : > { %1436 = vrot.lane.b32.xlu0 %v2609_v62, %s3142_s15 }
 0x4d8   : > { %1444 = vrot.lane.b32.xlu1 %v2625_v33, %s3142_s15 }
 0x4dd   : > { %1402 = vrot.lane.b32.xlu2 %v2597_v4, %s3141_s26 }
 0x4df   : > { %1404 = vrot.lane.b32.xlu0 %v2601_v5, %s3141_s26 }
 0x4e0   : > { %1438 = vrot.lane.b32.xlu1 %v2613_v55, %s3142_s15 }
 0x4e5   : > { %1398 = vrot.lane.b32.xlu2 %v2589_v12, %s3141_s26 }
 0x4e7   : > { %1400 = vrot.lane.b32.xlu0 %v2593_v14, %s3141_s26 }
 0x4e8   : > { %1473 = vrot.lane.b32.xlu1 %v2617_v39, %s3143_s30 }
 0x4ed   : > { %1475 = vrot.lane.b32.xlu2 %v2621_v34, %s3143_s30 }
 0x4ef   : > { %1467 = vrot.lane.b32.xlu0 %v2605_v61, %s3143_s30 }
 0x4f0   : > { %1469 = vrot.lane.b32.xlu1 %v2609_v62, %s3143_s30 }
 0x4f5   : > { %1477 = vrot.lane.b32.xlu2 %v2625_v33, %s3143_s30 }
 0x4f7   : > { %1471 = vrot.lane.b32.xlu0 %v2613_v55, %s3143_s30 }
 0x51f   : > { %v1461_v15 = vpop.permute.xlu2 %1460 }
 0x527   : > { %v1441_v24 = vpop.permute.xlu2 %1440 }
 0x52f   : > { %v1435_v32 = vpop.permute.xlu2 %1434 }
 0x531   : > { %v1457_v20 = vpop.permute.xlu0 %1456 }
 0x532   : > { %v1451_v21 = vpop.permute.xlu1 %1450  ;;  %1561 = vrot.lane.b32.xlu1 %v1457_v20, %s3145_s22 }
 0x533   : > { %1555 = vrot.lane.b32.xlu0 %v1451_v21, %s3145_s22 }
 0x537   : > { %v1403_v41 = vpop.permute.xlu2 %1402 }
 0x539   : > { %v1459_v28 = vpop.permute.xlu0 %1458 }
 0x53a   : > { %v1453_v29 = vpop.permute.xlu1 %1452  ;;  %v3810_v50 = vsel %vm1462_vm1, %v1457_v20, %v1459_v28  ;;  %v3818_v53 = vsel %vm1462_vm1, %v1459_v28, %v1461_v15 }
 0x53b   : > { %v3794_v30 = vsel %vm1462_vm1, %v1451_v21, %v1453_v29  ;;  %1549 = vrot.lane.b32.xlu0 %v1441_v24, %s3145_s22 }
 0x53c   : > { %1557 = vrot.lane.b32.xlu1 %v3794_v30, %s3145_s22 }
 0x53f   : > { %v1399_v18 = vpop.permute.xlu2 %1398 }
 0x541   : > { %v1443_v36 = vpop.permute.xlu0 %1442 }
 0x542   : > { %v1455_v38 = vpop.permute.xlu1 %1454  ;;  %v1448_v40 = vsel %vm973_vm14, %v1441_v24, %v1443_v36 }
 0x543   : > { %1543 = vrot.lane.b32.xlu0 %v1435_v32, %s3145_s22  ;;  %v3825_v39 = vsel %vm1462_vm1, %v1453_v29, %v1455_v38 }
 0x544   : > { %1551 = vrot.lane.b32.xlu1 %v1448_v40, %s3145_s22 }
 0x547   : > { %v1476_v59 = vpop.permute.xlu2 %1475 }
 0x549   : > { %v1437_v42 = vpop.permute.xlu0 %1436 }
 0x54a   : > { %v1445_v44 = vpop.permute.xlu1 %1444  ;;  %v1446_v46 = vsel %vm973_vm14, %v1435_v32, %v1437_v42 }
 0x54b   : > { %1537 = vrot.lane.b32.xlu0 %v1403_v41, %s3145_s22  ;;  %v1449_v57 = vsel %vm973_vm14, %v1443_v36, %v1445_v44 }
 0x54c   : > { %1545 = vrot.lane.b32.xlu1 %v1446_v46, %s3145_s22  ;;  %v2630_v46 = vld [vmem:[%s4167_s4 + $0x40] sm:$0xff] }
 0x54f   : > { %v1478_v60 = vpop.permute.xlu2 %1477 }
 0x550   : > { %v1482_v61 = vsel %vm1047_vm15, %v1476_v59, %v1478_v60 }
 0x551   : > { %v1405_v6 = vpop.permute.xlu0 %1404 }
 0x552   : > { %1541 = vrot.lane.b32.xlu2 %v1405_v6, %s3145_s22  ;;  %v1407_v47 = vsel %vm1030_vm13, %v1403_v41, %v1405_v6  ;;  %v1439_v48 = vpop.permute.xlu1 %1438  ;;  %v2636_v41 = vld [vmem:[%s4166_s3 + $0x40] sm:$0xf] }
 0x553   : > { %1531 = vrot.lane.b32.xlu0 %v1399_v18, %s3145_s22  ;;  %v1447_v58 = vsel %vm973_vm14, %v1437_v42, %v1439_v48  ;;  %v2835_v42 = vld [vmem:[%s4166_s3 + $0x44] sm:$0xf0] }
 0x554   : > { %1539 = vrot.lane.b32.xlu1 %v1407_v47, %s3145_s22  ;;  %v2637_v6 = vor.u32 %v2835_v42, %v2636_v41 }
 0x559   : > { %v1401_v49 = vpop.permute.xlu0 %1400 }
 0x55a   : > { %1563 = vrot.lane.b32.xlu2 %v3810_v50, %s3145_s22  ;;  %v1406_v51 = vsel %vm1030_vm13, %v1399_v18, %v1401_v49  ;;  %v1474_v52 = vpop.permute.xlu1 %1473 }
 0x55b   : > { %1535 = vrot.lane.b32.xlu0 %v1401_v49, %s3145_s22  ;;  %v1481_v26 = vsel %vm1047_vm15, %v1474_v52, %v1476_v59  ;;  %v2644_v59 = vld [vmem:[%s4166_s3 + $0x50] sm:$0xf] }
 0x55c   : > { %1533 = vrot.lane.b32.xlu1 %v1406_v51, %s3145_s22 }
 0x561   : > { %v1468_v35 = vpop.permute.xlu0 %1467 }
 0x562   : > { %1565 = vrot.lane.b32.xlu2 %v3818_v53, %s3145_s22  ;;  %v1470_v54 = vpop.permute.xlu1 %1469 }
 0x563   : > { %1567 = vrot.lane.b32.xlu0 %v1468_v35, %s3145_s22  ;;  %v1479_v17 = vsel %vm1047_vm15, %v1468_v35, %v1470_v54  ;;  %v2633_v35 = vld [vmem:[%s4167_s4 + $0x58] sm:$0xff] }
 0x564   : > { %1573 = vrot.lane.b32.xlu1 %v1474_v52, %s3145_s22  ;;  %v2632_v52 = vld [vmem:[%s4167_s4 + $0x50] sm:$0xff] }
 0x569   : > { %v1472_v34 = vpop.permute.xlu0 %1471 }
 0x56a   : > { %1559 = vrot.lane.b32.xlu2 %v3825_v39, %s3145_s22  ;;  %v1480_v56 = vsel %vm1047_vm15, %v1470_v54, %v1472_v34  ;;  %v2834_v34 = vld [vmem:[%s4166_s3 + $0x44] sm:$0xf] }
 0x56b   : > { %1571 = vrot.lane.b32.xlu0 %v1480_v56, %s3145_s22 }
 0x56c   : > { %1569 = vrot.lane.b32.xlu1 %v1479_v17, %s3145_s22  ;;  %v2638_v17 = vld [vmem:[%s4166_s3 + $0x48] sm:$0xf0] }
 0x572   : > { %1553 = vrot.lane.b32.xlu2 %v1449_v57, %s3145_s22  ;;  %v2641_v57 = vor.u32 %v2834_v34, %v2638_v17 }
 0x573   : > { %1505 = vperm.xlu0 %2970, %v2632_v52  }
 0x574   : > { %1495 = vperm.xlu1 %2968, %v2630_v46  }
 0x57a   : > { %1547 = vrot.lane.b32.xlu2 %v1447_v58, %s3145_s22 }
 0x57c   : > { %1510 = vperm.xlu1 %2968, %v2633_v35  }
 0x582   : > { %1575 = vrot.lane.b32.xlu2 %v1481_v26, %s3145_s22  ;;  %v2837_v26 = vld [vmem:[%s4166_s3 + $0x54] sm:$0xf0] }
 0x58a   : > { %1577 = vrot.lane.b32.xlu2 %v1482_v61, %s3145_s22 }
 0x5a4   : > { %v1562_v62 = vpop.permute.xlu1 %1561 }
 0x5a5   : > { %v1556_v33 = vpop.permute.xlu0 %1555 }
 0x5ac   : > { %v1542_v45 = vpop.permute.xlu2 %1541 }
 0x5ad   : > { %v1550_v63 = vpop.permute.xlu0 %1549 }
 0x5ae   : > { %v1558_v0 = vpop.permute.xlu1 %1557 }
 0x5af   : > { %v1587_v5 = vsel %vm1462_vm1, %v1556_v33, %v1558_v0  ;;  %v2836_v33 = vld [vmem:[%s4166_s3 + $0x54] sm:$0xf] }
 0x5b4   : > { %v1564_v1 = vpop.permute.xlu2 %1563 }
 0x5b5   : > { %v1589_v19 = vsel %vm1462_vm1, %v1562_v62, %v1564_v1  ;;  %v1544_v3 = vpop.permute.xlu0 %1543  ;;  %v2645_v62 = vor.u32 %v2837_v26, %v2644_v59 }
 0x5b6   : > { %v1552_v4 = vpop.permute.xlu1 %1551  ;;  %1621 = vmatpush.bf16.msra.mxu3 %v1589_v19 }
 0x5b7   : > { %v1585_v37 = vsel %vm1462_vm1, %v1550_v63, %v1552_v4 }
 0x5ba   : > { %1622 = vmatpush.bf16.msra.mxu3 %v1587_v5 }
 0x5bc   : > { %v1566_v55 = vpop.permute.xlu2 %1565 }
 0x5bd   : > { %v1590_v7 = vsel %vm1462_vm1, %v1564_v1, %v1566_v55  ;;  %v1538_v11 = vpop.permute.xlu0 %1537 }
 0x5be   : > { %v1546_v8 = vpop.permute.xlu1 %1545  ;;  %1623 = vmatpush.bf16.msra.mxu3 %v1585_v37  ;;  %1659 = vmatpush.bf16.msrb.mxu0 %v1590_v7 }
 0x5bf   : > { %v1583_v12 = vsel %vm1462_vm1, %v1544_v3, %v1546_v8 }
 0x5c2   : > { %1624 = vmatpush.bf16.msra.mxu3 %v1583_v12 }
 0x5c4   : > { %v1560_v14 = vpop.permute.xlu2 %1559 }
 0x5c5   : > { %v1588_v15 = vsel %vm1462_vm1, %v1558_v0, %v1560_v14  ;;  %v1532_v24 = vpop.permute.xlu0 %1531 }
 0x5c6   : > { %v1540_v20 = vpop.permute.xlu1 %1539  ;;  %1660 = vmatpush.bf16.msrb.mxu0 %v1588_v15 }
 0x5c7   : > { %v1581_v21 = vsel %vm1462_vm1, %v1538_v11, %v1540_v20  ;;  %v1582_v47 = vsel %vm1462_vm1, %v1540_v20, %v1542_v45  ;;  %v2646_v45 = vld [vmem:[%s4166_s3 + $0x58] sm:$0xf0] }
 0x5c8   : > { %1625 = vmatpush.bf16.msra.mxu3 %v1581_v21  ;;  %v2649_v63 = vor.u32 %v2836_v33, %v2646_v45 }
 0x5cc   : > { %v1554_v28 = vpop.permute.xlu2 %1553 }
 0x5cd   : > { %v1586_v29 = vsel %vm1462_vm1, %v1552_v4, %v1554_v28  ;;  %v1536_v38 = vpop.permute.xlu0 %1535 }
 0x5ce   : > { %v1534_v32 = vpop.permute.xlu1 %1533  ;;  %1661 = vmatpush.bf16.msrb.mxu0 %v1586_v29 }
 0x5cf   : > { %v1579_v36 = vsel %vm1462_vm1, %v1532_v24, %v1534_v32  ;;  %v1580_v51 = vsel %vm1462_vm1, %v1534_v32, %v1536_v38 }
 0x5d0   : > { %1626 = vmatpush.bf16.msra.mxu3 %v1579_v36 }
 0x5d4   : > { %1627 = vmatpush.bf16.msra.mxu3 %v3810_v50  ;;  %v1548_v40 = vpop.permute.xlu2 %1547 }
 0x5d5   : > { %v1584_v44 = vsel %vm1462_vm1, %v1546_v8, %v1548_v40  ;;  %v1568_v48 = vpop.permute.xlu0 %1567 }
 0x5d6   : > { %1662 = vmatpush.bf16.msrb.mxu0 %v1584_v44  ;;  %v1574_v18 = vpop.permute.xlu1 %1573 }
 0x5d8   : > { %1628 = vmatpush.bf16.msra.mxu3 %v3794_v30  ;;  %v2631_v30 = vld [vmem:[%s4167_s4 + $0x48] sm:$0xff] }
 0x5d9   : > { %1500 = vperm.xlu2 %2969, %v2631_v30  }
 0x5da   : > { %1663 = vmatpush.bf16.msrb.mxu0 %v1582_v47 }
 0x5db   : > { %1629 = vmatmul.bf16.vlgmr.msra.gmra.mxu3 %v2637_v6 }
 0x5dc   : > { %v1576_v49 = vpop.permute.xlu2 %1575 }
 0x5dd   : > { %v1593_v50 = vsel %vm1462_vm1, %v1574_v18, %v1576_v49  ;;  %v1572_v61 = vpop.permute.xlu0 %1571 }
 0x5de   : > { %1646 = vmatpush.bf16.msra.mxu2 %v1593_v50  ;;  %1664 = vmatpush.bf16.msrb.mxu0 %v1580_v51  ;;  %v1570_v54 = vpop.permute.xlu1 %1569 }
 0x5df   : > { %v1591_v56 = vsel %vm1462_vm1, %v1568_v48, %v1570_v54 }
 0x5e2   : > { %1647 = vmatpush.bf16.msra.mxu2 %v1591_v56  ;;  %1665 = vmatpush.bf16.msrb.mxu0 %v3818_v53  ;;  %v1592_v53 = vsel %vm1462_vm1, %v1570_v54, %v1572_v61 }
 0x5e4   : > { %v1578_v58 = vpop.permute.xlu2 %1577 }
 0x5e5   : > { %2650 = vmatmul.msk.bf16.vlgmr.msra.gmra.mxu2 %vm767_vm12, %v2641_v57  ;;  %v1594_v60 = vsel %vm1462_vm1, %v1576_v49, %v1578_v58  ;;  %v1506_v36 = vpop.permute.xlu0 %1505 }
 0x5e6   : > { %1666 = vmatpush.bf16.msrb.mxu0 %v3825_v39  ;;  %1684 = vmatpush.bf16.msrb.mxu1 %v1594_v60  ;;  %v1496_v0 = vpop.permute.xlu1 %1495 }
 0x5e9   : > { %1667 = vmatmul.bf16.vlgmr.msrb.gmra.mxu0 %v2637_v6 }
 0x5ea   : > { %1685 = vmatpush.bf16.msrb.mxu1 %v1592_v53 }
 0x5eb   : > { %1634 = vmatmul.bf16.gmra.mxu3 %v2645_v62 }
 0x5ed   : > { %2652 = vmatmul.msk.bf16.vlgmr.msrb.gmra.mxu1 %vm767_vm12, %v2641_v57 }
 0x5ee   : > { %v1511_v30 = vpop.permute.xlu1 %1510 }
 0x5f5   : > { %2651 = vmatmul.msk.bf16.gmra.mxu2 %vm767_vm12, %v2649_v63 }
 0x5f9   : > { %1672 = vmatmul.bf16.gmra.mxu0 %v2645_v62 }
 0x5fd   : > { %2653 = vmatmul.msk.bf16.gmra.mxu1 %vm767_vm12, %v2649_v63 }
 0x633   : > { %v1501_v11 = vpop.permute.xlu2 %1500 }
 0x65e   : > { %v1630_v39 = vpop.f32.mrf.mxu3 }
 0x65f   : > { %v1631_v1 = vadd.f32 %v1630_v39, %v1496_v0 }
 0x666   : > { %v1668_v19 = vpop.f32.mrf.mxu0  ;;  %v1632_v4 = vpop.f32.mrf.mxu3 }
 0x667   : > { %v1669_v3 = vadd.f32 %v1668_v19, %v1496_v0  ;;  %v1633_v20 = vadd.f32 %v1632_v4, %v1501_v11 }
 0x668   : > { %v1649_v5 = vpop.f32.mrf.mxu2 }
 0x669   : > { %v1650_v55 = vadd.f32 %v1649_v5, %v1631_v1 }
 0x66a   : > { %v1687_v37 = vpop.f32.mrf.mxu1 }
 0x66b   : > { %v1697_v7 = vmax.f32 %v1650_v55, 0.0  ;;  %v1688_v8 = vadd.f32 %v1687_v37, %v1669_v3 }
 0x66d   : > { %v3902_v12 = vadd.f32 %v1697_v7, %v3725_v22  ;;  %v1698_v14 = vmax.f32 %v1688_v8, 0.0 }
 0x66e   : > { %v1670_v15 = vpop.f32.mrf.mxu0  ;;  %v1635_v38 = vpop.f32.mrf.mxu3 }
 0x66f   : > { %v3905_v21 = vadd.f32 %v1698_v14, %v3728_v23  ;;  %v1671_v29 = vadd.f32 %v1670_v15, %v1501_v11  ;;  %v1636_v44 = vadd.f32 %v1635_v38, %v1506_v36 }
 0x670   : > { %v1651_v24 = vpop.f32.mrf.mxu2 }
 0x671   : > { %v1713_v28 = vpack.c.bf16 %v3905_v21, %v3902_v12  ;;  %v1652_v32 = vadd.f32 %v1651_v24, %v1633_v20 }
 0x672   : > { %v1689_v40 = vpop.f32.mrf.mxu1 }
 0x673   : > { %1717 = vst [vmem:[#allocation3 + $0x4] sm:$0xff] %v1713_v28  ;;  %v1699_v41 = vmax.f32 %v1652_v32, 0.0  ;;  %v1690_v42 = vadd.f32 %v1689_v40, %v1671_v29  ;;  %v1724_v33 = vunpack.c.l.bf16 (%p3341_p8), %v1713_v28  ;;  %v1725_v45 = vunpack.c.h.bf16 (%p3341_p8), %v1713_v28 }
 0x675   : > { %v1700_v22 = vmax.f32 %v1690_v42, 0.0  ;;  %v3910_v18 = vadd.f32 %v1699_v41, %v3733_v9 }
 0x676   : > { %v1673_v46 = vpop.f32.mrf.mxu0  ;;  %v1637_v35 = vpop.f32.mrf.mxu3 }
 0x677   : > { %v3913_v23 = vadd.f32 %v1700_v22, %v3736_v10  ;;  %v1674_v6 = vadd.f32 %v1673_v46, %v1506_v36  ;;  %v1638_v17 = vadd.f32 %v1637_v35, %v1511_v30 }
 0x678   : > { %v1654_v47 = vpop.f32.mrf.mxu2 }
 0x679   : > { %v1714_v48 = vpack.c.bf16 %v3913_v23, %v3910_v18  ;;  %v1655_v49 = vadd.f32 %v1654_v47, %v1636_v44 }
 0x67a   : > { %v1692_v50 = vpop.f32.mrf.mxu1 }
 0x67b   : > { %1718 = vst [vmem:[#allocation3 + $0x14] sm:$0xff] %v1714_v48  ;;  %v1701_v51 = vmax.f32 %v1655_v49, 0.0  ;;  %v1693_v52 = vadd.f32 %v1692_v50, %v1674_v6  ;;  %v1726_v63 = vunpack.c.l.bf16 (%p3341_p8), %v1714_v48  ;;  %v1727_v39 = vunpack.c.h.bf16 (%p3341_p8), %v1714_v48 }
 0x67d   : > { %v3918_v54 = vadd.f32 %v1701_v51, %v3741_v25  ;;  %v1702_v9 = vmax.f32 %v1693_v52, 0.0  ;;  %v1736_v4 = vmul.f32 (%p3341_p8), %v3348_v13, %v1726_v63  ;;  %v1737_v5 = vmul.f32 (%p3341_p8), %v3352_v16, %v1727_v39 }
 0x67e   : > { %v1675_v34 = vpop.f32.mrf.mxu0 }
 0x67f   : > { %v3921_v10 = vadd.f32 %v1702_v9, %v3744_v27  ;;  %v1676_v58 = vadd.f32 %v1675_v34, %v1511_v30  ;;  %v1743_v14 = vpack.c.bf16 (%p3341_p8), %v1737_v5, %v1736_v4 }
 0x680   : > { %v1656_v56 = vpop.f32.mrf.mxu2 }
 0x681   : > { %v1715_v57 = vpack.c.bf16 %v3921_v10, %v3918_v54  ;;  %v1657_v59 = vadd.f32 %v1656_v56, %v1638_v17  ;;  %1747 = vst [vmem:[#allocation3 + $0x14] sm:$0xff] (%p3341_p8), %v1743_v14 }
 0x682   : > { %v1694_v26 = vpop.f32.mrf.mxu1 }
 0x683   : > { %1719 = vst [vmem:[#allocation3 + $0x24] sm:$0xff] %v1715_v57  ;;  %v1703_v60 = vmax.f32 %v1657_v59, 0.0  ;;  %v1695_v61 = vadd.f32 %v1694_v26, %v1676_v58  ;;  %v1728_v0 = vunpack.c.l.bf16 (%p3341_p8), %v1715_v57  ;;  %v1729_v1 = vunpack.c.h.bf16 (%p3341_p8), %v1715_v57 }
 0x685   : > { %v1704_v62 = vmax.f32 %v1695_v61, 0.0  ;;  %v3926_v25 = vadd.f32 %v1703_v60, %v3749_v43  ;;  %v1734_v43 = vmul.f32 (%p3341_p8), %v3348_v13, %v1724_v33  ;;  %v1738_v55 = vmul.f32 (%p3341_p8), %v3348_v13, %v1728_v0 }
 0x686   : > { %v1739_v37 = vmul.f32 (%p3341_p8), %v3352_v16, %v1729_v1 }
 0x687   : > { %v3929_v53 = vadd.f32 %v1704_v62, %v3752_v31  ;;  %1723 = sbr.rel (!%p3341_p8) target bundleno = 1682 (0x692), region = 68  ;;  %v1735_v31 = vmul.f32 (%p3341_p8), %v3352_v16, %v1725_v45 }
 0x688   : > { %v1744_v15 = vpack.c.bf16 (%p3341_p8), %v1739_v37, %v1738_v55 }
 0x689   : > { %v1716_v27 = vpack.c.bf16 %v3929_v53, %v3926_v25  ;;  %v1742_v11 = vpack.c.bf16 (%p3341_p8), %v1735_v31, %v1734_v43 }
 0x68a   : > { %1748 = vst [vmem:[#allocation3 + $0x24] sm:$0xff] (%p3341_p8), %v1744_v15 }
 0x68b   : > { %1720 = vst [vmem:[#allocation3 + $0x34] sm:$0xff] %v1716_v27  ;;  %v1730_v19 = vunpack.c.l.bf16 (%p3341_p8), %v1716_v27  ;;  %v1731_v3 = vunpack.c.h.bf16 (%p3341_p8), %v1716_v27 }
 0x68c   : > { %1746 = vst [vmem:[#allocation3 + $0x4] sm:$0xff] %v1742_v11 }
 0x68d   : > { %v1740_v7 = vmul.f32 %v3348_v13, %v1730_v19  ;;  %v1741_v8 = vmul.f32 %v3352_v16, %v1731_v3 }
 0x68f   : > { %v1745_v20 = vpack.c.bf16 %v1741_v8, %v1740_v7 }
 0x691   : > { %1749 = vst [vmem:[#allocation3 + $0x34] sm:$0xff] %v1745_v20 }
 0x692 PF: > { %v2668_v24 = vld [vmem:[#allocation3 + $0x20] sm:$0xf]  ;;  %v2842_v28 = vld [vmem:[#allocation3 + $0x2c] sm:$0xf0]  ;;  %2971 = vset.pattern.permute.xlu1 %v3131_v2  ;;  %2973 = vset.pattern.permute.xlu0 %v3131_v2  ;;  %s3146_s24 = smov 7   ;;  %s3147_s8 = smov 127  }
 0x693   : > { %v3945_v29 = vor.u32 %v2842_v28, %v2668_v24  ;;  %v2656_v32 = vld [vmem:[#allocation3] sm:$0xf]  ;;  %v2839_v36 = vld [vmem:[#allocation3 + $0xc] sm:$0xf0]  ;;  %2972 = vset.pattern.permute.xlu2 %v3131_v2  ;;  %v2658_v46 = vld [vmem:[#allocation3 + $0x10] sm:$0xf0] }
 0x694   : > { %v3948_v38 = vor.u32 %v2839_v36, %v2656_v32  ;;  %v2840_v9 = vld [vmem:[#allocation3 + $0x14] sm:$0xf0]  ;;  %v2849_v57 = vld [vmem:[#allocation3 + $0x10] sm:$0xf0]  ;;  %v2716_v60 = vld [vmem:[#allocation3 + $0x2c] sm:$0xf] }
 0x695   : > { %1871 = vrot.lane.b32.xlu0 %v3945_v29, %s3146_s24  ;;  %v2698_v26 = vld [vmem:[#allocation3 + $0x14] sm:$0xf0]  ;;  %v2853_v61 = vld [vmem:[#allocation3 + $0x38] sm:$0xf0]  ;;  %v2704_v1 = vld [vmem:[#allocation3 + $0xc] sm:$0xf] }
 0x696   : > { %1865 = vrot.lane.b32.xlu1 %v3948_v38, %s3146_s24  ;;  %v2717_v27 = vor.u32 %v2853_v61, %v2716_v60  ;;  %v2850_v19 = vld [vmem:[#allocation3 + $0x18] sm:$0xf0]  ;;  %v2845_v4 = vld [vmem:[#allocation3 + $0x10] sm:$0xf0]  ;;  %v2682_v37 = vld [vmem:[#allocation3 + $0x14] sm:$0xf0] }
 0x697   : > { %v2841_v40 = vld [vmem:[#allocation3 + $0x24] sm:$0xf]  ;;  %v2676_v42 = vld [vmem:[#allocation3 + $0x28] sm:$0xf]  ;;  %v2705_v43 = vor.u32 %v2850_v19, %v2704_v1  ;;  %s3148_s18 = smov 1   ;;  %vm1877_vm2 = vcmask 56320  }
 0x698   : > { %v2670_v41 = vld [vmem:[#allocation3 + $0x30] sm:$0xf0]  ;;  %v2843_v22 = vld [vmem:[#allocation3 + $0x34] sm:$0xf0]  ;;  %v2708_v49 = vld [vmem:[#allocation3 + $0x24] sm:$0xf] }
 0x699   : > { %v2838_v44 = vld [vmem:[#allocation3 + $0x4] sm:$0xf]  ;;  %v3952_v6 = vor.u32 %v2843_v22, %v2676_v42  ;;  %v2673_v47 = vor.u32 %v2841_v40, %v2670_v41  ;;  %v2852_v50 = vld [vmem:[#allocation3 + $0x30] sm:$0xf0]  ;;  %v2851_v52 = vld [vmem:[#allocation3 + $0x28] sm:$0xf] }
 0x69a   : > { %v3955_v48 = vor.u32 %v2838_v44, %v2658_v46  ;;  %v2709_v51 = vor.u32 %v2852_v50, %v2708_v49  ;;  %v2710_v35 = vld [vmem:[#allocation3 + $0x34] sm:$0xf0]  ;;  %v2664_v30 = vld [vmem:[#allocation3 + $0x8] sm:$0xf]  ;;  %v2696_v56 = vld [vmem:[#allocation3 + $0x4] sm:$0xf] }
 0x69b   : > { %1875 = vrot.lane.b32.xlu2 %v3952_v6, %s3146_s24  ;;  %v2713_v34 = vor.u32 %v2851_v52, %v2710_v35  ;;  %v3959_v17 = vor.u32 %v2840_v9, %v2664_v30  ;;  %v2697_v58 = vor.u32 %v2849_v57, %v2696_v56  ;;  %v2848_v59 = vld [vmem:[#allocation3 + $0x8] sm:$0xf]  ;;  %v2688_v33 = vld [vmem:[#allocation3 + $0x24] sm:$0xf]  ;;  %v2847_v45 = vld [vmem:[#allocation3 + $0x30] sm:$0xf0] }
 0x69c   : > { %v2701_v62 = vor.u32 %v2848_v59, %v2698_v26  ;;  %v2689_v63 = vor.u32 %v2847_v45, %v2688_v33  ;;  %v2846_v39 = vld [vmem:[#allocation3 + $0x28] sm:$0xf]  ;;  %v2690_v0 = vld [vmem:[#allocation3 + $0x34] sm:$0xf0]  ;;  %v2680_v31 = vld [vmem:[#allocation3 + $0x4] sm:$0xf] }
 0x69d   : > { %1873 = vrot.lane.b32.xlu0 %v2673_v47, %s3146_s24  ;;  %v2693_v3 = vor.u32 %v2846_v39, %v2690_v0  ;;  %v2681_v5 = vor.u32 %v2845_v4, %v2680_v31  ;;  %v2844_v55 = vld [vmem:[#allocation3 + $0x8] sm:$0xf]  ;;  %vm1820_vm3 = vcmask 1039360   ;;  %vm2006_vm4 = vcmask 7168  }
 0x69e   : > { %1867 = vrot.lane.b32.xlu1 %v3955_v48, %s3146_s24  ;;  %v2685_v7 = vor.u32 %v2844_v55, %v2682_v37 }
 0x6a3   : > { %1855 = vrot.lane.b32.xlu2 %v2709_v51, %s3141_s26 }
 0x6a5   : > { %1857 = vrot.lane.b32.xlu0 %v2713_v34, %s3141_s26 }
 0x6a6   : > { %1869 = vrot.lane.b32.xlu1 %v3959_v17, %s3146_s24 }
 0x6ab   : > { %1849 = vrot.lane.b32.xlu2 %v2697_v58, %s3141_s26 }
 0x6ad   : > { %1851 = vrot.lane.b32.xlu0 %v2701_v62, %s3141_s26 }
 0x6ae   : > { %1859 = vrot.lane.b32.xlu1 %v2717_v27, %s3141_s26 }
 0x6b3   : > { %1816 = vrot.lane.b32.xlu2 %v2689_v63, %s3147_s8 }
 0x6b5   : > { %1818 = vrot.lane.b32.xlu0 %v2693_v3, %s3147_s8 }
 0x6b6   : > { %1853 = vrot.lane.b32.xlu1 %v2705_v43, %s3141_s26 }
 0x6bb   : > { %1812 = vrot.lane.b32.xlu2 %v2681_v5, %s3147_s8 }
 0x6bd   : > { %1814 = vrot.lane.b32.xlu0 %v2685_v7, %s3147_s8 }
 0x6be   : > { %1888 = vrot.lane.b32.xlu1 %v2709_v51, %s3140_s9 }
 0x6c3   : > { %1890 = vrot.lane.b32.xlu2 %v2713_v34, %s3140_s9 }
 0x6c5   : > { %1882 = vrot.lane.b32.xlu0 %v2697_v58, %s3140_s9 }
 0x6c6   : > { %1884 = vrot.lane.b32.xlu1 %v2701_v62, %s3140_s9 }
 0x6cb   : > { %1892 = vrot.lane.b32.xlu2 %v2717_v27, %s3140_s9 }
 0x6cd   : > { %1886 = vrot.lane.b32.xlu0 %v2705_v43, %s3140_s9 }
 0x6ce   : > { %1954 = vrot.lane.b32.xlu1 %v2673_v47, %s3148_s18 }
 0x6d3   : > { %1946 = vrot.lane.b32.xlu2 %v3948_v38, %s3148_s18 }
 0x6d5   : > { %1952 = vrot.lane.b32.xlu0 %v3945_v29, %s3148_s18 }
 0x6f5   : > { %v1876_v8 = vpop.permute.xlu2 %1875 }
 0x6fd   : > { %v1856_v15 = vpop.permute.xlu2 %1855 }
 0x705   : > { %v1850_v32 = vpop.permute.xlu2 %1849 }
 0x707   : > { %v1872_v11 = vpop.permute.xlu0 %1871 }
 0x708   : > { %v1866_v14 = vpop.permute.xlu1 %1865  ;;  %1988 = vrot.lane.b32.xlu1 %v1872_v11, %s3148_s18 }
 0x709   : > { %1982 = vrot.lane.b32.xlu0 %v1866_v14, %s3148_s18 }
 0x70d   : > { %v1817_v40 = vpop.permute.xlu2 %1816 }
 0x70f   : > { %v1874_v20 = vpop.permute.xlu0 %1873 }
 0x710   : > { %v1868_v24 = vpop.permute.xlu1 %1867  ;;  %v1880_v30 = vsel %vm1877_vm2, %v1872_v11, %v1874_v20  ;;  %v1881_v58 = vsel %vm1877_vm2, %v1874_v20, %v1876_v8 }
 0x711   : > { %1976 = vrot.lane.b32.xlu0 %v1856_v15, %s3148_s18  ;;  %v1878_v28 = vsel %vm1877_vm2, %v1866_v14, %v1868_v24 }
 0x712   : > { %1984 = vrot.lane.b32.xlu1 %v1878_v28, %s3148_s18 }
 0x715   : > { %v1813_v44 = vpop.permute.xlu2 %1812 }
 0x717   : > { %v1858_v36 = vpop.permute.xlu0 %1857 }
 0x718   : > { %v1870_v29 = vpop.permute.xlu1 %1869  ;;  %v1863_v38 = vsel %vm1030_vm13, %v1856_v15, %v1858_v36 }
 0x719   : > { %1970 = vrot.lane.b32.xlu0 %v1850_v32, %s3148_s18 }
 0x71a   : > { %1978 = vrot.lane.b32.xlu1 %v1863_v38, %s3148_s18 }
 0x71d   : > { %v1891_v35 = vpop.permute.xlu2 %1890 }
 0x71f   : > { %v1852_v41 = vpop.permute.xlu0 %1851 }
 0x720   : > { %v1860_v42 = vpop.permute.xlu1 %1859  ;;  %v1861_v22 = vsel %vm1030_vm13, %v1850_v32, %v1852_v41 }
 0x721   : > { %1964 = vrot.lane.b32.xlu0 %v1817_v40, %s3148_s18  ;;  %v1864_v62 = vsel %vm1030_vm13, %v1858_v36, %v1860_v42 }
 0x722   : > { %1972 = vrot.lane.b32.xlu1 %v1861_v22, %s3148_s18 }
 0x725   : > { %v1893_v26 = vpop.permute.xlu2 %1892 }
 0x726   : > { %v1897_v61 = vsel %vm615_vm10, %v1891_v35, %v1893_v26  ;;  %v2854_v26 = vld [vmem:[%s4166_s3 + $0x64] sm:$0xf] }
 0x727   : > { %v1819_v46 = vpop.permute.xlu0 %1818 }
 0x728   : > { %v1854_v47 = vpop.permute.xlu1 %1853  ;;  %1968 = vrot.lane.b32.xlu2 %v1819_v46, %s3148_s18  ;;  %v1822_v49 = vsel %vm1820_vm3, %v1817_v40, %v1819_v46  ;;  %v2728_v46 = vld [vmem:[%s4166_s3 + $0x60] sm:$0xf] }
 0x729   : > { %1958 = vrot.lane.b32.xlu0 %v1813_v44, %s3148_s18 }
 0x72a   : > { %1966 = vrot.lane.b32.xlu1 %v1822_v49, %s3148_s18 }
 0x72d   : > { %v1947_v45 = vpop.permute.xlu2 %1946 }
 0x72f   : > { %v1815_v50 = vpop.permute.xlu0 %1814 }
 0x730   : > { %v1889_v51 = vpop.permute.xlu1 %1888  ;;  %1962 = vrot.lane.b32.xlu2 %v1815_v50, %s3148_s18  ;;  %v1821_v52 = vsel %vm1820_vm3, %v1813_v44, %v1815_v50 }
 0x731   : > { %2000 = vrot.lane.b32.xlu0 %v1889_v51, %s3148_s18  ;;  %v1896_v9 = vsel %vm615_vm10, %v1889_v51, %v1891_v35 }
 0x732   : > { %1960 = vrot.lane.b32.xlu1 %v1821_v52, %s3148_s18  ;;  %v2722_v52 = vld [vmem:[%s4167_s4 + $0x60] sm:$0xff] }
 0x737   : > { %v1883_v34 = vpop.permute.xlu0 %1882 }
 0x738   : > { %1990 = vrot.lane.b32.xlu2 %v1880_v30, %s3148_s18  ;;  %v1885_v56 = vpop.permute.xlu1 %1884 }
 0x739   : > { %1948 = vrot.lane.b32.xlu0 %v3955_v48, %s3148_s18  ;;  %v1894_v57 = vsel %vm615_vm10, %v1883_v34, %v1885_v56  ;;  %v1879_v48 = vsel %vm1877_vm2, %v1868_v24, %v1870_v29 }
 0x73a   : > { %2002 = vrot.lane.b32.xlu1 %v1896_v9, %s3148_s18 }
 0x73f   : > { %v1887_v59 = vpop.permute.xlu0 %1886 }
 0x740   : > { %1992 = vrot.lane.b32.xlu2 %v1881_v58, %s3148_s18  ;;  %v1895_v60 = vsel %vm615_vm10, %v1885_v56, %v1887_v59  ;;  %v4020_v27 = vpop.permute.xlu1 %1954  ;;  %v2724_v58 = vld [vmem:[%s4167_s4 + $0x70] sm:$0xff]  ;;  %v2723_v59 = vld [vmem:[%s4167_s4 + $0x68] sm:$0xff] }
 0x741   : > { %1996 = vrot.lane.b32.xlu0 %v1894_v57, %s3148_s18  ;;  %v2725_v57 = vld [vmem:[%s4167_s4 + $0x78] sm:$0xff] }
 0x742   : > { %1956 = vrot.lane.b32.xlu1 %v3952_v6, %s3148_s18  ;;  %v1862_v6 = vsel %vm1030_vm13, %v1852_v41, %v1854_v47  ;;  %v2855_v47 = vld [vmem:[%s4166_s3 + $0x64] sm:$0xf0] }
 0x743   : > { %v2729_v51 = vor.u32 %v2855_v47, %v2728_v46 }
 0x747   : > { %v1953_v33 = vpop.permute.xlu0 %1952 }
 0x748   : > { %1986 = vrot.lane.b32.xlu2 %v1879_v48, %s3148_s18  ;;  %v2009_v41 = vsel %vm2006_vm4, %v1953_v33, %v4020_v27 }
 0x749   : > { %1998 = vrot.lane.b32.xlu0 %v1895_v60, %s3148_s18  ;;  %v2730_v60 = vld [vmem:[%s4166_s3 + $0x68] sm:$0xf0] }
 0x74a   : > { %2004 = vrot.lane.b32.xlu1 %v1897_v61, %s3148_s18 }
 0x750   : > { %1980 = vrot.lane.b32.xlu2 %v1864_v62, %s3148_s18 }
 0x751   : > { %1920 = vperm.xlu0 %2973, %v2724_v58  }
 0x752   : > { %1910 = vperm.xlu1 %2971, %v2722_v52  }
 0x758   : > { %1974 = vrot.lane.b32.xlu2 %v1862_v6, %s3148_s18  ;;  %v2733_v6 = vor.u32 %v2854_v26, %v2730_v60 }
 0x75a   : > { %1925 = vperm.xlu1 %2971, %v2725_v57  }
 0x760   : > { %1994 = vrot.lane.b32.xlu2 %v1883_v34, %s3148_s18 }
 0x768   : > { %1950 = vrot.lane.b32.xlu2 %v3959_v17, %s3148_s18 }
 0x770   : > { %1915 = vperm.xlu2 %2972, %v2723_v59  }
 0x77a   : > { %v1989_v63 = vpop.permute.xlu1 %1988 }
 0x77b   : > { %v1983_v39 = vpop.permute.xlu0 %1982 }
 0x782   : > { %v1969_v0 = vpop.permute.xlu2 %1968 }
 0x783   : > { %v1977_v1 = vpop.permute.xlu0 %1976 }
 0x784   : > { %v1985_v19 = vpop.permute.xlu1 %1984 }
 0x785   : > { %v2019_v17 = vsel %vm2006_vm4, %v1983_v39, %v1985_v19 }
 0x78a   : > { %v4022_v3 = vpop.permute.xlu2 %1962 }
 0x78b   : > { %v1971_v43 = vpop.permute.xlu0 %1970 }
 0x78c   : > { %v1979_v31 = vpop.permute.xlu1 %1978 }
 0x78d   : > { %v2017_v11 = vsel %vm2006_vm4, %v1977_v1, %v1979_v31 }
 0x792   : > { %v1991_v4 = vpop.permute.xlu2 %1990 }
 0x793   : > { %v1965_v5 = vpop.permute.xlu0 %1964  ;;  %v2021_v55 = vsel %vm2006_vm4, %v1989_v63, %v1991_v4  ;;  %v2857_v63 = vld [vmem:[%s4166_s3 + $0x74] sm:$0xf0] }
 0x794   : > { %v1973_v37 = vpop.permute.xlu1 %1972  ;;  %2053 = vmatpush.bf16.msrb.mxu3 %v2021_v55 }
 0x795   : > { %v2015_v20 = vsel %vm2006_vm4, %v1971_v43, %v1973_v37 }
 0x798   : > { %2054 = vmatpush.bf16.msrb.mxu3 %v2019_v17 }
 0x79a   : > { %v1993_v7 = vpop.permute.xlu2 %1992 }
 0x79b   : > { %v1959_v8 = vpop.permute.xlu0 %1958  ;;  %v2022_v14 = vsel %vm2006_vm4, %v1991_v4, %v1993_v7  ;;  %v2856_v4 = vld [vmem:[%s4166_s3 + $0x74] sm:$0xf] }
 0x79c   : > { %v1967_v15 = vpop.permute.xlu1 %1966  ;;  %2055 = vmatpush.bf16.msrb.mxu3 %v2017_v11  ;;  %2091 = vmatpush.bf16.msra.mxu0 %v2022_v14 }
 0x79d   : > { %v2013_v32 = vsel %vm2006_vm4, %v1965_v5, %v1967_v15  ;;  %v2014_v56 = vsel %vm2006_vm4, %v1967_v15, %v1969_v0 }
 0x7a0   : > { %2056 = vmatpush.bf16.msrb.mxu3 %v2015_v20 }
 0x7a2   : > { %v1987_v24 = vpop.permute.xlu2 %1986 }
 0x7a3   : > { %v2001_v28 = vpop.permute.xlu0 %2000  ;;  %v2020_v36 = vsel %vm2006_vm4, %v1985_v19, %v1987_v24 }
 0x7a4   : > { %v1961_v29 = vpop.permute.xlu1 %1960  ;;  %2057 = vmatpush.bf16.msrb.mxu3 %v2013_v32  ;;  %2092 = vmatpush.bf16.msra.mxu0 %v2020_v36 }
 0x7a5   : > { %v2011_v38 = vsel %vm2006_vm4, %v1959_v8, %v1961_v29  ;;  %v2012_v62 = vsel %vm2006_vm4, %v1961_v29, %v4022_v3 }
 0x7a8   : > { %2058 = vmatpush.bf16.msrb.mxu3 %v2011_v38 }
 0x7aa   : > { %v1981_v40 = vpop.permute.xlu2 %1980 }
 0x7ab   : > { %v2018_v42 = vsel %vm2006_vm4, %v1979_v31, %v1981_v40  ;;  %v1949_v22 = vpop.permute.xlu0 %1948 }
 0x7ac   : > { %v2003_v44 = vpop.permute.xlu1 %2002  ;;  %2059 = vmatpush.bf16.msrb.mxu3 %v2009_v41  ;;  %2093 = vmatpush.bf16.msra.mxu0 %v2018_v42  ;;  %v2007_v50 = vsel %vm2006_vm4, %v1947_v45, %v1949_v22  ;;  %v2736_v45 = vld [vmem:[%s4166_s3 + $0x70] sm:$0xf] }
 0x7ad   : > { %v2025_v49 = vsel %vm2006_vm4, %v2001_v28, %v2003_v44  ;;  %v2737_v19 = vor.u32 %v2857_v63, %v2736_v45 }
 0x7ae   : > { %2078 = vmatpush.bf16.msrb.mxu2 %v2025_v49 }
 0x7b0   : > { %2060 = vmatpush.bf16.msrb.mxu3 %v2007_v50 }
 0x7b2   : > { %v1975_v35 = vpop.permute.xlu2 %1974 }
 0x7b3   : > { %v2016_v30 = vsel %vm2006_vm4, %v1973_v37, %v1975_v35  ;;  %2061 = vmatmul.bf16.vlgmr.msrb.gmra.mxu3 %v2729_v51  ;;  %v1997_v34 = vpop.permute.xlu0 %1996 }
 0x7b4   : > { %v1957_v9 = vpop.permute.xlu1 %1956  ;;  %2094 = vmatpush.bf16.msra.mxu0 %v2016_v30 }
 0x7b5   : > { %v2010_v1 = vsel %vm2006_vm4, %v4020_v27, %v1957_v9  ;;  %v2738_v27 = vld [vmem:[%s4166_s3 + $0x78] sm:$0xf0] }
 0x7b6   : > { %v2741_v5 = vor.u32 %v2856_v4, %v2738_v27 }
 0x7b8   : > { %2095 = vmatpush.bf16.msra.mxu0 %v2014_v56 }
 0x7ba   : > { %v1995_v48 = vpop.permute.xlu2 %1994 }
 0x7bb   : > { %v2023_v61 = vsel %vm2006_vm4, %v1995_v48, %v1997_v34  ;;  %v1999_v0 = vpop.permute.xlu0 %1998 }
 0x7bc   : > { %v2005_v33 = vpop.permute.xlu1 %2004  ;;  %2079 = vmatpush.bf16.msrb.mxu2 %v2023_v61  ;;  %2096 = vmatpush.bf16.msra.mxu0 %v2012_v62  ;;  %v2024_v3 = vsel %vm2006_vm4, %v1997_v34, %v1999_v0 }
 0x7bd   : > { %v2026_v39 = vsel %vm2006_vm4, %v2003_v44, %v2005_v33 }
 0x7be   : > { %2116 = vmatpush.bf16.msra.mxu1 %v2026_v39 }
 0x7bf   : > { %2742 = vmatmul.msk.bf16.vlgmr.msrb.gmra.mxu2 %vm767_vm12, %v2733_v6 }
 0x7c0   : > { %2097 = vmatpush.bf16.msra.mxu0 %v2010_v1 }
 0x7c2   : > { %2117 = vmatpush.bf16.msra.mxu1 %v2024_v3  ;;  %v1951_v43 = vpop.permute.xlu2 %1950 }
 0x7c3   : > { %v2008_v31 = vsel %vm2006_vm4, %v1949_v22, %v1951_v43  ;;  %2066 = vmatmul.bf16.gmra.mxu3 %v2737_v19  ;;  %v1921_v44 = vpop.permute.xlu0 %1920 }
 0x7c4   : > { %2098 = vmatpush.bf16.msra.mxu0 %v2008_v31  ;;  %v1911_v37 = vpop.permute.xlu1 %1910 }
 0x7c5   : > { %2744 = vmatmul.msk.bf16.vlgmr.msra.gmra.mxu1 %vm767_vm12, %v2733_v6 }
 0x7c7   : > { %2099 = vmatmul.bf16.vlgmr.msra.gmra.mxu0 %v2729_v51 }
 0x7ca   : > { %v1916_v28 = vpop.permute.xlu2 %1915 }
 0x7cc   : > { %v1926_v48 = vpop.permute.xlu1 %1925 }
 0x7cf   : > { %2743 = vmatmul.msk.bf16.gmra.mxu2 %vm767_vm12, %v2741_v5 }
 0x7d5   : > { %2745 = vmatmul.msk.bf16.gmra.mxu1 %vm767_vm12, %v2741_v5 }
 0x7d7   : > { %2104 = vmatmul.bf16.gmra.mxu0 %v2737_v19 }
 0x836   : > { %v2062_v55 = vpop.f32.mrf.mxu3 }
 0x837   : > { %v2063_v17 = vadd.f32 %v2062_v55, %v1911_v37 }
 0x83e   : > { %v2064_v7 = vpop.f32.mrf.mxu3 }
 0x83f   : > { %v2065_v36 = vadd.f32 %v2064_v7, %v1916_v28 }
 0x842   : > { %v2119_v8 = vpop.f32.mrf.mxu1  ;;  %v2081_v11 = vpop.f32.mrf.mxu2 }
 0x843   : > { %v2082_v14 = vadd.f32 %v2081_v11, %v2063_v17 }
 0x844   : > { %v2100_v15 = vpop.f32.mrf.mxu0 }
 0x845   : > { %v2101_v20 = vadd.f32 %v2100_v15, %v1911_v37  ;;  %v2129_v24 = vmax.f32 %v2082_v14, 0.0 }
 0x846   : > { %v2067_v46 = vpop.f32.mrf.mxu3 }
 0x847   : > { %v2120_v32 = vadd.f32 %v2119_v8, %v2101_v20  ;;  %v2137_v38 = vadd.f32 %v2129_v24, %v3902_v12  ;;  %v2068_v35 = vadd.f32 %v2067_v46, %v1921_v44 }
 0x849   : > { %v2130_v29 = vmax.f32 %v2120_v32, 0.0 }
 0x84a   : > { %v2121_v40 = vpop.f32.mrf.mxu1  ;;  %v2083_v41 = vpop.f32.mrf.mxu2 }
 0x84b   : > { %v2138_v42 = vadd.f32 %v2130_v29, %v3905_v21  ;;  %v2084_v22 = vadd.f32 %v2083_v41, %v2065_v36 }
 0x84c   : > { %v2102_v47 = vpop.f32.mrf.mxu0 }
 0x84d   : > { %v2145_v49 = vpack.c.bf16 %v2138_v42, %v2137_v38  ;;  %v2103_v50 = vadd.f32 %v2102_v47, %v1916_v28  ;;  %v2131_v51 = vmax.f32 %v2084_v22, 0.0 }
 0x84e   : > { %v2069_v60 = vpop.f32.mrf.mxu3 }
 0x84f   : > { %2149 = vst [vmem:[#allocation3 + $0x4] sm:$0xff] %v2145_v49  ;;  %v2122_v52 = vadd.f32 %v2121_v40, %v2103_v50  ;;  %v2139_v34 = vadd.f32 %v2131_v51, %v3910_v18  ;;  %v2070_v33 = vadd.f32 %v2069_v60, %v1926_v48 }
 0x851   : > { %v2132_v30 = vmax.f32 %v2122_v52, 0.0 }
 0x852   : > { %v2086_v9 = vpop.f32.mrf.mxu2  ;;  %v2124_v57 = vpop.f32.mrf.mxu1 }
 0x853   : > { %v2140_v12 = vadd.f32 %v2132_v30, %v3913_v23  ;;  %v2087_v56 = vadd.f32 %v2086_v9, %v2068_v35 }
 0x854   : > { %v2105_v58 = vpop.f32.mrf.mxu0 }
 0x855   : > { %v2146_v21 = vpack.c.bf16 %v2140_v12, %v2139_v34  ;;  %v2133_v59 = vmax.f32 %v2087_v56, 0.0  ;;  %v2106_v26 = vadd.f32 %v2105_v58, %v1921_v44 }
 0x857   : > { %2150 = vst [vmem:[#allocation3 + $0x14] sm:$0xff] %v2146_v21  ;;  %v2125_v61 = vadd.f32 %v2124_v57, %v2106_v26  ;;  %v2141_v62 = vadd.f32 %v2133_v59, %v3918_v54  ;;  %v2156_v54 = vunpack.c.l.bf16 (%p3341_p8), %v2145_v49  ;;  %v2158_v5 = vunpack.c.l.bf16 (%p3341_p8), %v2146_v21 }
 0x858   : > { %v2159_v55 = vunpack.c.h.bf16 (%p3341_p8), %v2146_v21 }
 0x859   : > { %v2134_v6 = vmax.f32 %v2125_v61, 0.0  ;;  %v2166_v11 = vmul.f32 (%p3341_p8), %v3348_v13, %v2156_v54 }
 0x85a   : > { %v2088_v45 = vpop.f32.mrf.mxu2  ;;  %v2126_v1 = vpop.f32.mrf.mxu1 }
 0x85b   : > { %v2142_v63 = vadd.f32 %v2134_v6, %v3921_v10  ;;  %v2089_v18 = vadd.f32 %v2088_v45, %v2070_v33  ;;  %v2157_v10 = vunpack.c.h.bf16 (%p3341_p8), %v2145_v49 }
 0x85c   : > { %v2107_v39 = vpop.f32.mrf.mxu0 }
 0x85d   : > { %v2147_v23 = vpack.c.bf16 %v2142_v63, %v2141_v62  ;;  %v2108_v0 = vadd.f32 %v2107_v39, %v1926_v48  ;;  %v2135_v19 = vmax.f32 %v2089_v18, 0.0  ;;  %v2167_v14 = vmul.f32 (%p3341_p8), %v3352_v16, %v2157_v10 }
 0x85f   : > { %2151 = vst [vmem:[#allocation3 + $0x24] sm:$0xff] %v2147_v23  ;;  %v2127_v3 = vadd.f32 %v2126_v1, %v2108_v0  ;;  %v2143_v31 = vadd.f32 %v2135_v19, %v3926_v25  ;;  %v2160_v37 = vunpack.c.l.bf16 (%p3341_p8), %v2147_v23  ;;  %v2161_v17 = vunpack.c.h.bf16 (%p3341_p8), %v2147_v23 }
 0x860   : > { %v2168_v25 = vmul.f32 (%p3341_p8), %v3348_v13, %v2158_v5  ;;  %v2174_v32 = vpack.c.bf16 (%p3341_p8), %v2167_v14, %v2166_v11 }
 0x861   : > { %v2136_v43 = vmax.f32 %v2127_v3, 0.0  ;;  %v2170_v15 = vmul.f32 (%p3341_p8), %v3348_v13, %v2160_v37  ;;  %v2171_v20 = vmul.f32 (%p3341_p8), %v3352_v16, %v2161_v17 }
 0x862   : > { %2178 = vst [vmem:[#allocation3 + $0x4] sm:$0xff] (%p3341_p8), %v2174_v32 }
 0x863   : > { %v2144_v4 = vadd.f32 %v2136_v43, %v3929_v53  ;;  %2155 = sbr.rel (!%p3341_p8) target bundleno = 2158 (0x86e), region = 72  ;;  %v2169_v53 = vmul.f32 (%p3341_p8), %v3352_v16, %v2159_v55  ;;  %v2176_v29 = vpack.c.bf16 (%p3341_p8), %v2171_v20, %v2170_v15 }
 0x865   : > { %v2148_v27 = vpack.c.bf16 %v2144_v4, %v2143_v31  ;;  %v2175_v36 = vpack.c.bf16 (%p3341_p8), %v2169_v53, %v2168_v25  ;;  %2180 = vst [vmem:[#allocation3 + $0x24] sm:$0xff] (%p3341_p8), %v2176_v29 }
 0x867   : > { %2152 = vst [vmem:[#allocation3 + $0x34] sm:$0xff] %v2148_v27  ;;  %v2162_v7 = vunpack.c.l.bf16 (%p3341_p8), %v2148_v27  ;;  %v2163_v8 = vunpack.c.h.bf16 (%p3341_p8), %v2148_v27 }
 0x868   : > { %2179 = vst [vmem:[#allocation3 + $0x14] sm:$0xff] %v2175_v36 }
 0x869   : > { %v2172_v24 = vmul.f32 %v3348_v13, %v2162_v7  ;;  %v2173_v28 = vmul.f32 %v3352_v16, %v2163_v8 }
 0x86b   : > { %v2177_v38 = vpack.c.bf16 %v2173_v28, %v2172_v24 }
 0x86d   : > { %2181 = vst [vmem:[#allocation3 + $0x34] sm:$0xff] %v2177_v38 }
 0x86e PF: > { %2974 = vset.pattern.permute.xlu2 %v3131_v2  ;;  %2975 = vset.pattern.permute.xlu0 %v3131_v2  ;;  %s3149_s29 = smov 104   ;;  %v2187_v2 = vld [vmem:[%s4169_s6] sm:$0xff]  ;;  %vm2217_vm5 = vcmask 850944   ;;  %s2862_s10 = smul.u32 3, %s3112_s28 }
 0x86f   : > { %v2748_v22 = vld [vmem:[#allocation3 + $0x4] sm:$0xf]  ;;  %v2858_v47 = vld [vmem:[#allocation3 + $0x8] sm:$0xf]  ;;  %2190 = vperm.xlu2 %2974, %v2187_v2   ;;  %v2186_v56 = vld [vmem:[%s4168_s5] sm:$0xf] }
 0x870   : > { %s2250_s12 = sadd.s32 %s3108_s27, %s2862_s10  ;;  %s4194_s9 = scalar_lea.vmem [#allocation5], %s3265_s21 }
 0x871   : > { %s2764_s17 = sshll.u32 %s2250_s12, 3  ;;  %s2254_s26 = sshll.u32 %s4194_s9, 4  ;;  %s2255_s26 = int_to_ptr.vmem [resolvable:$true] %s2254_s26 }
 0x872   : > { %v2756_v40 = vld [vmem:[#allocation3 + $0x24] sm:$0xf]  ;;  %v2860_v16 = vld [vmem:[#allocation3 + $0x28] sm:$0xf]  ;;  %s2252_s18 = scalar_lea.hbm %s4170_s7, %s2764_s17  ;;  %s4195_s23 = smov %s4194_s9 }
 0x873   : > { %s2256_s11 = sshll.u32 %s2252_s18, 4  ;;  %s4196_s22 = sand.u32 1, %s3100_s25   ;;  %s2257_s11 = int_to_ptr.hbm [resolvable:$true] %s2256_s11 }
 0x874   : > { %v2861_v41 = vld [vmem:[#allocation3 + $0x30] sm:$0xf0]  ;;  %v2758_v46 = vld [vmem:[#allocation3 + $0x34] sm:$0xf0]  ;;  %s2240_s15 = scalar_lea.sflag [#allocation6], %s4196_s22  ;;  %s3042_s28 = sshra.s32 %s2257_s11, 4  ;;  %s3043_s28 = int_to_ptr.hbm [resolvable:$true] %s3042_s28 }
 0x875   : > { %v2757_v42 = vor.u32 %v2861_v41, %v2756_v40  ;;  %v2859_v13 = vld [vmem:[#allocation3 + $0x10] sm:$0xf0]  ;;  %v2750_v49 = vld [vmem:[#allocation3 + $0x14] sm:$0xf0]  ;;  %v2761_v50 = vor.u32 %v2860_v16, %v2758_v46  ;;  %s3044_s27 = scalar_lea.hbm %s3043_s28, 8  ;;  %s3048_s16 = scalar_lea.hbm %s4170_s7, 48 }
 0x876   : > { %v2749_v44 = vor.u32 %v2859_v13, %v2748_v22  ;;  %v2753_v51 = vor.u32 %v2858_v47, %v2750_v49  ;;  %p3045_p7 = scmp.ne.s32.totalorder %s3043_s28, %s3044_s27  ;;  %p3049_p1 = scmp.lt.s32.totalorder %s3043_s28, %s4170_s7 }
 0x877   : > { %2213 = vrot.lane.b32.xlu0 %v2757_v42, %s3149_s29  ;;  %p3050_p2 = scmp.lt.s32.totalorder %s3048_s16, %s3044_s27 }
 0x878   : > { %2209 = vrot.lane.b32.xlu1 %v2749_v44, %s3149_s29  ;;  %p3046_p13 = pnand %p3045_p7, %p3241_p3 }
 0x879   : > { %p3051_p4 = por %p3050_p2, %p3049_p1 }
 0x87a   : > { %p3047_p0 = pneg %p3046_p13 }
 0x87c   : > { %p3052_p5 = pnand %p3051_p4, %p3047_p0 }
 0x87f   : > { %2215 = vrot.lane.b32.xlu0 %v2761_v50, %s3149_s29 }
 0x880   : > { %2211 = vrot.lane.b32.xlu1 %v2753_v51, %s3149_s29 }
 0x8c9   : > { %v2191_v57 = vpop.permute.xlu2 %2190 }
 0x8e9   : > { %v2214_v52 = vpop.permute.xlu0 %2213 }
 0x8ea   : > { %v2210_v35 = vpop.permute.xlu1 %2209 }
 0x8f1   : > { %v2216_v30 = vpop.permute.xlu0 %2215 }
 0x8f2   : > { %v2219_v9 = vsel %vm2217_vm5, %v2214_v52, %v2216_v30  ;;  %v2212_v34 = vpop.permute.xlu1 %2211 }
 0x8f3   : > { %2231 = vmatpush.bf16.msra.mxu3 %v2219_v9  ;;  %v2218_v12 = vsel %vm2217_vm5, %v2210_v35, %v2212_v34 }
 0x8f7   : > { %2232 = vmatpush.bf16.msra.mxu3 %v2218_v12 }
 0x8fa   : > { %2762 = vmatmul.msk.bf16.vlgmr.msra.gmra.mxu3 %vm767_vm12, %v2186_v56 }
 0x97d   : > { %v2234_v58 = vpop.f32.mrf.mxu3 }
 0x97e   : > { %v2235_v21 = vadd.f32 %v2234_v58, %v2191_v57 }
 0x980   : > { %2238 = vst [vmem:[%s4195_s23] sm:$0xff] %v2235_v21 }
 0x981   : > { %3055 = shalt.err (!%p3052_p5)
}
 0x982   : > { %2865 = dma.vmem_to_hbm [thread:$0]  (%p3241_p3), %s2255_s26, 128, %s2257_s11, %s2240_s15  }
 0x985   : > { %v2236_v59 = vpop.f32.mrf.mxu3 }
 0x986 PF: > { %s4197_s21 = sld [smem:[#allocation15_spill]] }
 0x987   : > { %s4198_s13 = sld [smem:[#allocation11_spill]] }
 0x988   : > { %s4199_s10 = sld [smem:[#allocation18_spill]] }
 0x98c   : > { %p2872_p6 = scmp.ge.s32.totalorder %s4197_s21, 2 }
 0x98d   : > { %s2268_s12 = sand.u32 1, %s4198_s13  }
 0x98e   : > { %p4200_p9 = scmp.ne.s32.totalorder %s4199_s10, 0  ;;  %s2269_s17 = scalar_lea.sflag [#allocation6], %s2268_s12 }
 0x990   : > { %p2868_p10 = pnand %p2872_p6, %p4200_p9 }
 0x992   : > { %p2869_p11 = pneg %p2868_p10 }
 0x994   : > { %3091 = dma.done.wait (%p2869_p11), %s2269_s17, 128  }
 0x995   : > { %3093 = vsyncadd (%p2869_p11), %s2269_s17, 4294967168  ;;  %s20_s8 = sadd.s32 1, %s4197_s21   ;;  %s4201_s18 = sld [smem:[#allocation12_spill]] }
 0x996   : > { %p17_p12 = scmp.ge.s32.totalorder %s20_s8, 8   ;;  %s4202_s26 = sld [smem:[#allocation19_spill]] }
 0x997   : > { %s4203_s27 = sld [smem:[#allocation13_spill]]  ;;  %s4207_s24 = smov %s3100_s25 }
 0x998   : > { %s4204_s28 = sld [smem:[#allocation14_spill]]  ;;  %19 = sbr.rel (!%p17_p12) target bundleno = 5 (0x5), region = 117 }
 0x999   : > { %s4205_s29 = sld [smem:[#allocation16_spill]] }
 0x99a   : > { %s4206_s30 = sld [smem:[#allocation17_spill]] }
 0x99b   : > { %s4208_s25 = smov %s4201_s18 }
 0x99d   :  { %2275 = vsyncpa [#allocation6], 1 }
 0x99e   :  { %2277 = vsyncpa [#allocation6 + $0x1], 1 }
 0x99f   :  { %2278 = vsyncmov [#allocation4] }
 0x9a2   :  { %s2279_s14 = vpop.sfrf %2278 }
 0x9a3   :  { %p2767_p3 = scmp.ne.s32.totalorder %s2279_s14, 0 }
 0x9a5   :  { %2283 = shalt.err (%p2767_p3)  }
 0x9a6   :  { %2285 = vsyncmov [#allocation4 + $0x1] }
 0x9a9   :  { %s2286_s9 = vpop.sfrf %2285 }
 0x9aa   :  { %p2768_p8 = scmp.ne.s32.totalorder %s2286_s9, 0 }
 0x9ac   :  { %2290 = shalt.err (%p2768_p8)  }

</bundles_post_ra>
